<compile_context>
chip_gen: v5e
topology: v5e:2x2
jax: 0.10.0
libtpu: 0.0.40
codegen_flags: <defaults>
</compile_context>

<pallas_src>
import jax
import jax.numpy as jnp
import numpy as np
from jax.experimental import pallas as pl
from jax.experimental.pallas import tpu as pltpu


# ---------------------------- fused Pallas kernel ----------------------------

def _conv_bn_relu(pad_ref, w_ref, gamma, beta, Ho, Wo, M):
    """3x3 SAME conv as ONE MXU dot over an in-vreg im2col slab, then BN(train)+ReLU."""
    cin = pad_ref.shape[-1]
    taps = []
    for dy in range(3):                         # static unroll: 9 shifted window loads
        for dx in range(3):
            patch = pad_ref[:, dy:dy + Ho, dx:dx + Wo, :]        # (N, Ho, Wo, Cin) bf16
            taps.append(patch.reshape(M, cin))
    slab = jnp.concatenate(taps, axis=1)                          # (M, 9*Cin) bf16
    y = jnp.dot(slab, w_ref[...], preferred_element_type=jnp.float32)   # single MXU dot
    # batch stats over all M = N*Ho*Wo rows (single pass; fine at this scale,
    # switch to two-pass/Welford when M is grid-tiled)
    mean = jnp.mean(y, axis=0, keepdims=True)
    var = jnp.mean(y * y, axis=0, keepdims=True) - mean * mean
    scale = gamma * jax.lax.rsqrt(var + 1e-5)
    shift = beta - mean * scale
    return jnp.maximum(y * scale + shift, 0.0)                    # BN + ReLU, f32


def _down_kernel(x_ref, w1_ref, w2_ref, gb_ref, o_ref, pad1_ref, pad2_ref):
    NHo, _, Wo, two_cin = x_ref.shape            # x view: (N*Ho, 2, Wo, 2*Cin)
    cin = two_cin // 2
    n_b = pad1_ref.shape[0]
    Ho = NHo // n_b
    cout = o_ref.shape[0] // n_b                 # o_ref: (N*Cout, Ho*Wo)
    HW = o_ref.shape[1]
    M = n_b * HW                                 # = N*Ho*Wo output pixels

    # ---- 2x2 max-pool, entirely in-kernel (free wrapper view, no strided HBM gather)
    x = x_ref[...]
    a = jnp.maximum(x[:, 0], x[:, 1])                       # max over the 2 pool rows
    pooled = jnp.maximum(a[:, :, :cin], a[:, :, cin:])      # max over the 2 pool cols
    pooled = pooled.reshape(n_b, Ho, Wo, cin).astype(pad1_ref.dtype)   # bf16 staging

    # ---- stage pooled act into a zero-HALO'd padded VMEM tile (no full memset) ----
    zrow1 = jnp.zeros((n_b, 1, Wo + 2, cin), pad1_ref.dtype)
    zcol1 = jnp.zeros((n_b, Ho, 1, cin), pad1_ref.dtype)
    pad1_ref[:, 0:1, :, :] = zrow1
    pad1_ref[:, Ho + 1:Ho + 2, :, :] = zrow1
    pad1_ref[:, 1:Ho + 1, 0:1, :] = zcol1
    pad1_ref[:, 1:Ho + 1, Wo + 1:Wo + 2, :] = zcol1
    pad1_ref[:, 1:Ho + 1, 1:Wo + 1, :] = pooled

    # packed BN affine params: rows = [gamma1, beta1, gamma2, beta2]
    g1 = gb_ref[0:1, :]; t1 = gb_ref[1:2, :]
    g2 = gb_ref[2:3, :]; t2 = gb_ref[3:4, :]

    # ---- conv1 + BN + ReLU (conv bias dropped: cancels in BN mean subtraction) ----
    y1 = _conv_bn_relu(pad1_ref, w1_ref, g1, t1, Ho, Wo, M)        # (M, Cout) f32

    # ---- stage y1 into the second halo'd tile (bf16), y1 never leaves VMEM ----
    zrow2 = jnp.zeros((n_b, 1, Wo + 2, cout), pad2_ref.dtype)
    zcol2 = jnp.zeros((n_b, Ho, 1, cout), pad2_ref.dtype)
    pad2_ref[:, 0:1, :, :] = zrow2
    pad2_ref[:, Ho + 1:Ho + 2, :, :] = zrow2
    pad2_ref[:, 1:Ho + 1, 0:1, :] = zcol2
    pad2_ref[:, 1:Ho + 1, Wo + 1:Wo + 2, :] = zcol2
    pad2_ref[:, 1:Ho + 1, 1:Wo + 1, :] = y1.reshape(n_b, Ho, Wo, cout).astype(pad2_ref.dtype)

    # ---- conv2 + BN + ReLU ----
    y2 = _conv_bn_relu(pad2_ref, w2_ref, g2, t2, Ho, Wo, M)        # (M, Cout) f32

    # ---- lane-dense NCHW-compatible store: (Cout, M), per-batch row blocks ----
    y2t = jnp.transpose(y2)                                        # (Cout, M)
    for nb in range(n_b):
        o_ref[nb * cout:(nb + 1) * cout, :] = y2t[:, nb * HW:(nb + 1) * HW]


# ---------------------------- wrapper ----------------------------

def down_forward(x_nchw, params):
    """Forward of `down(in_ch, out_ch)`: MaxPool2d(2) -> double_conv."""
    N, Cin, H, W = x_nchw.shape
    Cout = params["w1"].shape[0]
    assert H % 2 == 0 and W % 2 == 0, "MaxPool2d(2) requires even spatial dims"
    Ho, Wo = H // 2, W // 2
    HW = Ho * Wo

    # TODO(synk): have the producer emit NHWC at production sizes (this transpose is a
    # full HBM round trip of x; negligible at the demo shape).
    x = jnp.transpose(x_nchw, (0, 2, 3, 1))
    xv = x.reshape(N * Ho, 2, Wo, 2 * Cin)        # FREE view: pool rows/cols in-kernel

    # weights OIHW -> tap-major im2col matrices (9*Cin, Cout), staged in bf16
    w1m = jnp.transpose(params["w1"], (2, 3, 1, 0)).reshape(9 * Cin, Cout).astype(jnp.bfloat16)
    w2m = jnp.transpose(params["w2"], (2, 3, 1, 0)).reshape(9 * Cout, Cout).astype(jnp.bfloat16)
    # BN affine params packed into ONE input (single DMA); conv biases intentionally
    # NOT passed: they cancel exactly in training-mode BatchNorm.
    gb = jnp.stack([params["g1"], params["beta1"],
                    params["g2"], params["beta2"]], axis=0).astype(jnp.float32)

    out = pl.pallas_call(
        _down_kernel,
        out_shape=jax.ShapeDtypeStruct((N * Cout, HW), jnp.float32),
        grid=(1,),
        in_specs=[
            pl.BlockSpec((N * Ho, 2, Wo, 2 * Cin), lambda i: (0, 0, 0, 0)),
            pl.BlockSpec((9 * Cin, Cout), lambda i: (0, 0)),
            pl.BlockSpec((9 * Cout, Cout), lambda i: (0, 0)),
            pl.BlockSpec((4, Cout), lambda i: (0, 0)),
        ],
        out_specs=pl.BlockSpec((N * Cout, HW), lambda i: (0, 0)),
        scratch_shapes=[
            pltpu.VMEM((N, Ho + 2, Wo + 2, Cin), jnp.bfloat16),    # padded pooled act
            pltpu.VMEM((N, Ho + 2, Wo + 2, Cout), jnp.bfloat16),   # padded conv1 output
        ],
        compiler_params=pltpu.CompilerParams(
            dimension_semantics=("arbitrary",)),
    )(xv, w1m, w2m, gb)

    # (N*Cout, Ho*Wo) -> NCHW is a pure reshape: no post-kernel transpose / HBM round trip.
    return out.reshape(N, Cout, Ho, Wo)


# ---------------------------- pure-JAX reference ----------------------------

def _ref_conv_bn_relu(x, w, b, g, beta):
    y = jax.lax.conv_general_dilated(
        x, w, window_strides=(1, 1), padding="SAME",
        dimension_numbers=("NCHW", "OIHW", "NCHW"),
        precision=jax.lax.Precision.HIGHEST)
    y = y + b[None, :, None, None]          # reference keeps the conv bias (it cancels)
    mean = jnp.mean(y, axis=(0, 2, 3), keepdims=True)
    var = jnp.mean((y - mean) ** 2, axis=(0, 2, 3), keepdims=True)
    y = (y - mean) / jnp.sqrt(var + 1e-5)
    y = y * g[None, :, None, None] + beta[None, :, None, None]
    return jnp.maximum(y, 0.0)


def down_reference(x_nchw, params):
    x = jax.lax.reduce_window(x_nchw, -jnp.inf, jax.lax.max,
                              (1, 1, 2, 2), (1, 1, 2, 2), "VALID")
    x = _ref_conv_bn_relu(x, params["w1"], params["b1"], params["g1"], params["beta1"])
    x = _ref_conv_bn_relu(x, params["w2"], params["b2"], params["g2"], params["beta2"])
    return x


# ---------------------------- main ----------------------------

if __name__ == "__main__":
    in_ch, out_ch = 4, 8
    N, H, W = 2, 16, 16

    key = jax.random.PRNGKey(0)
    ks = jax.random.split(key, 9)
    params = {
        "w1": 0.1 * jax.random.normal(ks[0], (out_ch, in_ch, 3, 3), jnp.float32),
        "b1": 0.1 * jax.random.normal(ks[1], (out_ch,), jnp.float32),
        "g1": 1.0 + 0.1 * jax.random.normal(ks[2], (out_ch,), jnp.float32),
        "beta1": 0.1 * jax.random.normal(ks[3], (out_ch,), jnp.float32),
        "w2": 0.1 * jax.random.normal(ks[4], (out_ch, out_ch, 3, 3), jnp.float32),
        "b2": 0.1 * jax.random.normal(ks[5], (out_ch,), jnp.float32),
        "g2": 1.0 + 0.1 * jax.random.normal(ks[6], (out_ch,), jnp.float32),
        "beta2": 0.1 * jax.random.normal(ks[7], (out_ch,), jnp.float32),
    }
    x = jax.random.normal(ks[8], (N, in_ch, H, W), jnp.float32)

    out = jax.jit(down_forward)(x, params)
    out = jax.block_until_ready(out)
    assert out.shape == (N, out_ch, H // 2, W // 2), out.shape

    # Tolerance note: the kernel stages activations/weights in bf16 for single-pass MXU
    # matmuls (f32 accumulation, f32 BN/ReLU math) while the reference uses
    # Precision.HIGHEST f32 end-to-end; post-BN the outputs are O(1), so differences of
    # up to ~1e-2 are expected and 4e-2 is a safe but still meaningful bound.
    ref = down_reference(x, params)
    np.testing.assert_allclose(np.asarray(out), np.asarray(ref), rtol=4e-2, atol=4e-2)

    print("KERNEL_OK")
</pallas_src>

<mosaic_0001>
module attributes {stable_mosaic.version = 11 : i64} {
  func.func @_down_kernel(%arg0: i32, %arg1: memref<16x2x8x8xf32, #tpu.memory_space<vmem>>, %arg2: memref<36x8xbf16, #tpu.memory_space<vmem>>, %arg3: memref<72x8xbf16, #tpu.memory_space<vmem>>, %arg4: memref<4x8xf32, #tpu.memory_space<vmem>>, %arg5: memref<16x64xf32, #tpu.memory_space<vmem>>, %arg6: memref<2x10x10x4xbf16, #tpu.memory_space<vmem>>, %arg7: memref<2x10x10x8xbf16, #tpu.memory_space<vmem>>) attributes {dimension_semantics = [#tpu.dimension_semantics<arbitrary>], iteration_bounds = array<i64: 1>, scalar_prefetch = 0 : i64, scratch_operands = 2 : i64, tpu.core_type = #tpu.core_type<tc>, window_params = [{pipeline_mode = #tpu.pipeline_mode<synchronous>, transform_indices = @transform_0, window_bounds = array<i64: 16, 2, 8, 8>}, {pipeline_mode = #tpu.pipeline_mode<synchronous>, transform_indices = @transform_1, window_bounds = array<i64: 36, 8>}, {pipeline_mode = #tpu.pipeline_mode<synchronous>, transform_indices = @transform_2, window_bounds = array<i64: 72, 8>}, {pipeline_mode = #tpu.pipeline_mode<synchronous>, transform_indices = @transform_3, window_bounds = array<i64: 4, 8>}, {pipeline_mode = #tpu.pipeline_mode<synchronous>, transform_indices = @transform_4, window_bounds = array<i64: 16, 64>}]} {
    %c0 = arith.constant 0 : index
    %c0_0 = arith.constant 0 : index
    %c0_1 = arith.constant 0 : index
    %c0_2 = arith.constant 0 : index
    %0 = vector.load %arg1[%c0, %c0_0, %c0_1, %c0_2] : memref<16x2x8x8xf32, #tpu.memory_space<vmem>>, vector<16x2x8x8xf32>
    %1 = vector.extract_strided_slice %0 {offsets = [0, 0, 0, 0], sizes = [16, 1, 8, 8], strides = [1, 1, 1, 1]} : vector<16x2x8x8xf32> to vector<16x1x8x8xf32>
    %2 = vector.shape_cast %1 : vector<16x1x8x8xf32> to vector<16x8x8xf32>
    %3 = vector.extract_strided_slice %0 {offsets = [0, 1, 0, 0], sizes = [16, 1, 8, 8], strides = [1, 1, 1, 1]} : vector<16x2x8x8xf32> to vector<16x1x8x8xf32>
    %4 = vector.shape_cast %3 : vector<16x1x8x8xf32> to vector<16x8x8xf32>
    %5 = arith.maximumf %2, %4 : vector<16x8x8xf32>
    %6 = vector.extract_strided_slice %5 {offsets = [0, 0, 0], sizes = [16, 8, 4], strides = [1, 1, 1]} : vector<16x8x8xf32> to vector<16x8x4xf32>
    %7 = vector.extract_strided_slice %5 {offsets = [0, 0, 4], sizes = [16, 8, 4], strides = [1, 1, 1]} : vector<16x8x8xf32> to vector<16x8x4xf32>
    %8 = arith.maximumf %6, %7 : vector<16x8x4xf32>
    %9 = vector.shape_cast %8 : vector<16x8x4xf32> to vector<2x8x8x4xf32>
    %10 = arith.truncf %9 : vector<2x8x8x4xf32> to vector<2x8x8x4xbf16>
    %cst = arith.constant 0.000000e+00 : bf16
    %11 = vector.broadcast %cst : bf16 to vector<2x1x10x4xbf16>
    %cst_3 = arith.constant 0.000000e+00 : bf16
    %12 = vector.broadcast %cst_3 : bf16 to vector<2x8x1x4xbf16>
    %c0_4 = arith.constant 0 : index
    %c0_5 = arith.constant 0 : index
    %c0_6 = arith.constant 0 : index
    %c0_7 = arith.constant 0 : index
    %13 = vector.load %arg6[%c0_4, %c0_5, %c0_6, %c0_7] : memref<2x10x10x4xbf16, #tpu.memory_space<vmem>>, vector<2x1x10x4xbf16>
    tpu.vector_store %arg6[%c0_4, %c0_5, %c0_6, %c0_7], %11 {strides = array<i32>} : memref<2x10x10x4xbf16, #tpu.memory_space<vmem>>, vector<2x1x10x4xbf16>,
    %c0_8 = arith.constant 0 : index
    %c9 = arith.constant 9 : index
    %c0_9 = arith.constant 0 : index
    %c0_10 = arith.constant 0 : index
    %14 = vector.load %arg6[%c0_8, %c9, %c0_9, %c0_10] : memref<2x10x10x4xbf16, #tpu.memory_space<vmem>>, vector<2x1x10x4xbf16>
    tpu.vector_store %arg6[%c0_8, %c9, %c0_9, %c0_10], %11 {strides = array<i32>} : memref<2x10x10x4xbf16, #tpu.memory_space<vmem>>, vector<2x1x10x4xbf16>,
    %c0_11 = arith.constant 0 : index
    %c1 = arith.constant 1 : index
    %c0_12 = arith.constant 0 : index
    %c0_13 = arith.constant 0 : index
    %15 = vector.load %arg6[%c0_11, %c1, %c0_12, %c0_13] : memref<2x10x10x4xbf16, #tpu.memory_space<vmem>>, vector<2x8x1x4xbf16>
    tpu.vector_store %arg6[%c0_11, %c1, %c0_12, %c0_13], %12 {strides = array<i32>} : memref<2x10x10x4xbf16, #tpu.memory_space<vmem>>, vector<2x8x1x4xbf16>,
    %c0_14 = arith.constant 0 : index
    %c1_15 = arith.constant 1 : index
    %c9_16 = arith.constant 9 : index
    %c0_17 = arith.constant 0 : index
    %16 = vector.load %arg6[%c0_14, %c1_15, %c9_16, %c0_17] : memref<2x10x10x4xbf16, #tpu.memory_space<vmem>>, vector<2x8x1x4xbf16>
    tpu.vector_store %arg6[%c0_14, %c1_15, %c9_16, %c0_17], %12 {strides = array<i32>} : memref<2x10x10x4xbf16, #tpu.memory_space<vmem>>, vector<2x8x1x4xbf16>,
    %c0_18 = arith.constant 0 : index
    %c1_19 = arith.constant 1 : index
    %c1_20 = arith.constant 1 : index
    %c0_21 = arith.constant 0 : index
    %17 = vector.load %arg6[%c0_18, %c1_19, %c1_20, %c0_21] : memref<2x10x10x4xbf16, #tpu.memory_space<vmem>>, vector<2x8x8x4xbf16>
    tpu.vector_store %arg6[%c0_18, %c1_19, %c1_20, %c0_21], %10 {strides = array<i32>} : memref<2x10x10x4xbf16, #tpu.memory_space<vmem>>, vector<2x8x8x4xbf16>,
    %c0_22 = arith.constant 0 : index
    %c0_23 = arith.constant 0 : index
    %18 = vector.load %arg4[%c0_22, %c0_23] : memref<4x8xf32, #tpu.memory_space<vmem>>, vector<1x8xf32>
    %c1_24 = arith.constant 1 : index
    %c0_25 = arith.constant 0 : index
    %19 = vector.load %arg4[%c1_24, %c0_25] : memref<4x8xf32, #tpu.memory_space<vmem>>, vector<1x8xf32>
    %c2 = arith.constant 2 : index
    %c0_26 = arith.constant 0 : index
    %20 = vector.load %arg4[%c2, %c0_26] : memref<4x8xf32, #tpu.memory_space<vmem>>, vector<1x8xf32>
    %c3 = arith.constant 3 : index
    %c0_27 = arith.constant 0 : index
    %21 = vector.load %arg4[%c3, %c0_27] : memref<4x8xf32, #tpu.memory_space<vmem>>, vector<1x8xf32>
    %c0_28 = arith.constant 0 : index
    %c0_29 = arith.constant 0 : index
    %c0_30 = arith.constant 0 : index
    %c0_31 = arith.constant 0 : index
    %22 = vector.load %arg6[%c0_28, %c0_29, %c0_30, %c0_31] : memref<2x10x10x4xbf16, #tpu.memory_space<vmem>>, vector<2x8x8x4xbf16>
    %23 = vector.shape_cast %22 : vector<2x8x8x4xbf16> to vector<128x4xbf16>
    %c0_32 = arith.constant 0 : index
    %c0_33 = arith.constant 0 : index
    %c1_34 = arith.constant 1 : index
    %c0_35 = arith.constant 0 : index
    %24 = vector.load %arg6[%c0_32, %c0_33, %c1_34, %c0_35] : memref<2x10x10x4xbf16, #tpu.memory_space<vmem>>, vector<2x8x8x4xbf16>
    %25 = vector.shape_cast %24 : vector<2x8x8x4xbf16> to vector<128x4xbf16>
    %c0_36 = arith.constant 0 : index
    %c0_37 = arith.constant 0 : index
    %c2_38 = arith.constant 2 : index
    %c0_39 = arith.constant 0 : index
    %26 = vector.load %arg6[%c0_36, %c0_37, %c2_38, %c0_39] : memref<2x10x10x4xbf16, #tpu.memory_space<vmem>>, vector<2x8x8x4xbf16>
    %27 = vector.shape_cast %26 : vector<2x8x8x4xbf16> to vector<128x4xbf16>
    %c0_40 = arith.constant 0 : index
    %c1_41 = arith.constant 1 : index
    %c0_42 = arith.constant 0 : index
    %c0_43 = arith.constant 0 : index
    %28 = vector.load %arg6[%c0_40, %c1_41, %c0_42, %c0_43] : memref<2x10x10x4xbf16, #tpu.memory_space<vmem>>, vector<2x8x8x4xbf16>
    %29 = vector.shape_cast %28 : vector<2x8x8x4xbf16> to vector<128x4xbf16>
    %c0_44 = arith.constant 0 : index
    %c1_45 = arith.constant 1 : index
    %c1_46 = arith.constant 1 : index
    %c0_47 = arith.constant 0 : index
    %30 = vector.load %arg6[%c0_44, %c1_45, %c1_46, %c0_47] : memref<2x10x10x4xbf16, #tpu.memory_space<vmem>>, vector<2x8x8x4xbf16>
    %31 = vector.shape_cast %30 : vector<2x8x8x4xbf16> to vector<128x4xbf16>
    %c0_48 = arith.constant 0 : index
    %c1_49 = arith.constant 1 : index
    %c2_50 = arith.constant 2 : index
    %c0_51 = arith.constant 0 : index
    %32 = vector.load %arg6[%c0_48, %c1_49, %c2_50, %c0_51] : memref<2x10x10x4xbf16, #tpu.memory_space<vmem>>, vector<2x8x8x4xbf16>
    %33 = vector.shape_cast %32 : vector<2x8x8x4xbf16> to vector<128x4xbf16>
    %c0_52 = arith.constant 0 : index
    %c2_53 = arith.constant 2 : index
    %c0_54 = arith.constant 0 : index
    %c0_55 = arith.constant 0 : index
    %34 = vector.load %arg6[%c0_52, %c2_53, %c0_54, %c0_55] : memref<2x10x10x4xbf16, #tpu.memory_space<vmem>>, vector<2x8x8x4xbf16>
    %35 = vector.shape_cast %34 : vector<2x8x8x4xbf16> to vector<128x4xbf16>
    %c0_56 = arith.constant 0 : index
    %c2_57 = arith.constant 2 : index
    %c1_58 = arith.constant 1 : index
    %c0_59 = arith.constant 0 : index
    %36 = vector.load %arg6[%c0_56, %c2_57, %c1_58, %c0_59] : memref<2x10x10x4xbf16, #tpu.memory_space<vmem>>, vector<2x8x8x4xbf16>
    %37 = vector.shape_cast %36 : vector<2x8x8x4xbf16> to vector<128x4xbf16>
    %c0_60 = arith.constant 0 : index
    %c2_61 = arith.constant 2 : index
    %c2_62 = arith.constant 2 : index
    %c0_63 = arith.constant 0 : index
    %38 = vector.load %arg6[%c0_60, %c2_61, %c2_62, %c0_63] : memref<2x10x10x4xbf16, #tpu.memory_space<vmem>>, vector<2x8x8x4xbf16>
    %39 = vector.shape_cast %38 : vector<2x8x8x4xbf16> to vector<128x4xbf16>
    %40 = tpu.concatenate %23, %25, %27, %29, %31, %33, %35, %37, %39 in 1 : vector<128x4xbf16>, vector<128x4xbf16>, vector<128x4xbf16>, vector<128x4xbf16>, vector<128x4xbf16>, vector<128x4xbf16>, vector<128x4xbf16>, vector<128x4xbf16>, vector<128x4xbf16> -> vector<128x36xbf16>
    %c0_64 = arith.constant 0 : index
    %c0_65 = arith.constant 0 : index
    %41 = vector.load %arg2[%c0_64, %c0_65] : memref<36x8xbf16, #tpu.memory_space<vmem>>, vector<36x8xbf16>
    %cst_66 = arith.constant dense<0.000000e+00> : vector<128x8xf32>
    %42 = tpu.matmul %40, %41, %cst_66 {dimension_numbers = #tpu.dot_dimension_numbers<[1], [0], [0], [1], [0, 0, 1, 1], [], []>} : vector<128x36xbf16>, vector<36x8xbf16>, vector<128x8xf32> -> vector<128x8xf32>
    %cst_67 = arith.constant dense<0.000000e+00> : vector<8xf32>
    %43 = vector.multi_reduction <add>, %42, %cst_67 [0] : vector<128x8xf32> to vector<8xf32>
    %44 = vector.shape_cast %43 : vector<8xf32> to vector<1x8xf32>
    %cst_68 = arith.constant 1.280000e+02 : f32
    %45 = vector.broadcast %cst_68 : f32 to vector<1x8xf32>
    %46 = arith.divf %44, %45 : vector<1x8xf32>
    %47 = arith.mulf %42, %42 : vector<128x8xf32>
    %cst_69 = arith.constant dense<0.000000e+00> : vector<8xf32>
    %48 = vector.multi_reduction <add>, %47, %cst_69 [0] : vector<128x8xf32> to vector<8xf32>
    %49 = vector.shape_cast %48 : vector<8xf32> to vector<1x8xf32>
    %cst_70 = arith.constant 1.280000e+02 : f32
    %50 = vector.broadcast %cst_70 : f32 to vector<1x8xf32>
    %51 = arith.divf %49, %50 : vector<1x8xf32>
    %52 = arith.mulf %46, %46 : vector<1x8xf32>
    %53 = arith.subf %51, %52 : vector<1x8xf32>
    %cst_71 = arith.constant 9.99999974E-6 : f32
    %54 = vector.broadcast %cst_71 : f32 to vector<1x8xf32>
    %55 = arith.addf %53, %54 : vector<1x8xf32>
    %56 = math.rsqrt %55 : vector<1x8xf32>
    %57 = arith.mulf %18, %56 : vector<1x8xf32>
    %58 = arith.mulf %46, %57 : vector<1x8xf32>
    %59 = arith.subf %19, %58 : vector<1x8xf32>
    %60 = vector.broadcast %57 : vector<1x8xf32> to vector<128x8xf32>
    %61 = arith.mulf %42, %60 : vector<128x8xf32>
    %62 = vector.broadcast %59 : vector<1x8xf32> to vector<128x8xf32>
    %63 = arith.addf %61, %62 : vector<128x8xf32>
    %cst_72 = arith.constant 0.000000e+00 : f32
    %64 = vector.broadcast %cst_72 : f32 to vector<128x8xf32>
    %65 = arith.maximumf %63, %64 : vector<128x8xf32>
    %cst_73 = arith.constant 0.000000e+00 : bf16
    %66 = vector.broadcast %cst_73 : bf16 to vector<2x1x10x8xbf16>
    %cst_74 = arith.constant 0.000000e+00 : bf16
    %67 = vector.broadcast %cst_74 : bf16 to vector<2x8x1x8xbf16>
    %c0_75 = arith.constant 0 : index
    %c0_76 = arith.constant 0 : index
    %c0_77 = arith.constant 0 : index
    %c0_78 = arith.constant 0 : index
    %68 = vector.load %arg7[%c0_75, %c0_76, %c0_77, %c0_78] : memref<2x10x10x8xbf16, #tpu.memory_space<vmem>>, vector<2x1x10x8xbf16>
    tpu.vector_store %arg7[%c0_75, %c0_76, %c0_77, %c0_78], %66 {strides = array<i32>} : memref<2x10x10x8xbf16, #tpu.memory_space<vmem>>, vector<2x1x10x8xbf16>,
    %c0_79 = arith.constant 0 : index
    %c9_80 = arith.constant 9 : index
    %c0_81 = arith.constant 0 : index
    %c0_82 = arith.constant 0 : index
    %69 = vector.load %arg7[%c0_79, %c9_80, %c0_81, %c0_82] : memref<2x10x10x8xbf16, #tpu.memory_space<vmem>>, vector<2x1x10x8xbf16>
    tpu.vector_store %arg7[%c0_79, %c9_80, %c0_81, %c0_82], %66 {strides = array<i32>} : memref<2x10x10x8xbf16, #tpu.memory_space<vmem>>, vector<2x1x10x8xbf16>,
    %c0_83 = arith.constant 0 : index
    %c1_84 = arith.constant 1 : index
    %c0_85 = arith.constant 0 : index
    %c0_86 = arith.constant 0 : index
    %70 = vector.load %arg7[%c0_83, %c1_84, %c0_85, %c0_86] : memref<2x10x10x8xbf16, #tpu.memory_space<vmem>>, vector<2x8x1x8xbf16>
    tpu.vector_store %arg7[%c0_83, %c1_84, %c0_85, %c0_86], %67 {strides = array<i32>} : memref<2x10x10x8xbf16, #tpu.memory_space<vmem>>, vector<2x8x1x8xbf16>,
    %c0_87 = arith.constant 0 : index
    %c1_88 = arith.constant 1 : index
    %c9_89 = arith.constant 9 : index
    %c0_90 = arith.constant 0 : index
    %71 = vector.load %arg7[%c0_87, %c1_88, %c9_89, %c0_90] : memref<2x10x10x8xbf16, #tpu.memory_space<vmem>>, vector<2x8x1x8xbf16>
    tpu.vector_store %arg7[%c0_87, %c1_88, %c9_89, %c0_90], %67 {strides = array<i32>} : memref<2x10x10x8xbf16, #tpu.memory_space<vmem>>, vector<2x8x1x8xbf16>,
    %72 = vector.shape_cast %65 : vector<128x8xf32> to vector<2x8x8x8xf32>
    %73 = arith.truncf %72 : vector<2x8x8x8xf32> to vector<2x8x8x8xbf16>
    %c0_91 = arith.constant 0 : index
    %c1_92 = arith.constant 1 : index
    %c1_93 = arith.constant 1 : index
    %c0_94 = arith.constant 0 : index
    %74 = vector.load %arg7[%c0_91, %c1_92, %c1_93, %c0_94] : memref<2x10x10x8xbf16, #tpu.memory_space<vmem>>, vector<2x8x8x8xbf16>
    tpu.vector_store %arg7[%c0_91, %c1_92, %c1_93, %c0_94], %73 {strides = array<i32>} : memref<2x10x10x8xbf16, #tpu.memory_space<vmem>>, vector<2x8x8x8xbf16>,
    %c0_95 = arith.constant 0 : index
    %c0_96 = arith.constant 0 : index
    %c0_97 = arith.constant 0 : index
    %c0_98 = arith.constant 0 : index
    %75 = vector.load %arg7[%c0_95, %c0_96, %c0_97, %c0_98] : memref<2x10x10x8xbf16, #tpu.memory_space<vmem>>, vector<2x8x8x8xbf16>
    %76 = vector.shape_cast %75 : vector<2x8x8x8xbf16> to vector<128x8xbf16>
    %c0_99 = arith.constant 0 : index
    %c0_100 = arith.constant 0 : index
    %c1_101 = arith.constant 1 : index
    %c0_102 = arith.constant 0 : index
    %77 = vector.load %arg7[%c0_99, %c0_100, %c1_101, %c0_102] : memref<2x10x10x8xbf16, #tpu.memory_space<vmem>>, vector<2x8x8x8xbf16>
    %78 = vector.shape_cast %77 : vector<2x8x8x8xbf16> to vector<128x8xbf16>
    %c0_103 = arith.constant 0 : index
    %c0_104 = arith.constant 0 : index
    %c2_105 = arith.constant 2 : index
    %c0_106 = arith.constant 0 : index
    %79 = vector.load %arg7[%c0_103, %c0_104, %c2_105, %c0_106] : memref<2x10x10x8xbf16, #tpu.memory_space<vmem>>, vector<2x8x8x8xbf16>
    %80 = vector.shape_cast %79 : vector<2x8x8x8xbf16> to vector<128x8xbf16>
    %c0_107 = arith.constant 0 : index
    %c1_108 = arith.constant 1 : index
    %c0_109 = arith.constant 0 : index
    %c0_110 = arith.constant 0 : index
    %81 = vector.load %arg7[%c0_107, %c1_108, %c0_109, %c0_110] : memref<2x10x10x8xbf16, #tpu.memory_space<vmem>>, vector<2x8x8x8xbf16>
    %82 = vector.shape_cast %81 : vector<2x8x8x8xbf16> to vector<128x8xbf16>
    %c0_111 = arith.constant 0 : index
    %c1_112 = arith.constant 1 : index
    %c1_113 = arith.constant 1 : index
    %c0_114 = arith.constant 0 : index
    %83 = vector.load %arg7[%c0_111, %c1_112, %c1_113, %c0_114] : memref<2x10x10x8xbf16, #tpu.memory_space<vmem>>, vector<2x8x8x8xbf16>
    %84 = vector.shape_cast %83 : vector<2x8x8x8xbf16> to vector<128x8xbf16>
    %c0_115 = arith.constant 0 : index
    %c1_116 = arith.constant 1 : index
    %c2_117 = arith.constant 2 : index
    %c0_118 = arith.constant 0 : index
    %85 = vector.load %arg7[%c0_115, %c1_116, %c2_117, %c0_118] : memref<2x10x10x8xbf16, #tpu.memory_space<vmem>>, vector<2x8x8x8xbf16>
    %86 = vector.shape_cast %85 : vector<2x8x8x8xbf16> to vector<128x8xbf16>
    %c0_119 = arith.constant 0 : index
    %c2_120 = arith.constant 2 : index
    %c0_121 = arith.constant 0 : index
    %c0_122 = arith.constant 0 : index
    %87 = vector.load %arg7[%c0_119, %c2_120, %c0_121, %c0_122] : memref<2x10x10x8xbf16, #tpu.memory_space<vmem>>, vector<2x8x8x8xbf16>
    %88 = vector.shape_cast %87 : vector<2x8x8x8xbf16> to vector<128x8xbf16>
    %c0_123 = arith.constant 0 : index
    %c2_124 = arith.constant 2 : index
    %c1_125 = arith.constant 1 : index
    %c0_126 = arith.constant 0 : index
    %89 = vector.load %arg7[%c0_123, %c2_124, %c1_125, %c0_126] : memref<2x10x10x8xbf16, #tpu.memory_space<vmem>>, vector<2x8x8x8xbf16>
    %90 = vector.shape_cast %89 : vector<2x8x8x8xbf16> to vector<128x8xbf16>
    %c0_127 = arith.constant 0 : index
    %c2_128 = arith.constant 2 : index
    %c2_129 = arith.constant 2 : index
    %c0_130 = arith.constant 0 : index
    %91 = vector.load %arg7[%c0_127, %c2_128, %c2_129, %c0_130] : memref<2x10x10x8xbf16, #tpu.memory_space<vmem>>, vector<2x8x8x8xbf16>
    %92 = vector.shape_cast %91 : vector<2x8x8x8xbf16> to vector<128x8xbf16>
    %93 = tpu.concatenate %76, %78, %80, %82, %84, %86, %88, %90, %92 in 1 : vector<128x8xbf16>, vector<128x8xbf16>, vector<128x8xbf16>, vector<128x8xbf16>, vector<128x8xbf16>, vector<128x8xbf16>, vector<128x8xbf16>, vector<128x8xbf16>, vector<128x8xbf16> -> vector<128x72xbf16>
    %c0_131 = arith.constant 0 : index
    %c0_132 = arith.constant 0 : index
    %94 = vector.load %arg3[%c0_131, %c0_132] : memref<72x8xbf16, #tpu.memory_space<vmem>>, vector<72x8xbf16>
    %cst_133 = arith.constant dense<0.000000e+00> : vector<128x8xf32>
    %95 = tpu.matmul %93, %94, %cst_133 {dimension_numbers = #tpu.dot_dimension_numbers<[1], [0], [0], [1], [0, 0, 1, 1], [], []>} : vector<128x72xbf16>, vector<72x8xbf16>, vector<128x8xf32> -> vector<128x8xf32>
    %cst_134 = arith.constant dense<0.000000e+00> : vector<8xf32>
    %96 = vector.multi_reduction <add>, %95, %cst_134 [0] : vector<128x8xf32> to vector<8xf32>
    %97 = vector.shape_cast %96 : vector<8xf32> to vector<1x8xf32>
    %cst_135 = arith.constant 1.280000e+02 : f32
    %98 = vector.broadcast %cst_135 : f32 to vector<1x8xf32>
    %99 = arith.divf %97, %98 : vector<1x8xf32>
    %100 = arith.mulf %95, %95 : vector<128x8xf32>
    %cst_136 = arith.constant dense<0.000000e+00> : vector<8xf32>
    %101 = vector.multi_reduction <add>, %100, %cst_136 [0] : vector<128x8xf32> to vector<8xf32>
    %102 = vector.shape_cast %101 : vector<8xf32> to vector<1x8xf32>
    %cst_137 = arith.constant 1.280000e+02 : f32
    %103 = vector.broadcast %cst_137 : f32 to vector<1x8xf32>
    %104 = arith.divf %102, %103 : vector<1x8xf32>
    %105 = arith.mulf %99, %99 : vector<1x8xf32>
    %106 = arith.subf %104, %105 : vector<1x8xf32>
    %cst_138 = arith.constant 9.99999974E-6 : f32
    %107 = vector.broadcast %cst_138 : f32 to vector<1x8xf32>
    %108 = arith.addf %106, %107 : vector<1x8xf32>
    %109 = math.rsqrt %108 : vector<1x8xf32>
    %110 = arith.mulf %20, %109 : vector<1x8xf32>
    %111 = arith.mulf %99, %110 : vector<1x8xf32>
    %112 = arith.subf %21, %111 : vector<1x8xf32>
    %113 = vector.broadcast %110 : vector<1x8xf32> to vector<128x8xf32>
    %114 = arith.mulf %95, %113 : vector<128x8xf32>
    %115 = vector.broadcast %112 : vector<1x8xf32> to vector<128x8xf32>
    %116 = arith.addf %114, %115 : vector<128x8xf32>
    %cst_139 = arith.constant 0.000000e+00 : f32
    %117 = vector.broadcast %cst_139 : f32 to vector<128x8xf32>
    %118 = arith.maximumf %116, %117 : vector<128x8xf32>
    %119 = tpu.transpose %118, [1, 0] : vector<128x8xf32> -> vector<8x128xf32>
    %120 = vector.extract_strided_slice %119 {offsets = [0, 0], sizes = [8, 64], strides = [1, 1]} : vector<8x128xf32> to vector<8x64xf32>
    %c0_140 = arith.constant 0 : index
    %c0_141 = arith.constant 0 : index
    %121 = vector.load %arg5[%c0_140, %c0_141] : memref<16x64xf32, #tpu.memory_space<vmem>>, vector<8x64xf32>
    tpu.vector_store %arg5[%c0_140, %c0_141], %120 {strides = array<i32>} : memref<16x64xf32, #tpu.memory_space<vmem>>, vector<8x64xf32>,
    %122 = vector.extract_strided_slice %119 {offsets = [0, 64], sizes = [8, 64], strides = [1, 1]} : vector<8x128xf32> to vector<8x64xf32>
    %c8 = arith.constant 8 : index
    %c0_142 = arith.constant 0 : index
    %123 = vector.load %arg5[%c8, %c0_142] : memref<16x64xf32, #tpu.memory_space<vmem>>, vector<8x64xf32>
    tpu.vector_store %arg5[%c8, %c0_142], %122 {strides = array<i32>} : memref<16x64xf32, #tpu.memory_space<vmem>>, vector<8x64xf32>,
    return
  }
  func.func @transform_0(%arg0: i32) -> (i32, i32, i32, i32) {
    %c0_i32 = arith.constant 0 : i32
    %c0_i32_0 = arith.constant 0 : i32
    %c0_i32_1 = arith.constant 0 : i32
    %c0_i32_2 = arith.constant 0 : i32
    %c0_i32_3 = arith.constant 0 : i32
    return %c0_i32, %c0_i32_0, %c0_i32_1, %c0_i32_2 : i32, i32, i32, i32
  }
  func.func @transform_1(%arg0: i32) -> (i32, i32) {
    %c0_i32 = arith.constant 0 : i32
    %c0_i32_0 = arith.constant 0 : i32
    %c0_i32_1 = arith.constant 0 : i32
    return %c0_i32, %c0_i32_0 : i32, i32
  }
  func.func @transform_2(%arg0: i32) -> (i32, i32) {
    %c0_i32 = arith.constant 0 : i32
    %c0_i32_0 = arith.constant 0 : i32
    %c0_i32_1 = arith.constant 0 : i32
    return %c0_i32, %c0_i32_0 : i32, i32
  }
  func.func @transform_3(%arg0: i32) -> (i32, i32) {
    %c0_i32 = arith.constant 0 : i32
    %c0_i32_0 = arith.constant 0 : i32
    %c0_i32_1 = arith.constant 0 : i32
    return %c0_i32, %c0_i32_0 : i32, i32
  }
  func.func @transform_4(%arg0: i32) -> (i32, i32) {
    %c0_i32 = arith.constant 0 : i32
    %c0_i32_0 = arith.constant 0 : i32
    %c0_i32_1 = arith.constant 0 : i32
    return %c0_i32, %c0_i32_0 : i32, i32
  }
}

</mosaic_0001>

<bundles_post_ra>
// kernel: down_forward.1
= control target key start
LH: loop header
LB: loop body
LE: loop exit
PB: predicated region body
PF: predicated region fallthrough
CT: control target
= control target key end

     0   :  { %s5232_s21 = smov 124   ;;  %vm164_vm0 = vcmask 24576   ;;  %vm175_vm1 = vsmask.f32 256  ;;  %vm225_vm2 = vsmask.f32 7938  ;;  %s7522_s0 = inlined_call_operand.vmem [shape: f32[16,2,8,8], index: 0, kind: input, shape index: {}]   ;;  %s7523_s1 = inlined_call_operand.vmem [shape: bf16[36,8], index: 1, kind: input, shape index: {}]   ;;  %s7524_s3 = inlined_call_operand.vmem [shape: f32[4,8], index: 3, kind: input, shape index: {}]   ;;  %s7525_s2 = inlined_call_operand.vmem [shape: bf16[72,8], index: 2, kind: input, shape index: {}]   ;;  %s7526_s4 = inlined_call_operand.vmem [shape: f32[16,64], index: 4, kind: output, shape index: {}]  }
   0x1   :  { %v26_v0 = vld [vmem:[%s7522_s0 + $0x40] sm:$0xff]  ;;  %v27_v1 = vld [vmem:[%s7522_s0 + $0x48] sm:$0xff]  ;;  %v28_v2 = vld [vmem:[%s7522_s0 + $0x50] sm:$0xff]  ;;  %vm162_vm5 = vcmask 27648   ;;  %vm844_vm7 = vcmask 1042432   ;;  %vm845_vm8 = vcmask 1046532  }
   0x2   :  { %v29_v3 = vld [vmem:[%s7522_s0 + $0x58] sm:$0xff]  ;;  %v5284_v4 = vmax.f32 %v26_v0, %v27_v1  ;;  %v18_v5 = vld [vmem:[%s7522_s0] sm:$0xff]  ;;  %v19_v6 = vld [vmem:[%s7522_s0 + $0x8] sm:$0xff]  ;;  %vm2441_vm9 = vcmask 57344   ;;  %s5236_s29 = smov 8   ;;  %s5237_s30 = smov 20  }
   0x3   :  { %v5292_v7 = vmax.f32 %v28_v2, %v29_v3  ;;  %v20_v8 = vld [vmem:[%s7522_s0 + $0x10] sm:$0xff]  ;;  %v21_v9 = vld [vmem:[%s7522_s0 + $0x18] sm:$0xff]  ;;  %v5300_v10 = vmax.f32 %v18_v5, %v19_v6  ;;  %v30_v11 = vld [vmem:[%s7522_s0 + $0x60] sm:$0xff]  ;;  %s5238_s5 = smov 32   ;;  %vm569_vm11 = vsmask.f32 3328 }
   0x4   :  { %v5305_v12 = vmax.f32 %v20_v8, %v21_v9  ;;  %v31_v13 = vld [vmem:[%s7522_s0 + $0x68] sm:$0xff]  ;;  %v36_v14 = vld [vmem:[%s7522_s0 + $0x90] sm:$0xff]  ;;  %v37_v15 = vld [vmem:[%s7522_s0 + $0x98] sm:$0xff]  ;;  %vm570_vm12 = vsmask.f32 7440  ;;  %s5239_s6 = smov 4  }
   0x5   :  { %v5182_v16 = vpack.i.bf16 %v5292_v7, %v5284_v4  ;;  %v22_v17 = vld [vmem:[%s7522_s0 + $0x20] sm:$0xff]  ;;  %v23_v18 = vld [vmem:[%s7522_s0 + $0x28] sm:$0xff]  ;;  %v24_v19 = vld [vmem:[%s7522_s0 + $0x30] sm:$0xff]  ;;  %v5333_v22 = vmax.f32 %v30_v11, %v31_v13  ;;  %v5335_v23 = vmax.f32 %v36_v14, %v37_v15  ;;  %s5240_s7 = smov 16   ;;  %s5241_s8 = smov 28   ;;  %vm2040_vm14 = vcmask 31744  }
   0x6   :  { %v5172_v20 = vpack.i.bf16 %v5305_v12, %v5300_v10  ;;  %v25_v21 = vld [vmem:[%s7522_s0 + $0x38] sm:$0xff]  ;;  %v5338_v24 = vmax.f32 %v22_v17, %v23_v18  ;;  %v34_v26 = vld [vmem:[%s7522_s0 + $0x80] sm:$0xff]  ;;  %v35_v27 = vld [vmem:[%s7522_s0 + $0x88] sm:$0xff]  ;;  %vm2065_vm15 = vcmask 64512   ;;  %s5243_s18 = smov 48   ;;  %s5244_s19 = smov 40  }
   0x7   :  { %5183 = vrot.lane.b32.xlu1 %v5182_v16, %s5232_s21  ;;  %v5340_v25 = vmax.f32 %v24_v19, %v25_v21  ;;  %v38_v28 = vld [vmem:[%s7522_s0 + $0xa0] sm:$0xff]  ;;  %v39_v29 = vld [vmem:[%s7522_s0 + $0xa8] sm:$0xff]  ;;  %v40_v30 = vld [vmem:[%s7522_s0 + $0xb0] sm:$0xff]  ;;  %v5187_v36 = vpack.i.bf16 %v5335_v23, %v5333_v22  ;;  %v5413_v55 = vmax.f32 %v34_v26, %v35_v27  ;;  %s5245_s20 = smov 64   ;;  %s5246_s22 = smov 56  }
   0x8   :  { %5173 = vrot.lane.b32.xlu0 %v5172_v20, %s5232_s21  ;;  %v48_v31 = vld [vmem:[%s7522_s0 + $0xf0] sm:$0xff]  ;;  %v49_v32 = vld [vmem:[%s7522_s0 + $0xf8] sm:$0xff]  ;;  %v5366_v34 = vmax.f32 %v38_v28, %v39_v29  ;;  %v46_v39 = vld [vmem:[%s7522_s0 + $0xe0] sm:$0xff] }
   0x9   :  { %v41_v33 = vld [vmem:[%s7522_s0 + $0xb8] sm:$0xff]  ;;  %v32_v35 = vld [vmem:[%s7522_s0 + $0x70] sm:$0xff]  ;;  %v47_v40 = vld [vmem:[%s7522_s0 + $0xe8] sm:$0xff]  ;;  %v5177_v45 = vpack.i.bf16 %v5340_v25, %v5338_v24  ;;  %v5420_v58 = vmax.f32 %v48_v31, %v49_v32 }
   0xa   :  { %v44_v37 = vld [vmem:[%s7522_s0 + $0xd0] sm:$0xff]  ;;  %v45_v38 = vld [vmem:[%s7522_s0 + $0xd8] sm:$0xff]  ;;  %v61_v41 = vmax.f32 %v40_v30, %v41_v33  ;;  %v42_v43 = vld [vmem:[%s7522_s0 + $0xc0] sm:$0xff]  ;;  %v5430_v62 = vmax.f32 %v46_v39, %v47_v40 }
   0xb   :  { %v33_v42 = vld [vmem:[%s7522_s0 + $0x78] sm:$0xff]  ;;  %vm5393_vm3 = vmand %vm164_vm0, %vm175_vm1  ;;  %v43_v46 = vld [vmem:[%s7522_s0 + $0xc8] sm:$0xff]  ;;  %v5428_v61 = vmax.f32 %v44_v37, %v45_v38  ;;  %v5207_v63 = vpack.i.bf16 %v5420_v58, %v5413_v55  ;;  %s5234_s0 = smov 12  }
   0xc   :  { %v189_v47 = vld [vmem:[#allocation2 + $0x28] sm:$0x1]  ;;  %v192_v48 = vld [vmem:[#allocation2 + $0x30] sm:$0x1]  ;;  %v5192_v49 = vpack.i.bf16 %v61_v41, %v5366_v34  ;;  %vm5409_vm4 = vmand %vm164_vm0, %vm225_vm2  ;;  %v5423_v59 = vmax.f32 %v32_v35, %v33_v42  ;;  %v5425_v60 = vmax.f32 %v42_v43, %v43_v46 }
   0xd   :  { %v190_v50 = vsel %vm5393_vm3, 0, %v189_v47  ;;  %v193_v51 = vsel %vm5393_vm3, 0, %v192_v48  ;;  %v239_v53 = vld [vmem:[#allocation2 + $0x2c] sm:$0x1]  ;;  %v242_v54 = vld [vmem:[#allocation2 + $0x34] sm:$0x1]  ;;  %v5202_v1 = vpack.i.bf16 %v5430_v62, %v5428_v61  ;;  %vm5480_vm6 = vmand %vm162_vm5, %vm225_vm2 }
   0xe   :  { %191 = vst [vmem:[#allocation2 + $0x28] sm:$0x1] %v190_v50  ;;  %v240_v56 = vsel %vm5409_vm4, 0, %v239_v53  ;;  %v243_v57 = vsel %vm5409_vm4, 0, %v242_v54  ;;  %5193 = vrot.lane.b32.xlu2 %v5192_v49, %s5232_s21  ;;  %v5197_v0 = vpack.i.bf16 %v5423_v59, %v5425_v60  ;;  %v177_v2 = vld [vmem:[#allocation2 + $0x8] sm:$0x1]  ;;  %vm5625_vm10 = vmor %vm844_vm7, %vm845_vm8 }
   0xf   :  { %5188 = vrot.lane.b32.xlu1 %v5187_v36, %s5232_s21  ;;  %194 = vst [vmem:[#allocation2 + $0x30] sm:$0x1] %v193_v51  ;;  %v180_v3 = vld [vmem:[#allocation2 + $0x10] sm:$0x1]  ;;  %v227_v5 = vld [vmem:[#allocation2 + $0xc] sm:$0x1]  ;;  %vm5841_vm13 = vmor %vm569_vm11, %vm570_vm12 }
  0x10   :  { %5178 = vrot.lane.b32.xlu0 %v5177_v45, %s5232_s21  ;;  %241 = vst [vmem:[#allocation2 + $0x2c] sm:$0x1] %v240_v56  ;;  %v178_v6 = vsel %vm5393_vm3, 0, %v177_v2  ;;  %v181_v8 = vsel %vm5393_vm3, 0, %v180_v3  ;;  %v228_v9 = vsel %vm5409_vm4, 0, %v227_v5  ;;  %vm2150_vm7 = vcmask 228352  }
  0x11   :  { %244 = vst [vmem:[#allocation2 + $0x34] sm:$0x1] %v243_v57  ;;  %v230_v11 = vld [vmem:[#allocation2 + $0x14] sm:$0x1]  ;;  %v195_v15 = vld [vmem:[#allocation2 + $0x38] sm:$0x1] }
  0x12   :  { %179 = vst [vmem:[#allocation2 + $0x8] sm:$0x1] %v178_v6  ;;  %v231_v13 = vsel %vm5409_vm4, 0, %v230_v11  ;;  %v196_v16 = vsel %vm5393_vm3, 0, %v195_v15  ;;  %v207_v19 = vld [vmem:[#allocation2 + $0x68] sm:$0x1] }
  0x13   :  { %182 = vst [vmem:[#allocation2 + $0x10] sm:$0x1] %v181_v8  ;;  %v210_v20 = vld [vmem:[#allocation2 + $0x70] sm:$0x1]  ;;  %v257_v21 = vld [vmem:[#allocation2 + $0x6c] sm:$0x1] }
  0x14   :  { %229 = vst [vmem:[#allocation2 + $0xc] sm:$0x1] %v228_v9  ;;  %v208_v26 = vsel %vm5393_vm3, 0, %v207_v19  ;;  %v211_v27 = vsel %vm5393_vm3, 0, %v210_v20  ;;  %v258_v28 = vsel %vm5409_vm4, 0, %v257_v21  ;;  %vm2167_vm8 = vcmask 261120  }
  0x15   :  { %232 = vst [vmem:[#allocation2 + $0x14] sm:$0x1] %v231_v13  ;;  %v260_v29 = vld [vmem:[#allocation2 + $0x74] sm:$0x1]  ;;  %v183_v31 = vld [vmem:[#allocation2 + $0x18] sm:$0x1] }
  0x16   :  { %5198 = vrot.lane.b32.xlu2 %v5197_v0, %s5232_s21  ;;  %197 = vst [vmem:[#allocation2 + $0x38] sm:$0x1] %v196_v16  ;;  %v261_v32 = vsel %vm5409_vm4, 0, %v260_v29  ;;  %v204_v35 = vld [vmem:[#allocation2 + $0x60] sm:$0x1]  ;;  %v184_v51 = vsel %vm5393_vm3, 0, %v183_v31 }
  0x17   :  { %5208 = vrot.lane.b32.xlu1 %v5207_v63, %s5232_s21  ;;  %209 = vst [vmem:[#allocation2 + $0x68] sm:$0x1] %v208_v26  ;;  %v186_v36 = vld [vmem:[#allocation2 + $0x20] sm:$0x1]  ;;  %v205_v38 = vsel %vm5393_vm3, 0, %v204_v35  ;;  %vm2204_vm11 = vcmask 293888  }
  0x18   :  { %5203 = vrot.lane.b32.xlu0 %v5202_v1, %s5232_s21  ;;  %212 = vst [vmem:[#allocation2 + $0x70] sm:$0x1] %v211_v27  ;;  %v245_v39 = vld [vmem:[#allocation2 + $0x3c] sm:$0x1]  ;;  %v254_v45 = vld [vmem:[#allocation2 + $0x64] sm:$0x1] }
  0x19   :  { %v233_v40 = vld [vmem:[#allocation2 + $0x1c] sm:$0x1]  ;;  %259 = vst [vmem:[#allocation2 + $0x6c] sm:$0x1] %v258_v28  ;;  %v246_v43 = vsel %vm5409_vm4, 0, %v245_v39  ;;  %v255_v48 = vsel %vm5409_vm4, 0, %v254_v45 }
  0x1a   :  { %262 = vst [vmem:[#allocation2 + $0x74] sm:$0x1] %v261_v32  ;;  %v187_v56 = vsel %vm5393_vm3, 0, %v186_v36  ;;  %v236_v57 = vld [vmem:[#allocation2 + $0x24] sm:$0x1]  ;;  %v234_v0 = vsel %vm5409_vm4, 0, %v233_v40 }
  0x1b   :  { %206 = vst [vmem:[#allocation2 + $0x60] sm:$0x1] %v205_v38  ;;  %v237_v11 = vsel %vm5409_vm4, 0, %v236_v57  ;;  %v213_v13 = vld [vmem:[#allocation2 + $0x78] sm:$0x1]  ;;  %s5235_s21 = smov 24  }
  0x1c   :  { %247 = vst [vmem:[#allocation2 + $0x3c] sm:$0x1] %v246_v43  ;;  %v198_v29 = vld [vmem:[#allocation2 + $0x40] sm:$0x1]  ;;  %v248_v38 = vld [vmem:[#allocation2 + $0x44] sm:$0x1] }
  0x1d   :  { %256 = vst [vmem:[#allocation2 + $0x64] sm:$0x1] %v255_v48 }
  0x1e   :  { %v497_v1 = vld [vmem:[#allocation2 + $0x68] sm:$0xf]  ;;  %185 = vst [vmem:[#allocation2 + $0x18] sm:$0x1] %v184_v51 }
  0x1f   :  { %v503_v6 = vld [vmem:[#allocation2 + $0x70] sm:$0xf]  ;;  %188 = vst [vmem:[#allocation2 + $0x20] sm:$0x1] %v187_v56  ;;  %v461_v51 = vld [vmem:[#allocation2 + $0x28] sm:$0xf] }
  0x20   :  { %v500_v15 = vld [vmem:[#allocation2 + $0x6c] sm:$0x1]  ;;  %235 = vst [vmem:[#allocation2 + $0x1c] sm:$0x1] %v234_v0 }
  0x21   :  { %v506_v26 = vld [vmem:[#allocation2 + $0x74] sm:$0x1]  ;;  %238 = vst [vmem:[#allocation2 + $0x24] sm:$0x1] %v237_v11 }
  0x68   :  { %v5194_v14 = vpop.permute.xlu2 %5193 }
  0x69   :  { %v5196_v17 = vunpack.i.h.bf16 %v5194_v14  ;;  %v5195_v18 = vunpack.i.l.bf16 %v5194_v14 }
  0x6b   :  { %v141_v30 = vmax.f32 %v61_v41, %v5196_v17  ;;  %v140_v33 = vmax.f32 %v5366_v34, %v5195_v18  ;;  %v263_v17 = vld [vmem:[#allocation2 + $0x7c] sm:$0x1] }
  0x6d   :  { %v157_v37 = vpack.c.bf16 %v141_v30, %v141_v30  ;;  %v156_v41 = vpack.c.bf16 %v140_v33, %v140_v33 }
  0x6f   :  { %v364_v34 = vshrl.u32 %v157_v37, 16  ;;  %v367_v47 = vshll.u32 %v157_v37, 16  ;;  %v356_v49 = vshrl.u32 %v156_v41, 16  ;;  %v359_v50 = vshll.u32 %v156_v41, 16 }
  0x70   :  { %v5462_v42 = vpop.permute.xlu2 %5198  ;;  %v199_v37 = vsel %vm5393_vm3, 0, %v198_v29  ;;  %v264_v41 = vsel %vm5409_vm4, 0, %v263_v17 }
  0x71   :  { %v5200_v46 = vunpack.i.l.bf16 %v5462_v42  ;;  %v366_v54 = vrot.slane %v364_v34, 7  ;;  %v358_v63 = vrot.slane %v356_v49, 7  ;;  %v5201_v18 = vunpack.i.h.bf16 %v5462_v42  ;;  %200 = vst [vmem:[#allocation2 + $0x40] sm:$0x1] %v199_v37 }
  0x72   :  { %v214_v42 = vsel %vm5393_vm3, 0, %v213_v13  ;;  %265 = vst [vmem:[#allocation2 + $0x7c] sm:$0x1] %v264_v41 }
  0x73   :  { %v142_v53 = vmax.f32 %v5425_v60, %v5200_v46  ;;  %v369_v2 = vor.u32 %v367_v47, %v366_v54  ;;  %v370_v3 = vrot.slane %v366_v54, 4  ;;  %v361_v8 = vor.u32 %v359_v50, %v358_v63  ;;  %215 = vst [vmem:[#allocation2 + $0x78] sm:$0x1] %v214_v42 }
  0x74   :  { %v362_v9 = vrot.slane %v358_v63, 4  ;;  %v467_v63 = vld [vmem:[#allocation2 + $0x30] sm:$0xf] }
  0x75   :  { %v5476_v5 = vpack.c.bf16 %v142_v53, %v142_v53  ;;  %v504_v16 = vsel %vm5480_vm6, %v369_v2, %v503_v6  ;;  %v498_v27 = vsel %vm5480_vm6, %v361_v8, %v497_v1  ;;  %v507_v32 = vsel %vm5393_vm3, %v370_v3, %v506_v26  ;;  %v470_v6 = vld [vmem:[#allocation2 + $0x34] sm:$0x1] }
  0x76   :  { %505 = vst [vmem:[#allocation2 + $0x70] sm:$0xf] %v504_v16  ;;  %v501_v28 = vsel %vm5393_vm3, %v362_v9, %v500_v15 }
  0x77   :  { %499 = vst [vmem:[#allocation2 + $0x68] sm:$0xf] %v498_v27  ;;  %v372_v33 = vshrl.u32 %v5476_v5, 16  ;;  %v375_v45 = vshll.u32 %v5476_v5, 16 }
  0x78   :  { %508 = vst [vmem:[#allocation2 + $0x74] sm:$0x1] %v507_v32  ;;  %v446_v32 = vld [vmem:[#allocation2 + $0x14] sm:$0x1] }
  0x79   :  { %v5184_v14 = vpop.permute.xlu1 %5183  ;;  %502 = vst [vmem:[#allocation2 + $0x6c] sm:$0x1] %v501_v28 }
  0x7a   :  { %v5186_v19 = vunpack.i.h.bf16 %v5184_v14  ;;  %v5185_v20 = vunpack.i.l.bf16 %v5184_v14  ;;  %v5174_v21 = vpop.permute.xlu0 %5173  ;;  %v464_v14 = vld [vmem:[#allocation2 + $0x2c] sm:$0x1] }
  0x7b   :  { %v5176_v30 = vunpack.i.h.bf16 %v5174_v21  ;;  %v5175_v31 = vunpack.i.l.bf16 %v5174_v21 }
  0x7c   :  { %v135_v35 = vmax.f32 %v5292_v7, %v5186_v19  ;;  %v134_v36 = vmax.f32 %v5284_v4, %v5185_v20  ;;  %v137_v4 = vmax.f32 %v5423_v59, %v5201_v18  ;;  %v443_v19 = vld [vmem:[#allocation2 + $0x10] sm:$0xf] }
  0x7d   :  { %v131_v39 = vmax.f32 %v5305_v12, %v5176_v30  ;;  %v130_v40 = vmax.f32 %v5300_v10, %v5175_v31  ;;  %v249_v10 = vsel %vm5409_vm4, 0, %v248_v38  ;;  %v5510_v12 = vrot.slane %v372_v33, 7  ;;  %v437_v31 = vld [vmem:[#allocation2 + $0x8] sm:$0xf] }
  0x7e   :  { %v151_v43 = vpack.c.bf16 %v135_v35, %v135_v35  ;;  %v150_v7 = vpack.c.bf16 %v134_v36, %v134_v36  ;;  %250 = vst [vmem:[#allocation2 + $0x44] sm:$0x1] %v249_v10  ;;  %v5512_v27 = vpack.c.bf16 %v137_v4, %v137_v4  ;;  %v5233_v33 = vmov 0  }
  0x7f   :  { %v147_v46 = vpack.c.bf16 %v131_v39, %v131_v39  ;;  %v146_v34 = vpack.c.bf16 %v130_v40, %v130_v40  ;;  %169 = vst.msk [vmem:[#allocation2 + $0x48] sm:$0xf] %vm162_vm5, %v5233_v33  ;;  %v377_v38 = vor.u32 %v375_v45, %v5510_v12  ;;  %v440_v39 = vld [vmem:[#allocation2 + $0xc] sm:$0x1] }
  0x80   :  { %v316_v47 = vshrl.u32 %v151_v43, 16  ;;  %v319_v48 = vshll.u32 %v151_v43, 16  ;;  %v308_v49 = vshrl.u32 %v150_v7, 16  ;;  %v311_v50 = vshll.u32 %v150_v7, 16  ;;  %v509_v7 = vld [vmem:[#allocation2 + $0x78] sm:$0xf] }
  0x81   :  { %v284_v53 = vshrl.u32 %v147_v46, 16  ;;  %v287_v54 = vshll.u32 %v147_v46, 16  ;;  %v276_v56 = vshrl.u32 %v146_v34, 16  ;;  %v279_v57 = vshll.u32 %v146_v34, 16  ;;  %v5189_v59 = vpop.permute.xlu1 %5188  ;;  %163 = vst.msk [vmem:[#allocation2] sm:$0xf] %vm162_vm5, %v5233_v33 }
  0x82   :  { %v318_v0 = vrot.slane %v316_v47, 7  ;;  %v310_v1 = vrot.slane %v308_v49, 7  ;;  %v5191_v2 = vunpack.i.h.bf16 %v5189_v59  ;;  %v5190_v3 = vunpack.i.l.bf16 %v5189_v59  ;;  %v5179_v5 = vpop.permute.xlu0 %5178  ;;  %v491_v59 = vld [vmem:[#allocation2 + $0x60] sm:$0xf]  ;;  %165 = vst.msk [vmem:[#allocation2 + $0x4] sm:$0x1] %vm164_vm0, %v5233_v33 }
  0x83   :  { %v286_v8 = vrot.slane %v284_v53, 7  ;;  %v278_v9 = vrot.slane %v276_v56, 7  ;;  %v5181_v11 = vunpack.i.h.bf16 %v5179_v5  ;;  %v5180_v13 = vunpack.i.l.bf16 %v5179_v5  ;;  %v476_v5 = vld [vmem:[#allocation2 + $0x3c] sm:$0x1]  ;;  %166 = vst.msk [vmem:[#allocation2 + $0x50] sm:$0xf] %vm162_vm5, %v5233_v33 }
  0x84   :  { %v321_v15 = vor.u32 %v319_v48, %v318_v0  ;;  %v322_v16 = vrot.slane %v318_v0, 4  ;;  %v313_v17 = vor.u32 %v311_v50, %v310_v1  ;;  %v314_v18 = vrot.slane %v310_v1, 4  ;;  %v216_v48 = vld [vmem:[#allocation2 + $0x80] sm:$0x1]  ;;  %167 = vst.msk [vmem:[#allocation2 + $0x54] sm:$0x1] %vm164_vm0, %v5233_v33 }
  0x85   :  { %v289_v20 = vor.u32 %v287_v54, %v286_v8  ;;  %v290_v21 = vrot.slane %v286_v8, 4  ;;  %v281_v26 = vor.u32 %v279_v57, %v278_v9  ;;  %v282_v37 = vrot.slane %v278_v9, 4  ;;  %v473_v57 = vld [vmem:[#allocation2 + $0x38] sm:$0xf]  ;;  %170 = vst.msk [vmem:[#allocation2 + $0x4c] sm:$0x1] %vm164_vm0, %v5233_v33 }
  0x86   :  { %v468_v28 = vsel %vm5480_vm6, %v321_v15, %v467_v63  ;;  %v471_v29 = vsel %vm5393_vm3, %v322_v16, %v470_v6  ;;  %v462_v30 = vsel %vm5480_vm6, %v313_v17, %v461_v51  ;;  %v465_v35 = vsel %vm5393_vm3, %v314_v18, %v464_v14  ;;  %v219_v51 = vld [vmem:[#allocation2 + $0x88] sm:$0x1]  ;;  %v494_v63 = vld [vmem:[#allocation2 + $0x64] sm:$0x1]  ;;  %171 = vst.msk [vmem:[#allocation2 + $0x98] sm:$0xf] %vm162_vm5, %v5233_v33 }
  0x87   :  { %469 = vst [vmem:[#allocation2 + $0x30] sm:$0xf] %v468_v28  ;;  %v444_v36 = vsel %vm5480_vm6, %v289_v20, %v443_v19  ;;  %v139_v40 = vmax.f32 %v5335_v23, %v5191_v2  ;;  %v136_v42 = vmax.f32 %v5333_v22, %v5190_v3  ;;  %v133_v41 = vmax.f32 %v5340_v25, %v5181_v11  ;;  %v512_v25 = vld [vmem:[#allocation2 + $0x7c] sm:$0x1] }
  0x88   :  { %472 = vst [vmem:[#allocation2 + $0x34] sm:$0x1] %v471_v29  ;;  %v132_v43 = vmax.f32 %v5338_v24, %v5180_v13  ;;  %v447_v4 = vsel %vm5393_vm3, %v290_v21, %v446_v32  ;;  %v438_v46 = vsel %vm5480_vm6, %v281_v26, %v437_v31  ;;  %v332_v45 = vshrl.u32 %v5512_v27, 16  ;;  %v449_v21 = vld [vmem:[#allocation2 + $0x18] sm:$0xf] }
  0x89   :  { %463 = vst [vmem:[#allocation2 + $0x28] sm:$0xf] %v462_v30  ;;  %v378_v34 = vrot.slane %v5510_v12, 4  ;;  %v155_v23 = vpack.c.bf16 %v139_v40, %v139_v40  ;;  %v152_v10 = vpack.c.bf16 %v136_v42, %v136_v42  ;;  %v149_v22 = vpack.c.bf16 %v133_v41, %v133_v41  ;;  %v455_v26 = vld [vmem:[#allocation2 + $0x20] sm:$0xf] }
  0x8a   :  { %466 = vst [vmem:[#allocation2 + $0x2c] sm:$0x1] %v465_v35  ;;  %v148_v47 = vpack.c.bf16 %v132_v43, %v132_v43  ;;  %v441_v24 = vsel %vm5393_vm3, %v282_v37, %v440_v39  ;;  %v335_v49 = vshll.u32 %v5512_v27, 16  ;;  %v510_v50 = vsel %vm5480_vm6, %v377_v38, %v509_v7  ;;  %v458_v27 = vld [vmem:[#allocation2 + $0x24] sm:$0x1]  ;;  %v5204_v31 = vpop.permute.xlu0 %5203  ;;  %v5209_v43 = vpop.permute.xlu1 %5208 }
  0x8b   :  { %445 = vst [vmem:[#allocation2 + $0x10] sm:$0xf] %v444_v36  ;;  %v348_v53 = vshrl.u32 %v155_v23, 16  ;;  %v351_v12 = vshll.u32 %v155_v23, 16  ;;  %v324_v54 = vshrl.u32 %v152_v10, 16  ;;  %v327_v56 = vshll.u32 %v152_v10, 16 }
  0x8c   :  { %448 = vst [vmem:[#allocation2 + $0x14] sm:$0x1] %v447_v4  ;;  %v300_v0 = vshrl.u32 %v149_v22, 16  ;;  %v292_v1 = vshrl.u32 %v148_v47, 16  ;;  %v5542_v2 = vrot.slane %v332_v45, 7  ;;  %v513_v3 = vsel %vm5393_vm3, %v378_v34, %v512_v25 }
  0x8d   :  { %439 = vst [vmem:[#allocation2 + $0x8] sm:$0xf] %v438_v46  ;;  %v350_v6 = vrot.slane %v348_v53, 7  ;;  %v326_v8 = vrot.slane %v324_v54, 7  ;;  %v217_v9 = vsel %vm5393_vm3, 0, %v216_v48  ;;  %v220_v11 = vsel %vm5393_vm3, 0, %v219_v51 }
  0x8e   :  { %442 = vst [vmem:[#allocation2 + $0xc] sm:$0x1] %v441_v24  ;;  %v302_v13 = vrot.slane %v300_v0, 7  ;;  %v303_v14 = vshll.u32 %v149_v22, 16  ;;  %v294_v15 = vrot.slane %v292_v1, 7  ;;  %v295_v16 = vshll.u32 %v148_v47, 16 }
  0x8f   :  { %511 = vst [vmem:[#allocation2 + $0x78] sm:$0xf] %v510_v50  ;;  %v353_v17 = vor.u32 %v351_v12, %v350_v6  ;;  %v354_v18 = vrot.slane %v350_v6, 4  ;;  %v329_v19 = vor.u32 %v327_v56, %v326_v8  ;;  %v330_v20 = vrot.slane %v326_v8, 4  ;;  %v452_v37 = vld [vmem:[#allocation2 + $0x1c] sm:$0x1] }
  0x90   :  { %514 = vst [vmem:[#allocation2 + $0x7c] sm:$0x1] %v513_v3  ;;  %v305_v28 = vor.u32 %v303_v14, %v302_v13  ;;  %v306_v29 = vrot.slane %v302_v13, 4  ;;  %v297_v30 = vor.u32 %v295_v16, %v294_v15  ;;  %v479_v38 = vld [vmem:[#allocation2 + $0x40] sm:$0xf]  ;;  %v298_v42 = vrot.slane %v294_v15, 4 }
  0x91   :  { %218 = vst [vmem:[#allocation2 + $0x80] sm:$0x1] %v217_v9  ;;  %v492_v32 = vsel %vm5480_vm6, %v353_v17, %v491_v59  ;;  %v495_v35 = vsel %vm5393_vm3, %v354_v18, %v494_v63  ;;  %v474_v36 = vsel %vm5480_vm6, %v329_v19, %v473_v57  ;;  %v4857_v39 = vld [vmem:[#allocation2 + $0x28] sm:$0xf]  ;;  %v477_v40 = vsel %vm5393_vm3, %v330_v20, %v476_v5  ;;  %v5105_v7 = vld [vmem:[#allocation2 + $0x2c] sm:$0xf0] }
  0x92   :  { %221 = vst [vmem:[#allocation2 + $0x88] sm:$0x1] %v220_v11  ;;  %v337_v41 = vor.u32 %v335_v49, %v5542_v2  ;;  %v456_v4 = vsel %vm5480_vm6, %v305_v28, %v455_v26  ;;  %v266_v46 = vld [vmem:[#allocation2 + $0x84] sm:$0x1]  ;;  %v5206_v45 = vunpack.i.h.bf16 %v5204_v31  ;;  %v5205_v34 = vunpack.i.l.bf16 %v5204_v31  ;;  %v5103_v10 = vld [vmem:[#allocation2 + $0xc] sm:$0xf0] }
  0x93   :  { %493 = vst [vmem:[#allocation2 + $0x60] sm:$0xf] %v492_v32  ;;  %v459_v22 = vsel %vm5393_vm3, %v306_v29, %v458_v27  ;;  %v450_v47 = vsel %vm5480_vm6, %v297_v30, %v449_v21  ;;  %v338_v25 = vrot.slane %v5542_v2, 4  ;;  %v269_v48 = vld [vmem:[#allocation2 + $0x8c] sm:$0x1]  ;;  %v5211_v53 = vunpack.i.h.bf16 %v5209_v43 }
  0x94   :  { %496 = vst [vmem:[#allocation2 + $0x64] sm:$0x1] %v495_v35  ;;  %v4849_v23 = vld [vmem:[#allocation2 + $0x8] sm:$0xf]  ;;  %v482_v24 = vld [vmem:[#allocation2 + $0x44] sm:$0x1]  ;;  %v144_v49 = vmax.f32 %v5430_v62, %v5206_v45  ;;  %v143_v50 = vmax.f32 %v5428_v61, %v5205_v34  ;;  %v5210_v12 = vunpack.i.l.bf16 %v5209_v43  ;;  %v453_v54 = vsel %vm5393_vm3, %v298_v42, %v452_v37 }
  0x95   :  { %475 = vst [vmem:[#allocation2 + $0x38] sm:$0xf] %v474_v36  ;;  %v201_v51 = vld [vmem:[#allocation2 + $0x58] sm:$0x1]  ;;  %v480_v56 = vsel %vm5480_vm6, %v337_v41, %v479_v38  ;;  %v4858_v57 = vor.u32 %v5105_v7, %v4857_v39  ;;  %v4850_v59 = vor.u32 %v5103_v10, %v4849_v23  ;;  %v222_v1 = vld [vmem:[#allocation2 + $0x90] sm:$0x1]  ;;  %v145_v62 = vmax.f32 %v5420_v58, %v5211_v53 }
  0x96   :  { %478 = vst [vmem:[#allocation2 + $0x3c] sm:$0x1] %v477_v40  ;;  %v160_v63 = vpack.c.bf16 %v144_v49, %v144_v49  ;;  %v159_v0 = vpack.c.bf16 %v143_v50, %v143_v50  ;;  %v251_v2 = vld [vmem:[#allocation2 + $0x5c] sm:$0x1]  ;;  %v138_v61 = vmax.f32 %v5413_v55, %v5210_v12  ;;  %v483_v3 = vsel %vm5393_vm3, %v338_v25, %v482_v24  ;;  %v4889_v13 = vld [vmem:[#allocation2 + $0x30] sm:$0xf] }
  0x97   :  { %457 = vst [vmem:[#allocation2 + $0x20] sm:$0xf] %v456_v4  ;;  %v267_v5 = vsel %vm5409_vm4, 0, %v266_v46  ;;  %v270_v6 = vsel %vm5409_vm4, 0, %v269_v48  ;;  %v202_v8 = vsel %vm5393_vm3, 0, %v201_v51  ;;  %1812 = vrot.lane.b32.xlu2 %v4858_v57, %s5234_s0  ;;  %1808 = vrot.lane.b32.xlu1 %v4850_v59, %s5234_s0  ;;  %v223_v15 = vsel %vm5393_vm3, 0, %v222_v1 }
  0x98   :  { %460 = vst [vmem:[#allocation2 + $0x24] sm:$0x1] %v459_v22  ;;  %v388_v55 = vshrl.u32 %v160_v63, 16  ;;  %v391_v58 = vshll.u32 %v160_v63, 16  ;;  %v380_v9 = vshrl.u32 %v159_v0, 16  ;;  %v383_v11 = vshll.u32 %v159_v0, 16 }
  0x99   :  { %451 = vst [vmem:[#allocation2 + $0x18] sm:$0xf] %v450_v47  ;;  %v515_v14 = vld [vmem:[#allocation2 + $0x80] sm:$0xf]  ;;  %v252_v16 = vsel %vm5409_vm4, 0, %v251_v2  ;;  %v161_v17 = vpack.c.bf16 %v145_v62, %v145_v62  ;;  %v154_v18 = vpack.c.bf16 %v138_v61, %v138_v61  ;;  %vm2116_vm5 = vcmask 162816  }
  0x9a   :  { %454 = vst [vmem:[#allocation2 + $0x1c] sm:$0x1] %v453_v54  ;;  %v390_v19 = vrot.slane %v388_v55, 7  ;;  %v382_v20 = vrot.slane %v380_v9, 7  ;;  %v521_v26 = vld [vmem:[#allocation2 + $0x88] sm:$0xf] }
  0x9b   :  { %481 = vst [vmem:[#allocation2 + $0x40] sm:$0xf] %v480_v56  ;;  %v396_v27 = vshrl.u32 %v161_v17, 16  ;;  %v340_v28 = vshrl.u32 %v154_v18, 16  ;;  %v272_v31 = vld [vmem:[#allocation2 + $0x94] sm:$0x1] }
  0x9c   :  { %484 = vst [vmem:[#allocation2 + $0x44] sm:$0x1] %v483_v3  ;;  %v5113_v21 = vld [vmem:[#allocation2 + $0x34] sm:$0xf0]  ;;  %v393_v29 = vor.u32 %v391_v58, %v390_v19  ;;  %v385_v30 = vor.u32 %v383_v11, %v382_v20  ;;  %v399_v32 = vshll.u32 %v161_v17, 16  ;;  %v343_v35 = vshll.u32 %v154_v18, 16 }
  0x9d   :  { %268 = vst [vmem:[#allocation2 + $0x84] sm:$0x1] %v267_v5  ;;  %v5588_v36 = vrot.slane %v396_v27, 7  ;;  %v5590_v37 = vrot.slane %v340_v28, 7  ;;  %v4890_v38 = vor.u32 %v5113_v21, %v4889_v13  ;;  %v4881_v40 = vld [vmem:[#allocation2 + $0x10] sm:$0xf] }
  0x9e   :  { %271 = vst [vmem:[#allocation2 + $0x8c] sm:$0x1] %v270_v6  ;;  %v5104_v39 = vld [vmem:[#allocation2 + $0x1c] sm:$0xf0]  ;;  %v522_v42 = vsel %vm5480_vm6, %v393_v29, %v521_v26  ;;  %v516_v41 = vsel %vm5480_vm6, %v385_v30, %v515_v14  ;;  %v386_v4 = vrot.slane %v382_v20, 4  ;;  %v273_v46 = vsel %vm5409_vm4, 0, %v272_v31 }
  0x9f   :  { %203 = vst [vmem:[#allocation2 + $0x58] sm:$0x1] %v202_v8  ;;  %1948 = vrot.lane.b32.xlu2 %v4890_v38, %s5235_s21  ;;  %v5599_v45 = vld [vmem:[#allocation2 + $0x14] sm:$0x1]  ;;  %v394_v34 = vrot.slane %v390_v19, 4  ;;  %v345_v47 = vor.u32 %v343_v35, %v5590_v37  ;;  %v401_v52 = vor.u32 %v399_v32, %v5588_v36  ;;  %v402_v51 = vrot.slane %v5588_v36, 4 }
  0xa0   :  { %224 = vst [vmem:[#allocation2 + $0x90] sm:$0x1] %v223_v15  ;;  %v4853_v43 = vld [vmem:[#allocation2 + $0x18] sm:$0xf]  ;;  %v798_v22 = vld [vmem:[#allocation2 + $0x10] sm:$0xe] }
  0xa1   :  { %v5111_v7 = vld [vmem:[#allocation2 + $0x14] sm:$0xf0]  ;;  %523 = vst [vmem:[#allocation2 + $0x88] sm:$0xf] %v522_v42  ;;  %v4854_v23 = vor.u32 %v5104_v39, %v4853_v43  ;;  %v5602_v25 = vld [vmem:[#allocation2 + $0x1c] sm:$0x1] }
  0xa2   :  { %517 = vst [vmem:[#allocation2 + $0x80] sm:$0xf] %v516_v41  ;;  %v4882_v10 = vor.u32 %v5111_v7, %v4881_v40  ;;  %v799_v24 = vld [vmem:[#allocation2 + $0x18] sm:$0xe]  ;;  %v346_v53 = vrot.slane %v5590_v37, 4  ;;  %v4769_v1 = vrot.slane %v798_v22, 9 }
  0xa3   :  { %253 = vst [vmem:[#allocation2 + $0x5c] sm:$0x1] %v252_v16  ;;  %1810 = vrot.lane.b32.xlu0 %v4854_v23, %s5234_s0  ;;  %v4873_v12 = vld [vmem:[#allocation2 + $0x78] sm:$0xf]  ;;  %v4885_v54 = vld [vmem:[#allocation2 + $0x20] sm:$0xf] }
  0xa4   :  { %v518_v48 = vld [vmem:[#allocation2 + $0x84] sm:$0x1]  ;;  %274 = vst [vmem:[#allocation2 + $0x94] sm:$0x1] %v273_v46  ;;  %1944 = vrot.lane.b32.xlu1 %v4882_v10, %s5235_s21  ;;  %v5112_v56 = vld [vmem:[#allocation2 + $0x24] sm:$0xf0] }
  0xa5   :  { %v524_v49 = vld [vmem:[#allocation2 + $0x8c] sm:$0x1]  ;;  %v519_v50 = vsel %vm5393_vm3, %v386_v4, %v518_v48  ;;  %v4869_v63 = vld [vmem:[#allocation2 + $0x68] sm:$0xf]  ;;  %v5108_v0 = vld [vmem:[#allocation2 + $0x6c] sm:$0xf0]  ;;  %v4886_v15 = vor.u32 %v5112_v56, %v4885_v54 }
  0xa6   :  { %v525_v57 = vsel %vm5393_vm3, %v394_v34, %v524_v49  ;;  %520 = vst [vmem:[#allocation2 + $0x84] sm:$0x1] %v519_v50  ;;  %v485_v59 = vld [vmem:[#allocation2 + $0x58] sm:$0xf]  ;;  %v857_v2 = vrot.slane %v5599_v45, 5  ;;  %v4770_v3 = vrot.slane %v799_v24, 9  ;;  %v4870_v20 = vor.u32 %v5108_v0, %v4869_v63 }
  0xa7   :  { %526 = vst [vmem:[#allocation2 + $0x8c] sm:$0x1] %v525_v57  ;;  %v527_v62 = vld [vmem:[#allocation2 + $0x90] sm:$0xf]  ;;  %v486_v61 = vsel %vm5480_vm6, %v345_v47, %v485_v59  ;;  %v861_v5 = vrot.slane %v5602_v25, 5  ;;  %vm2099_vm4 = vcmask 130048  }
  0xa8   :  { %v528_v6 = vsel %vm5480_vm6, %v401_v52, %v527_v62  ;;  %487 = vst [vmem:[#allocation2 + $0x58] sm:$0xf] %v486_v61  ;;  %v5621_v8 = vld [vmem:[#allocation2 + $0x24] sm:$0x1]  ;;  %v800_v55 = vld [vmem:[#allocation2 + $0x20] sm:$0xe]  ;;  %v858_v30 = vsel %vm5625_vm10, %v4769_v1, %v857_v2 }
  0xa9   :  { %529 = vst [vmem:[#allocation2 + $0x90] sm:$0xf] %v528_v6  ;;  %v5109_v58 = vld [vmem:[#allocation2 + $0x7c] sm:$0xf0]  ;;  %v5629_v11 = vld [vmem:[#allocation2 + $0x2c] sm:$0x1]  ;;  %v862_v44 = vsel %vm5625_vm10, %v4770_v3, %v861_v5  ;;  %v1730_v23 = vunpack.c.l.b16 %v858_v30 }
  0xaa   :  { %v488_v13 = vld [vmem:[#allocation2 + $0x5c] sm:$0x1]  ;;  %v4874_v14 = vor.u32 %v5109_v58, %v4873_v12  ;;  %v5631_v60 = vld [vmem:[#allocation2 + $0x38] sm:$0xf]  ;;  %v5633_v16 = vld [vmem:[#allocation2 + $0x3c] sm:$0xf0]  ;;  %v1731_v52 = vunpack.c.l.b16 %v862_v44 }
  0xab   :  { %v801_v17 = vld [vmem:[#allocation2 + $0x28] sm:$0xe]  ;;  %v530_v18 = vld [vmem:[#allocation2 + $0x94] sm:$0x1]  ;;  %v489_v19 = vsel %vm5393_vm3, %v346_v53, %v488_v13  ;;  %v4905_v21 = vld [vmem:[#allocation2 + $0x80] sm:$0xf]  ;;  %1946 = vrot.lane.b32.xlu0 %v4886_v15, %s5235_s21  ;;  %v4862_v34 = vor.u32 %v5633_v16, %v5631_v60 }
  0xac   :  { %v5117_v26 = vld [vmem:[#allocation2 + $0x84] sm:$0xf0]  ;;  %v4771_v27 = vrot.slane %v800_v55, 9  ;;  %v865_v28 = vrot.slane %v5621_v8, 5  ;;  %v531_v29 = vsel %vm5393_vm3, %v402_v51, %v530_v18  ;;  %490 = vst [vmem:[#allocation2 + $0x5c] sm:$0x1] %v489_v19  ;;  %1820 = vrot.lane.b32.xlu2 %v4874_v14, %s5234_s0  ;;  %1818 = vrot.lane.b32.xlu1 %v4870_v20, %s5234_s0  ;;  %v1745_v5 = vpack.c.b16 %v1731_v52, %v1730_v23 }
  0xad   :  { %v4772_v31 = vrot.slane %v801_v17, 9  ;;  %v869_v32 = vrot.slane %v5629_v11, 5  ;;  %v5649_v35 = vld [vmem:[#allocation2 + $0x1c] sm:$0x1]  ;;  %532 = vst [vmem:[#allocation2 + $0x94] sm:$0x1] %v531_v29  ;;  %v4906_v48 = vor.u32 %v5117_v26, %v4905_v21 }
  0xae   :  { %v866_v36 = vsel %vm5625_vm10, %v4771_v27, %v865_v28  ;;  %v5656_v37 = vld [vmem:[#allocation2 + $0x24] sm:$0x1]  ;;  %v1169_v38 = vld [vmem:[#allocation2 + $0x18] sm:$0xe]  ;;  %v4901_v39 = vld [vmem:[#allocation2 + $0x70] sm:$0xf] }
  0xaf   :  { %v5116_v40 = vld [vmem:[#allocation2 + $0x74] sm:$0xf0]  ;;  %v5658_v42 = vld [vmem:[#allocation2 + $0x40] sm:$0xf]  ;;  %v5660_v41 = vld [vmem:[#allocation2 + $0x44] sm:$0xf0]  ;;  %v870_v43 = vsel %vm5625_vm10, %v4772_v31, %v869_v32  ;;  %v1732_v24 = vunpack.c.l.b16 %v866_v36 }
  0xb0   :  { %v1170_v7 = vld [vmem:[#allocation2 + $0x20] sm:$0xe]  ;;  %v4785_v4 = vrot.slane %v1169_v38, 9  ;;  %v1225_v46 = vrot.slane %v5649_v35, 5  ;;  %v1229_v22 = vrot.slane %v5656_v37, 5  ;;  %v1733_v53 = vunpack.c.l.b16 %v870_v43 }
  0xb1   :  { %v4786_v10 = vrot.slane %v1170_v7, 9  ;;  %v5672_v47 = vld [vmem:[#allocation2 + $0x2c] sm:$0x1]  ;;  %v5678_v50 = vld [vmem:[#allocation2 + $0x34] sm:$0x1]  ;;  %v4902_v2 = vor.u32 %v5116_v40, %v4901_v39  ;;  %v4894_v62 = vor.u32 %v5660_v41, %v5658_v42  ;;  %vm2082_vm3 = vcmask 97280  }
  0xb2   :  { %v1226_v49 = vsel %vm5625_vm10, %v4785_v4, %v1225_v46  ;;  %v1171_v51 = vld [vmem:[#allocation2 + $0x28] sm:$0xe]  ;;  %172 = vst.msk [vmem:[#allocation2 + $0x9c] sm:$0x1] %vm164_vm0, %v5233_v33  ;;  %v1172_v56 = vld [vmem:[#allocation2 + $0x30] sm:$0xe]  ;;  %v1746_v18 = vpack.c.b16 %v1733_v53, %v1732_v24 }
  0xb3   :  { %v1230_v12 = vsel %vm5625_vm10, %v4786_v10, %v1229_v22  ;;  %v1866_v54 = vunpack.c.l.b16 %v1226_v49  ;;  %v4787_v57 = vrot.slane %v1171_v51, 9  ;;  %2442 = vst.msk [vmem:[#allocation3 + $0x4] sm:$0x1] %vm2441_vm9, %v5233_v33  ;;  %v1233_v63 = vrot.slane %v5672_v47, 5  ;;  %v5692_v61 = vld [vmem:[#allocation2 + $0x4] sm:$0x1]  ;;  %1814 = vrot.lane.b32.xlu0 %v4862_v34, %s5234_s0 }
  0xb4   :  { %v1867_v59 = vunpack.c.l.b16 %v1230_v12  ;;  %v4788_v0 = vrot.slane %v1172_v56, 9  ;;  %v1237_v1 = vrot.slane %v5678_v50, 5  ;;  %2444 = vst.msk [vmem:[#allocation3 + $0x54] sm:$0x1] %vm2441_vm9, %v5233_v33  ;;  %v5694_v3 = vld [vmem:[#allocation2 + $0xc] sm:$0x1]  ;;  %1956 = vrot.lane.b32.xlu2 %v4906_v48, %s5235_s21  ;;  %1954 = vrot.lane.b32.xlu1 %v4902_v2, %s5235_s21 }
  0xb5   :  { %2447 = vst.msk [vmem:[#allocation3 + $0x4c] sm:$0x1] %vm2441_vm9, %v5233_v33  ;;  %v1234_v6 = vsel %vm5625_vm10, %v4787_v57, %v1233_v63  ;;  %v796_v58 = vld [vmem:[#allocation2] sm:$0xe]  ;;  %v797_v13 = vld [vmem:[#allocation2 + $0x8] sm:$0xe] }
  0xb6   :  { %v1238_v55 = vsel %vm5625_vm10, %v4788_v0, %v1237_v1  ;;  %2449 = vst.msk [vmem:[#allocation3 + $0x9c] sm:$0x1] %vm2441_vm9, %v5233_v33  ;;  %v1868_v14 = vunpack.c.l.b16 %v1234_v6  ;;  %v4767_v60 = vrot.slane %v796_v58, 9  ;;  %v849_v16 = vrot.slane %v5692_v61, 5  ;;  %v5708_v17 = vld [vmem:[#allocation2 + $0x24] sm:$0x1] }
  0xb7   :  { %v1869_v15 = vunpack.c.l.b16 %v1238_v55  ;;  %v5710_v19 = vpack.c.b16 %v1867_v59, %v1866_v54  ;;  %v4768_v20 = vrot.slane %v797_v13, 9  ;;  %v853_v21 = vrot.slane %v5694_v3, 5  ;;  %v5713_v26 = vld [vmem:[#allocation2 + $0x2c] sm:$0x1]  ;;  %v1538_v27 = vld [vmem:[#allocation2 + $0x20] sm:$0xe] }
  0xb8   :  { %v850_v29 = vsel %vm5625_vm10, %v4767_v60, %v849_v16  ;;  %v1539_v30 = vld [vmem:[#allocation2 + $0x28] sm:$0xe]  ;;  %v4801_v31 = vrot.slane %v1538_v27, 9  ;;  %v1594_v32 = vrot.slane %v5708_v17, 5  ;;  %v1302_v44 = vld [vmem:[#allocation2 + $0x44] sm:$0x1] }
  0xb9   :  { %v5715_v28 = vpack.c.b16 %v1869_v15, %v1868_v14  ;;  %v854_v36 = vsel %vm5625_vm10, %v4768_v20, %v853_v21  ;;  %v1728_v38 = vunpack.c.l.b16 %v850_v29  ;;  %v4802_v39 = vrot.slane %v1539_v30, 9  ;;  %v1303_v42 = vld [vmem:[#allocation2 + $0x4c] sm:$0x1]  ;;  %v1542_v41 = vld [vmem:[#allocation2 + $0x40] sm:$0xe] }
  0xba   :  { %v1598_v40 = vrot.slane %v5713_v26, 5  ;;  %v1729_v43 = vunpack.c.l.b16 %v854_v36  ;;  %v1595_v7 = vsel %vm5625_vm10, %v4801_v31, %v1594_v32  ;;  %v1543_v4 = vld [vmem:[#allocation2 + $0x48] sm:$0xe]  ;;  %v4805_v46 = vrot.slane %v1542_v41, 9  ;;  %v5725_v23 = vld [vmem:[#allocation2 + $0xc] sm:$0x1] }
  0xbb   :  { %v1610_v34 = vrot.slane %v1302_v44, 5  ;;  %v2002_v22 = vunpack.c.l.b16 %v1595_v7  ;;  %v4806_v48 = vrot.slane %v1543_v4, 9  ;;  %v1614_v52 = vrot.slane %v1303_v42, 5  ;;  %v5729_v24 = vld [vmem:[#allocation2 + $0x14] sm:$0x1]  ;;  %1950 = vrot.lane.b32.xlu0 %v4894_v62, %s5235_s21 }
  0xbc   :  { %v1599_v10 = vsel %vm5625_vm10, %v4802_v39, %v1598_v40  ;;  %v1167_v49 = vld [vmem:[#allocation2 + $0x8] sm:$0xe]  ;;  %v1744_v51 = vpack.c.b16 %v1729_v43, %v1728_v38  ;;  %v1168_v54 = vld [vmem:[#allocation2 + $0x10] sm:$0xe]  ;;  %v5733_v57 = vld [vmem:[#allocation2 + $0x64] sm:$0x1]  ;;  %1754 = vrot.lane.b32.xlu2 %v1745_v5, %s5236_s29  ;;  %1756 = vrot.lane.b32.xlu1 %v1746_v18, %s5236_s29 }
  0xbd   :  { %v2003_v53 = vunpack.c.l.b16 %v1599_v10  ;;  %v1611_v12 = vsel %vm5625_vm10, %v4805_v46, %v1610_v34  ;;  %v4783_v56 = vrot.slane %v1167_v49, 9  ;;  %v1615_v59 = vsel %vm5625_vm10, %v4806_v48, %v1614_v52  ;;  %v5740_v2 = vld [vmem:[#allocation2 + $0x6c] sm:$0x1]  ;;  %v806_v6 = vld [vmem:[#allocation2 + $0x60] sm:$0xe] }
  0xbe   :  { %v2006_v63 = vunpack.c.l.b16 %v1611_v12  ;;  %v1217_v0 = vrot.slane %v5725_v23, 5  ;;  %v4784_v1 = vrot.slane %v1168_v54, 9  ;;  %v2007_v58 = vunpack.c.l.b16 %v1615_v59  ;;  %v807_v13 = vld [vmem:[#allocation2 + $0x68] sm:$0xe]  ;;  %v939_v5 = vld [vmem:[#allocation2 + $0x7c] sm:$0x1] }
  0xbf   :  { %v5743_v55 = vpack.c.b16 %v2003_v53, %v2002_v22  ;;  %v1221_v62 = vrot.slane %v5729_v24, 5  ;;  %v4777_v14 = vrot.slane %v806_v6, 9  ;;  %v889_v60 = vrot.slane %v5733_v57, 5  ;;  %v940_v21 = vld [vmem:[#allocation2 + $0x84] sm:$0x1] }
  0xc0   :  { %v1218_v15 = vsel %vm5625_vm10, %v4783_v56, %v1217_v0  ;;  %v4778_v16 = vrot.slane %v807_v13, 9  ;;  %v893_v20 = vrot.slane %v5740_v2, 5  ;;  %v5750_v27 = vpack.c.b16 %v2007_v58, %v2006_v63  ;;  %v1179_v30 = vld [vmem:[#allocation2 + $0x78] sm:$0xe]  ;;  %v1180_v31 = vld [vmem:[#allocation2 + $0x80] sm:$0xe] }
  0xc1   :  { %v1222_v18 = vsel %vm5625_vm10, %v4784_v1, %v1221_v62  ;;  %v1864_v29 = vunpack.c.l.b16 %v1218_v15  ;;  %v1265_v32 = vrot.slane %v939_v5, 5  ;;  %v890_v36 = vsel %vm5625_vm10, %v4777_v14, %v889_v60  ;;  %v5758_v40 = vld [vmem:[#allocation2 + $0x14] sm:$0x1]  ;;  %v5760_v42 = vld [vmem:[#allocation2 + $0x1c] sm:$0x1] }
  0xc2   :  { %v1865_v44 = vunpack.c.l.b16 %v1222_v18  ;;  %v894_v38 = vsel %vm5625_vm10, %v4778_v16, %v893_v20  ;;  %v4795_v39 = vrot.slane %v1179_v30, 9  ;;  %v1738_v41 = vunpack.c.l.b16 %v890_v36  ;;  %v1536_v46 = vld [vmem:[#allocation2 + $0x10] sm:$0xe]  ;;  %v1537_v34 = vld [vmem:[#allocation2 + $0x18] sm:$0xe] }
  0xc3   :  { %v1739_v43 = vunpack.c.l.b16 %v894_v38  ;;  %v4796_v7 = vrot.slane %v1180_v31, 9  ;;  %v1269_v4 = vrot.slane %v940_v21, 5  ;;  %v4799_v48 = vrot.slane %v1536_v46, 9  ;;  %v5765_v49 = vld [vmem:[#allocation2 + $0x34] sm:$0x1]  ;;  %1752 = vrot.lane.b32.xlu0 %v1744_v51, %s5236_s29 }
  0xc4   :  { %v1880_v10 = vpack.c.b16 %v1865_v44, %v1864_v29  ;;  %v1266_v22 = vsel %vm5625_vm10, %v4795_v39, %v1265_v32  ;;  %v1586_v52 = vrot.slane %v5758_v40, 5  ;;  %v5767_v53 = vld [vmem:[#allocation2 + $0x3c] sm:$0x1]  ;;  %v4800_v59 = vrot.slane %v1537_v34, 9  ;;  %v802_v63 = vld [vmem:[#allocation2 + $0x30] sm:$0xe]  ;;  %1890 = vrot.lane.b32.xlu2 %v5710_v19, %s5237_s30  ;;  %1892 = vrot.lane.b32.xlu1 %v5715_v28, %s5237_s30 }
  0xc5   :  { %v5769_v12 = vpack.c.b16 %v1739_v43, %v1738_v41  ;;  %v1270_v54 = vsel %vm5625_vm10, %v4796_v7, %v1269_v4  ;;  %v1876_v56 = vunpack.c.l.b16 %v1266_v22  ;;  %v803_v0 = vld [vmem:[#allocation2 + $0x38] sm:$0xe]  ;;  %v1590_v58 = vrot.slane %v5760_v42, 5  ;;  %v1308_v13 = vld [vmem:[#allocation2 + $0x84] sm:$0x1] }
  0xc6   :  { %v1877_v1 = vunpack.c.l.b16 %v1270_v54  ;;  %v1587_v6 = vsel %vm5625_vm10, %v4799_v48, %v1586_v52  ;;  %v4773_v62 = vrot.slane %v802_v63, 9  ;;  %v1309_v14 = vld [vmem:[#allocation2 + $0x8c] sm:$0x1]  ;;  %v873_v15 = vrot.slane %v5765_v49, 5  ;;  %v1548_v16 = vld [vmem:[#allocation2 + $0x80] sm:$0xe] }
  0xc7   :  { %v2000_v5 = vunpack.c.l.b16 %v1587_v6  ;;  %v4774_v60 = vrot.slane %v803_v0, 9  ;;  %v877_v19 = vrot.slane %v5767_v53, 5  ;;  %v1591_v20 = vsel %vm5625_vm10, %v4800_v59, %v1590_v58  ;;  %v1549_v21 = vld [vmem:[#allocation2 + $0x88] sm:$0xe]  ;;  %v5787_v30 = vld [vmem:[#allocation2 + $0x34] sm:$0x1] }
  0xc8   :  { %v5783_v51 = vpack.c.b16 %v1877_v1, %v1876_v56  ;;  %v4811_v18 = vrot.slane %v1548_v16, 9  ;;  %v1634_v29 = vrot.slane %v1308_v13, 5  ;;  %v2001_v31 = vunpack.c.l.b16 %v1591_v20  ;;  %v5793_v36 = vld [vmem:[#allocation2 + $0x3c] sm:$0x1]  ;;  %v1540_v38 = vld [vmem:[#allocation2 + $0x30] sm:$0xe] }
  0xc9   :  { %v874_v28 = vsel %vm5625_vm10, %v4773_v62, %v873_v15  ;;  %v878_v32 = vsel %vm5625_vm10, %v4774_v60, %v877_v19  ;;  %v4812_v44 = vrot.slane %v1549_v21, 9  ;;  %v1638_v7 = vrot.slane %v1309_v14, 5  ;;  %v1541_v4 = vld [vmem:[#allocation2 + $0x38] sm:$0xe]  ;;  %v5797_v46 = vld [vmem:[#allocation2 + $0x3c] sm:$0x1] }
  0xca   :  { %v1734_v39 = vunpack.c.l.b16 %v874_v28  ;;  %v1735_v41 = vunpack.c.l.b16 %v878_v32  ;;  %v1635_v43 = vsel %vm5625_vm10, %v4811_v18, %v1634_v29  ;;  %v2016_v34 = vpack.c.b16 %v2001_v31, %v2000_v5  ;;  %v5800_v54 = vld [vmem:[#allocation2 + $0x44] sm:$0x1]  ;;  %v1173_v56 = vld [vmem:[#allocation2 + $0x38] sm:$0xe]  ;;  %v1174_v6 = vld [vmem:[#allocation2 + $0x40] sm:$0xe] }
  0xcb   :  { %v2012_v22 = vunpack.c.l.b16 %v1635_v43  ;;  %v4803_v48 = vrot.slane %v1540_v38, 9  ;;  %v1602_v52 = vrot.slane %v5787_v30, 5  ;;  %v1639_v63 = vsel %vm5625_vm10, %v4812_v44, %v1638_v7  ;;  %v539_v5 = vld [vmem:[#allocation2 + $0x10] sm:$0xf]  ;;  %1888 = vrot.lane.b32.xlu0 %v1880_v10, %s5237_s30  ;;  %v540_v29 = vld [vmem:[#allocation2 + $0x18] sm:$0xf] }
  0xcc   :  { %v5802_v59 = vpack.c.b16 %v1735_v41, %v1734_v39  ;;  %v4804_v0 = vrot.slane %v1541_v4, 9  ;;  %v1606_v1 = vrot.slane %v5793_v36, 5  ;;  %v2013_v58 = vunpack.c.l.b16 %v1639_v63  ;;  %2026 = vrot.lane.b32.xlu2 %v5743_v55, %s5238_s5  ;;  %2030 = vrot.lane.b32.xlu1 %v5750_v27, %s5238_s5  ;;  %v5822_v55 = vld [vmem:[#allocation2 + $0x6c] sm:$0x1]  ;;  %v1177_v32 = vld [vmem:[#allocation2 + $0x68] sm:$0xe] }
  0xcd   :  { %v1603_v62 = vsel %vm5625_vm10, %v4803_v48, %v1602_v52  ;;  %v4789_v13 = vrot.slane %v1173_v56, 9  ;;  %v1241_v14 = vrot.slane %v5797_v46, 5  ;;  %v4790_v19 = vrot.slane %v1174_v6, 9  ;;  %v5829_v41 = vld [vmem:[#allocation2 + $0x74] sm:$0x1] }
  0xce   :  { %v1607_v15 = vsel %vm5625_vm10, %v4804_v0, %v1606_v1  ;;  %v2004_v60 = vunpack.c.l.b16 %v1603_v62  ;;  %v1245_v16 = vrot.slane %v5800_v54, 5  ;;  %v5818_v20 = vpack.c.b16 %v2013_v58, %v2012_v22  ;;  %v1178_v43 = vld [vmem:[#allocation2 + $0x70] sm:$0xe]  ;;  %v913_v52 = vld [vmem:[#allocation2 + $0x18] sm:$0xf] }
  0xcf   :  { %v2005_v21 = vunpack.c.l.b16 %v1607_v15  ;;  %v1242_v18 = vsel %vm5625_vm10, %v4789_v13, %v1241_v14  ;;  %v601_v28 = vshrl.u32 %v539_v5, 16  ;;  %v604_v38 = vshll.u32 %v539_v5, 16 }
  0xd0   :  { %v1246_v10 = vsel %vm5625_vm10, %v4790_v19, %v1245_v16  ;;  %v1870_v31 = vunpack.c.l.b16 %v1242_v18  ;;  %v610_v39 = vshll.u32 %v5599_v45, 16  ;;  %v615_v4 = vshrl.u32 %v540_v29, 16  ;;  %v914_v16 = vld [vmem:[#allocation2 + $0x20] sm:$0xf] }
  0xd1   :  { %v5826_v44 = vpack.c.b16 %v2005_v21, %v2004_v60  ;;  %v1871_v27 = vunpack.c.l.b16 %v1246_v10  ;;  %v603_v7 = vrot.slane %v601_v28, 4  ;;  %v618_v22 = vshll.u32 %v540_v29, 16 }
  0xd2   :  { %v624_v48 = vshll.u32 %v5602_v25, 16  ;;  %v606_v63 = vrot.slane %v604_v38, 5  ;;  %v612_v0 = vrot.slane %v610_v39, 5  ;;  %v4793_v1 = vrot.slane %v1177_v32, 9  ;;  %v1546_v39 = vld [vmem:[#allocation2 + $0x70] sm:$0xe] }
  0xd3   :  { %v5832_v56 = vpack.c.b16 %v1871_v27, %v1870_v31  ;;  %v617_v6 = vrot.slane %v615_v4, 4  ;;  %v620_v58 = vrot.slane %v618_v22, 5  ;;  %v1257_v13 = vrot.slane %v5822_v55, 5  ;;  %2024 = vrot.lane.b32.xlu0 %v2016_v34, %s5238_s5  ;;  %v5852_v31 = vld [vmem:[#allocation2 + $0x74] sm:$0x1] }
  0xd4   :  { %v626_v62 = vrot.slane %v624_v48, 5  ;;  %v607_v45 = vor.u32 %v606_v63, %v603_v7  ;;  %v4794_v14 = vrot.slane %v1178_v43, 9  ;;  %v1261_v5 = vrot.slane %v5829_v41, 5  ;;  %1762 = vrot.lane.b32.xlu2 %v5769_v12, %s5236_s29  ;;  %1900 = vrot.lane.b32.xlu1 %v5783_v51, %s5237_s30  ;;  %v1547_v4 = vld [vmem:[#allocation2 + $0x78] sm:$0xe] }
  0xd5   :  { %v972_v15 = vshrl.u32 %v913_v52, 16  ;;  %v621_v60 = vor.u32 %v620_v58, %v617_v6  ;;  %v1258_v19 = vsel %vm5625_vm10, %v4793_v1, %v1257_v13  ;;  %v975_v21 = vshll.u32 %v913_v52, 16  ;;  %v5861_v1 = vld [vmem:[#allocation2 + $0x7c] sm:$0x1]  ;;  %v537_v6 = vld [vmem:[#allocation2] sm:$0xf] }
  0xd6   :  { %v981_v18 = vshll.u32 %v5649_v35, 16  ;;  %v608_v12 = vrot.slane %v607_v45, 4  ;;  %v1262_v34 = vsel %vm5625_vm10, %v4794_v14, %v1261_v5  ;;  %v1874_v29 = vunpack.c.l.b16 %v1258_v19 }
  0xd7   :  { %v974_v10 = vrot.slane %v972_v15, 4  ;;  %v622_v28 = vrot.slane %v621_v60, 4  ;;  %v1875_v32 = vunpack.c.l.b16 %v1262_v34  ;;  %v977_v27 = vrot.slane %v975_v21, 5 }
  0xd8   :  { %v983_v38 = vrot.slane %v981_v18, 5  ;;  %v613_v43 = vsel %vm5841_vm13, %v608_v12, %v612_v0  ;;  %v986_v35 = vshrl.u32 %v914_v16, 16  ;;  %v989_v7 = vshll.u32 %v914_v16, 16  ;;  %v538_v12 = vld [vmem:[#allocation2 + $0x8] sm:$0xf] }
  0xd9   :  { %v995_v51 = vshll.u32 %v5656_v37, 16  ;;  %v627_v22 = vsel %vm5841_vm13, %v622_v28, %v626_v62  ;;  %v5859_v48 = vunpack.c.l.b16 %v613_v43  ;;  %v1885_v52 = vpack.c.b16 %v1875_v32, %v1874_v29  ;;  %v1282_v32 = vld [vmem:[#allocation2 + $0x20] sm:$0xf] }
  0xda   :  { %v978_v63 = vor.u32 %v977_v27, %v974_v10  ;;  %v1691_v58 = vunpack.c.l.b16 %v627_v22  ;;  %v988_v13 = vrot.slane %v986_v35, 4  ;;  %v991_v45 = vrot.slane %v989_v7, 5 }
  0xdb   :  { %v997_v14 = vrot.slane %v995_v51, 5  ;;  %v4809_v5 = vrot.slane %v1546_v39, 9  ;;  %v1626_v15 = vrot.slane %v5852_v31, 5  ;;  %v4810_v37 = vrot.slane %v1547_v4, 9  ;;  %2028 = vrot.lane.b32.xlu0 %v5826_v44, %s5238_s5 }
  0xdc   :  { %v979_v0 = vrot.slane %v978_v63, 4  ;;  %v1705_v60 = vpack.c.b16 %v1691_v58, %v5859_v48  ;;  %v992_v19 = vor.u32 %v991_v45, %v988_v13  ;;  %v1630_v62 = vrot.slane %v5861_v1, 5  ;;  %1758 = vrot.lane.b32.xlu2 %v5802_v59, %s5236_s29  ;;  %2036 = vrot.lane.b32.xlu1 %v5818_v20, %s5238_s5  ;;  %v1283_v48 = vld [vmem:[#allocation2 + $0x28] sm:$0xf] }
  0xdd   :  { %v573_v16 = vshrl.u32 %v537_v6, 16  ;;  %v1627_v18 = vsel %vm5625_vm10, %v4809_v5, %v1626_v15  ;;  %v576_v34 = vshll.u32 %v537_v6, 16  ;;  %v582_v29 = vshll.u32 %v5692_v61, 16  ;;  %v808_v5 = vld [vmem:[#allocation2 + $0x70] sm:$0xe] }
  0xde   :  { %v984_v21 = vsel %vm5841_vm13, %v979_v0, %v983_v38  ;;  %v993_v10 = vrot.slane %v992_v19, 4  ;;  %v1631_v59 = vsel %vm5625_vm10, %v4810_v37, %v1630_v62  ;;  %v2010_v44 = vunpack.c.l.b16 %v1627_v18  ;;  %v5886_v0 = vld [vmem:[#allocation2 + $0x74] sm:$0x1]  ;;  %v5891_v19 = vld [vmem:[#allocation2 + $0x7c] sm:$0x1] }
  0xdf   :  { %v5877_v28 = vunpack.c.l.b16 %v984_v21  ;;  %v2011_v27 = vunpack.c.l.b16 %v1631_v59  ;;  %v575_v38 = vrot.slane %v573_v16, 4  ;;  %v578_v39 = vrot.slane %v576_v34, 5 }
  0xe0   :  { %v584_v43 = vrot.slane %v582_v29, 5  ;;  %v998_v35 = vsel %vm5841_vm13, %v993_v10, %v997_v14  ;;  %v587_v7 = vshrl.u32 %v538_v12, 16  ;;  %v590_v61 = vshll.u32 %v538_v12, 16  ;;  %v809_v12 = vld [vmem:[#allocation2 + $0x78] sm:$0xe] }
  0xe1   :  { %v596_v51 = vshll.u32 %v5694_v3, 16  ;;  %v5884_v20 = vunpack.c.l.b16 %v998_v35  ;;  %v2021_v4 = vpack.c.b16 %v2011_v27, %v2010_v44  ;;  %v579_v22 = vor.u32 %v578_v39, %v575_v38 }
  0xe2   :  { %v1341_v63 = vshrl.u32 %v1282_v32, 16  ;;  %v589_v6 = vrot.slane %v587_v7, 4  ;;  %v592_v58 = vrot.slane %v590_v61, 5  ;;  %v1344_v45 = vshll.u32 %v1282_v32, 16 }
  0xe3   :  { %v598_v13 = vrot.slane %v596_v51, 5  ;;  %v1841_v14 = vpack.c.b16 %v5884_v20, %v5877_v28  ;;  %v580_v15 = vrot.slane %v579_v22, 4  ;;  %v1350_v3 = vshll.u32 %v5708_v17, 16  ;;  %1898 = vrot.lane.b32.xlu0 %v1885_v52, %s5237_s30  ;;  %v911_v17 = vld [vmem:[#allocation2 + $0x8] sm:$0xf] }
  0xe4   :  { %v1343_v37 = vrot.slane %v1341_v63, 4  ;;  %v593_v62 = vor.u32 %v592_v58, %v589_v6  ;;  %v1346_v16 = vrot.slane %v1344_v45, 5  ;;  %v1355_v21 = vshrl.u32 %v1283_v48, 16  ;;  %1894 = vrot.lane.b32.xlu2 %v5832_v56, %s5237_s30  ;;  %1714 = vrot.lane.b32.xlu1 %v1705_v60, %s5239_s6  ;;  %v912_v20 = vld [vmem:[#allocation2 + $0x10] sm:$0xf] }
  0xe5   :  { %v1358_v18 = vshll.u32 %v1283_v48, 16  ;;  %v585_v34 = vsel %vm5841_vm13, %v580_v15, %v584_v43  ;;  %v1352_v29 = vrot.slane %v1350_v3, 5  ;;  %v1364_v10 = vshll.u32 %v5713_v26, 16 }
  0xe6   :  { %v4779_v28 = vrot.slane %v808_v5, 9  ;;  %v594_v59 = vrot.slane %v593_v62, 4  ;;  %v1688_v44 = vunpack.c.l.b16 %v585_v34  ;;  %v1347_v32 = vor.u32 %v1346_v16, %v1343_v37 }
  0xe7   :  { %v1357_v27 = vrot.slane %v1355_v21, 4  ;;  %v1360_v38 = vrot.slane %v1358_v18, 5  ;;  %v1366_v39 = vrot.slane %v1364_v10, 5  ;;  %v897_v56 = vrot.slane %v5886_v0, 5 }
  0xe8   :  { %v4780_v52 = vrot.slane %v809_v12, 9  ;;  %v599_v43 = vsel %vm5841_vm13, %v594_v59, %v598_v13  ;;  %v1348_v35 = vrot.slane %v1347_v32, 4  ;;  %v901_v26 = vrot.slane %v5891_v19, 5  ;;  %v1284_v13 = vld [vmem:[#allocation2 + $0x30] sm:$0xf] }
  0xe9   :  { %v944_v7 = vshrl.u32 %v911_v17, 16  ;;  %v1689_v61 = vunpack.c.l.b16 %v599_v43  ;;  %v1361_v51 = vor.u32 %v1360_v38, %v1357_v27  ;;  %v898_v60 = vsel %vm5625_vm10, %v4779_v28, %v897_v56  ;;  %v541_v38 = vld [vmem:[#allocation2 + $0x20] sm:$0xf] }
  0xea   :  { %v947_v22 = vshll.u32 %v911_v17, 16  ;;  %v1353_v48 = vsel %vm5841_vm13, %v1348_v35, %v1352_v29  ;;  %v902_v63 = vsel %vm5625_vm10, %v4780_v52, %v901_v26  ;;  %v1740_v6 = vunpack.c.l.b16 %v898_v60  ;;  %v1285_v29 = vld [vmem:[#allocation2 + $0x38] sm:$0xf]  ;;  %v542_v60 = vld [vmem:[#allocation2 + $0x28] sm:$0xf] }
  0xeb   :  { %v946_v58 = vrot.slane %v944_v7, 4  ;;  %v1704_v45 = vpack.c.b16 %v1689_v61, %v1688_v44  ;;  %v1362_v5 = vrot.slane %v1361_v51, 4  ;;  %v1962_v15 = vunpack.c.l.b16 %v1353_v48  ;;  %2034 = vrot.lane.b32.xlu0 %v2021_v4, %s5238_s5 }
  0xec   :  { %v1741_v37 = vunpack.c.l.b16 %v902_v63  ;;  %v949_v3 = vrot.slane %v947_v22, 5  ;;  %v953_v62 = vshll.u32 %v5725_v23, 16  ;;  %v958_v16 = vshrl.u32 %v912_v20, 16  ;;  %1850 = vrot.lane.b32.xlu1 %v1841_v14, %s5240_s7 }
  0xed   :  { %v961_v21 = vshll.u32 %v912_v20, 16  ;;  %1712 = vrot.lane.b32.xlu2 %v1704_v45, %s5239_s6  ;;  %v1367_v18 = vsel %vm5841_vm13, %v1362_v5, %v1366_v39  ;;  %v967_v34 = vshll.u32 %v5729_v24, 16  ;;  %v1369_v10 = vshrl.u32 %v1284_v13, 16 }
  0xee   :  { %v1750_v12 = vpack.c.b16 %v1741_v37, %v1740_v6  ;;  %v1963_v28 = vunpack.c.l.b16 %v1367_v18  ;;  %v950_v17 = vor.u32 %v949_v3, %v946_v58  ;;  %v955_v23 = vrot.slane %v953_v62, 5 }
  0xef   :  { %v960_v59 = vrot.slane %v958_v16, 4  ;;  %v963_v44 = vrot.slane %v961_v21, 5  ;;  %v969_v32 = vrot.slane %v967_v34, 5  ;;  %v1371_v4 = vrot.slane %v1369_v10, 4  ;;  %v1280_v34 = vld [vmem:[#allocation2 + $0x10] sm:$0xf] }
  0xf0   :  { %v1372_v27 = vshll.u32 %v1284_v13, 16  ;;  %v1977_v56 = vpack.c.b16 %v1963_v28, %v1962_v15  ;;  %v951_v52 = vrot.slane %v950_v17, 4  ;;  %v1378_v39 = vshll.u32 %v5787_v30, 16 }
  0xf1   :  { %v1383_v43 = vshrl.u32 %v1285_v29, 16  ;;  %v964_v24 = vor.u32 %v963_v44, %v960_v59  ;;  %v1386_v26 = vshll.u32 %v1285_v29, 16  ;;  %v1392_v7 = vshll.u32 %v5793_v36, 16  ;;  %v5921_v58 = vpop.permute.xlu2 %1812  ;;  %v1281_v44 = vld [vmem:[#allocation2 + $0x18] sm:$0xf] }
  0xf2   :  { %v1374_v35 = vrot.slane %v1372_v27, 5  ;;  %v956_v14 = vsel %vm5841_vm13, %v951_v52, %v955_v23  ;;  %v1380_v61 = vrot.slane %v1378_v39, 5  ;;  %v629_v20 = vshrl.u32 %v541_v38, 16 }
  0xf3   :  { %v1385_v51 = vrot.slane %v1383_v43, 4  ;;  %v965_v22 = vrot.slane %v964_v24, 4  ;;  %v1824_v48 = vunpack.c.l.b16 %v956_v14  ;;  %v1388_v6 = vrot.slane %v1386_v26, 5  ;;  %1764 = vrot.lane.b32.xlu0 %v1750_v12, %s5236_s29 }
  0xf4   :  { %v1375_v63 = vor.u32 %v1374_v35, %v1371_v4  ;;  %v1394_v30 = vrot.slane %v1392_v7, 5  ;;  %v631_v13 = vrot.slane %v629_v20, 4  ;;  %v632_v45 = vshll.u32 %v541_v38, 16  ;;  %1986 = vrot.lane.b32.xlu1 %v1977_v56, %s5241_s8  ;;  %v543_v7 = vld [vmem:[#allocation2 + $0x30] sm:$0xf] }
  0xf5   :  { %v638_v5 = vshll.u32 %v5621_v8, 16  ;;  %v970_v36 = vsel %vm5841_vm13, %v965_v22, %v969_v32  ;;  %v1389_v37 = vor.u32 %v1388_v6, %v1385_v51  ;;  %v643_v3 = vshrl.u32 %v542_v60, 16 }
  0xf6   :  { %v1376_v15 = vrot.slane %v1375_v63, 4  ;;  %v1825_v62 = vunpack.c.l.b16 %v970_v36  ;;  %v634_v16 = vrot.slane %v632_v45, 5  ;;  %v646_v18 = vshll.u32 %v542_v60, 16 }
  0xf7   :  { %v640_v21 = vrot.slane %v638_v5, 5  ;;  %v1390_v8 = vrot.slane %v1389_v37, 4  ;;  %v645_v10 = vrot.slane %v643_v3, 4  ;;  %v652_v12 = vshll.u32 %v5629_v11, 16 }
  0xf8   :  { %v1381_v29 = vsel %vm5841_vm13, %v1376_v15, %v1380_v61  ;;  %v1840_v28 = vpack.c.b16 %v1825_v62, %v1824_v48  ;;  %v635_v23 = vor.u32 %v634_v16, %v631_v13  ;;  %v648_v59 = vrot.slane %v646_v18, 5 }
  0xf9   :  { %v1964_v17 = vunpack.c.l.b16 %v1381_v29  ;;  %v1395_v32 = vsel %vm5841_vm13, %v1390_v8, %v1394_v30  ;;  %v654_v4 = vrot.slane %v652_v12, 5  ;;  %v1313_v27 = vshrl.u32 %v1280_v34, 16  ;;  %v5937_v6 = vpop.permute.xlu2 %1948  ;;  %v544_v30 = vld [vmem:[#allocation2 + $0x38] sm:$0xf] }
  0xfa   :  { %v1316_v38 = vshll.u32 %v1280_v34, 16  ;;  %1848 = vrot.lane.b32.xlu2 %v1840_v28, %s5240_s7  ;;  %v1965_v56 = vunpack.c.l.b16 %v1395_v32  ;;  %v636_v52 = vrot.slane %v635_v23, 4  ;;  %v649_v39 = vor.u32 %v648_v59, %v645_v10  ;;  %v915_v34 = vld [vmem:[#allocation2 + $0x28] sm:$0xf]  ;;  %v916_v59 = vld [vmem:[#allocation2 + $0x30] sm:$0xf] }
  0xfb   :  { %v1322_v43 = vshll.u32 %v5758_v40, 16  ;;  %v1315_v24 = vrot.slane %v1313_v27, 4  ;;  %v1327_v35 = vshrl.u32 %v1281_v44, 16  ;;  %v1330_v26 = vshll.u32 %v1281_v44, 16 }
  0xfc   :  { %v1318_v11 = vrot.slane %v1316_v38, 5  ;;  %v1978_v14 = vpack.c.b16 %v1965_v56, %v1964_v17  ;;  %v641_v61 = vsel %vm5841_vm13, %v636_v52, %v640_v21  ;;  %v650_v51 = vrot.slane %v649_v39, 4 }
  0xfd   :  { %v1324_v60 = vrot.slane %v1322_v43, 5  ;;  %v1692_v20 = vunpack.c.l.b16 %v641_v61  ;;  %v1329_v48 = vrot.slane %v1327_v35, 4  ;;  %v1332_v63 = vrot.slane %v1330_v26, 5  ;;  %v921_v35 = vld [vmem:[#allocation2 + $0x68] sm:$0xf] }
  0xfe   :  { %v1319_v22 = vor.u32 %v1318_v11, %v1315_v24  ;;  %1988 = vrot.lane.b32.xlu1 %v1978_v14, %s5241_s8  ;;  %v655_v40 = vsel %vm5841_vm13, %v650_v51, %v654_v4  ;;  %v1336_v13 = vshll.u32 %v5760_v42, 16  ;;  %v657_v45 = vshrl.u32 %v543_v7, 16  ;;  %v922_v51 = vld [vmem:[#allocation2 + $0x70] sm:$0xf] }
  0xff   :  { %v660_v5 = vshll.u32 %v543_v7, 16  ;;  %v1693_v36 = vunpack.c.l.b16 %v655_v40  ;;  %v1333_v37 = vor.u32 %v1332_v63, %v1329_v48  ;;  %v666_v3 = vshll.u32 %v5765_v49, 16 }
 0x100   :  { %v1320_v15 = vrot.slane %v1319_v22, 4  ;;  %v1338_v62 = vrot.slane %v1336_v13, 5  ;;  %v659_v16 = vrot.slane %v657_v45, 4  ;;  %v671_v18 = vshrl.u32 %v544_v30, 16 }
 0x101   :  { %v662_v21 = vrot.slane %v660_v5, 5  ;;  %v1706_v29 = vpack.c.b16 %v1693_v36, %v1692_v20  ;;  %v1334_v10 = vrot.slane %v1333_v37, 4  ;;  %v668_v12 = vrot.slane %v666_v3, 5 }
 0x102   :  { %v1325_v8 = vsel %vm5841_vm13, %v1320_v15, %v1324_v60  ;;  %v673_v17 = vrot.slane %v671_v18, 4  ;;  %v674_v23 = vshll.u32 %v544_v30, 16  ;;  %v680_v44 = vshll.u32 %v5767_v53, 16 }
 0x103   :  { %v1960_v28 = vunpack.c.l.b16 %v1325_v8  ;;  %v663_v42 = vor.u32 %v662_v21, %v659_v16  ;;  %1716 = vrot.lane.b32.xlu0 %v1706_v29, %s5239_s6  ;;  %v1339_v49 = vsel %vm5841_vm13, %v1334_v10, %v1338_v62  ;;  %v1000_v32 = vshrl.u32 %v915_v34, 16  ;;  %v917_v16 = vld [vmem:[#allocation2 + $0x38] sm:$0xf] }
 0x104   :  { %v1003_v4 = vshll.u32 %v915_v34, 16  ;;  %v1961_v27 = vunpack.c.l.b16 %v1339_v49  ;;  %v676_v56 = vrot.slane %v674_v23, 5  ;;  %v1009_v52 = vshll.u32 %v5672_v47, 16 }
 0x105   :  { %v664_v38 = vrot.slane %v663_v42, 4  ;;  %v682_v39 = vrot.slane %v680_v44, 5  ;;  %v1002_v43 = vrot.slane %v1000_v32, 4  ;;  %v1014_v11 = vshrl.u32 %v916_v59, 16 }
 0x106   :  { %v1005_v24 = vrot.slane %v1003_v4, 5  ;;  %v1976_v26 = vpack.c.b16 %v1961_v27, %v1960_v28  ;;  %v677_v14 = vor.u32 %v676_v56, %v673_v17  ;;  %v1011_v61 = vrot.slane %v1009_v52, 5  ;;  %v5953_v48 = vpop.permute.xlu2 %1820  ;;  %v918_v28 = vld [vmem:[#allocation2 + $0x40] sm:$0xf] }
 0x107   :  { %v669_v7 = vsel %vm5841_vm13, %v664_v38, %v668_v12  ;;  %v1016_v20 = vrot.slane %v1014_v11, 4  ;;  %v1017_v22 = vshll.u32 %v916_v59, 16  ;;  %v1023_v63 = vshll.u32 %v5678_v50, 16 }
 0x108   :  { %v1694_v53 = vunpack.c.l.b16 %v669_v7  ;;  %v1006_v60 = vor.u32 %v1005_v24, %v1002_v43  ;;  %1984 = vrot.lane.b32.xlu2 %v1976_v26, %s5241_s8  ;;  %v678_v47 = vrot.slane %v677_v14, 4  ;;  %v1084_v30 = vshrl.u32 %v921_v35, 16  ;;  %v547_v24 = vld [vmem:[#allocation2 + $0x60] sm:$0xf]  ;;  %v548_v14 = vld [vmem:[#allocation2 + $0x68] sm:$0xf] }
 0x109   :  { %v1087_v40 = vshll.u32 %v921_v35, 16  ;;  %v1019_v45 = vrot.slane %v1017_v22, 5  ;;  %v1093_v5 = vshll.u32 %v5822_v55, 16  ;;  %v1098_v36 = vshrl.u32 %v922_v51, 16  ;;  %v5969_v11 = vpop.permute.xlu1 %1808 }
 0x10a   :  { %v1007_v13 = vrot.slane %v1006_v60, 4  ;;  %v683_v15 = vsel %vm5841_vm13, %v678_v47, %v682_v39  ;;  %v1025_v37 = vrot.slane %v1023_v63, 5  ;;  %v1086_v3 = vrot.slane %v1084_v30, 4 }
 0x10b   :  { %v1089_v62 = vrot.slane %v1087_v40, 5  ;;  %v1695_v21 = vunpack.c.l.b16 %v683_v15  ;;  %v1020_v34 = vor.u32 %v1019_v45, %v1016_v20  ;;  %v1095_v50 = vrot.slane %v1093_v5, 5 }
 0x10c   :  { %v1012_v18 = vsel %vm5841_vm13, %v1007_v13, %v1011_v61  ;;  %v1100_v10 = vrot.slane %v1098_v36, 4  ;;  %v1101_v12 = vshll.u32 %v922_v51, 16  ;;  %v1107_v17 = vshll.u32 %v5829_v41, 16 }
 0x10d   :  { %v1828_v29 = vunpack.c.l.b16 %v1012_v18  ;;  %v1090_v8 = vor.u32 %v1089_v62, %v1086_v3  ;;  %v1707_v55 = vpack.c.b16 %v1695_v21, %v1694_v53  ;;  %v1021_v42 = vrot.slane %v1020_v34, 4  ;;  %v1290_v62 = vld [vmem:[#allocation2 + $0x70] sm:$0xf] }
 0x10e   :  { %v1028_v23 = vshrl.u32 %v917_v16, 16  ;;  %v1103_v49 = vrot.slane %v1101_v12, 5  ;;  %v1031_v44 = vshll.u32 %v917_v16, 16  ;;  %v1037_v32 = vshll.u32 %v5797_v46, 16  ;;  %v5971_v61 = vpop.permute.xlu2 %1956 }
 0x10f   :  { %v1091_v59 = vrot.slane %v1090_v8, 4  ;;  %1718 = vrot.lane.b32.xlu1 %v1707_v55, %s5239_s6  ;;  %v1026_v4 = vsel %vm5841_vm13, %v1021_v42, %v1025_v37  ;;  %v1109_v27 = vrot.slane %v1107_v17, 5  ;;  %v1042_v56 = vshrl.u32 %v918_v28, 16 }
 0x110   :  { %v1030_v38 = vrot.slane %v1028_v23, 4  ;;  %v1829_v52 = vunpack.c.l.b16 %v1026_v4  ;;  %v1104_v43 = vor.u32 %v1103_v49, %v1100_v10  ;;  %v1033_v41 = vrot.slane %v1031_v44, 5 }
 0x111   :  { %v1096_v39 = vsel %vm5841_vm13, %v1091_v59, %v1095_v50  ;;  %v1039_v26 = vrot.slane %v1037_v32, 5  ;;  %v1044_v46 = vrot.slane %v1042_v56, 4  ;;  %v1045_v7 = vshll.u32 %v918_v28, 16 }
 0x112   :  { %v1834_v35 = vunpack.c.l.b16 %v1096_v39  ;;  %v1842_v51 = vpack.c.b16 %v1829_v52, %v1828_v29  ;;  %v1105_v53 = vrot.slane %v1104_v43, 4  ;;  %v1034_v60 = vor.u32 %v1033_v41, %v1030_v38  ;;  %v549_v38 = vld [vmem:[#allocation2 + $0x70] sm:$0xf]  ;;  %v550_v41 = vld [vmem:[#allocation2 + $0x78] sm:$0xf] }
 0x113   :  { %v1051_v20 = vshll.u32 %v5800_v54, 16  ;;  %v1047_v22 = vrot.slane %v1045_v7, 5  ;;  %v713_v47 = vshrl.u32 %v547_v24, 16  ;;  %v716_v63 = vshll.u32 %v547_v24, 16 }
 0x114   :  { %v722_v30 = vshll.u32 %v5733_v57, 16  ;;  %1852 = vrot.lane.b32.xlu0 %v1842_v51, %s5240_s7  ;;  %v1110_v40 = vsel %vm5841_vm13, %v1105_v53, %v1109_v27  ;;  %v1035_v13 = vrot.slane %v1034_v60, 4  ;;  %v727_v5 = vshrl.u32 %v548_v14, 16  ;;  %v1291_v57 = vld [vmem:[#allocation2 + $0x78] sm:$0xf] }
 0x115   :  { %v1053_v45 = vrot.slane %v1051_v20, 5  ;;  %v1835_v36 = vunpack.c.l.b16 %v1110_v40  ;;  %v1048_v15 = vor.u32 %v1047_v22, %v1044_v46  ;;  %v715_v37 = vrot.slane %v713_v47, 4  ;;  %v5985_v49 = vpop.permute.xlu0 %1810 }
 0x116   :  { %v718_v3 = vrot.slane %v716_v63, 5  ;;  %v1040_v54 = vsel %vm5841_vm13, %v1035_v13, %v1039_v26  ;;  %v724_v16 = vrot.slane %v722_v30, 5  ;;  %v729_v21 = vrot.slane %v727_v5, 4  ;;  %v5987_v56 = vpop.permute.xlu1 %1944  ;;  %v5991_v24 = vpop.permute.xlu2 %1754 }
 0x117   :  { %v730_v18 = vshll.u32 %v548_v14, 16  ;;  %v1845_v34 = vpack.c.b16 %v1835_v36, %v1834_v35  ;;  %v1049_v50 = vrot.slane %v1048_v15, 4  ;;  %v1830_v29 = vunpack.c.l.b16 %v1040_v54 }
 0x118   :  { %v719_v8 = vor.u32 %v718_v3, %v715_v37  ;;  %v736_v12 = vshll.u32 %v5740_v2, 16  ;;  %v1453_v28 = vshrl.u32 %v1290_v62, 16  ;;  %v1456_v55 = vshll.u32 %v1290_v62, 16 }
 0x119   :  { %v732_v10 = vrot.slane %v730_v18, 5  ;;  %1858 = vrot.lane.b32.xlu2 %v1845_v34, %s5240_s7  ;;  %v1054_v42 = vsel %vm5841_vm13, %v1049_v50, %v1053_v45  ;;  %v1462_v23 = vshll.u32 %v5852_v31, 16  ;;  %v1467_v59 = vshrl.u32 %v1291_v57, 16  ;;  %v923_v45 = vld [vmem:[#allocation2 + $0x78] sm:$0xf] }
 0x11a   :  { %v720_v17 = vrot.slane %v719_v8, 4  ;;  %v1831_v44 = vunpack.c.l.b16 %v1054_v42  ;;  %v738_v4 = vrot.slane %v736_v12, 5  ;;  %v1455_v27 = vrot.slane %v1453_v28, 4  ;;  %v5218_v8 = vld [vmem:[#allocation2 + $0x7c] sm:$0x1] }
 0x11b   :  { %v733_v32 = vor.u32 %v732_v10, %v729_v21  ;;  %v1458_v52 = vrot.slane %v1456_v55, 5  ;;  %v1464_v39 = vrot.slane %v1462_v23, 5  ;;  %v1469_v43 = vrot.slane %v1467_v59, 4 }
 0x11c   :  { %v725_v2 = vsel %vm5841_vm13, %v720_v17, %v724_v16  ;;  %v1843_v31 = vpack.c.b16 %v1831_v44, %v1830_v29  ;;  %v1470_v46 = vshll.u32 %v1291_v57, 16  ;;  %v1476_v14 = vshll.u32 %v5861_v1, 16  ;;  %v924_v16 = vld [vmem:[#allocation2 + $0x80] sm:$0xf] }
 0x11d   :  { %v734_v35 = vrot.slane %v733_v32, 4  ;;  %v1698_v26 = vunpack.c.l.b16 %v725_v2  ;;  %v1459_v7 = vor.u32 %v1458_v52, %v1455_v27  ;;  %v741_v51 = vshrl.u32 %v549_v38, 16  ;;  %v6002_v12 = vpop.permute.xlu0 %1946 }
 0x11e   :  { %v744_v53 = vshll.u32 %v549_v38, 16  ;;  %1854 = vrot.lane.b32.xlu1 %v1843_v31, %s5240_s7  ;;  %v1472_v20 = vrot.slane %v1470_v46, 5  ;;  %v750_v22 = vshll.u32 %v5886_v0, 16  ;;  %v755_v47 = vshrl.u32 %v550_v41, 16  ;;  %v6006_v17 = vpop.permute.xlu1 %1818  ;;  %v6008_v27 = vpop.permute.xlu2 %1890 }
 0x11f   :  { %v739_v60 = vsel %vm5841_vm13, %v734_v35, %v738_v4  ;;  %v1460_v30 = vrot.slane %v1459_v7, 4  ;;  %v1478_v40 = vrot.slane %v1476_v14, 5  ;;  %v743_v13 = vrot.slane %v741_v51, 4  ;;  %v1286_v4 = vld [vmem:[#allocation2 + $0x40] sm:$0xf] }
 0x120   :  { %v1699_v63 = vunpack.c.l.b16 %v739_v60  ;;  %v1473_v5 = vor.u32 %v1472_v20, %v1469_v43  ;;  %v746_v36 = vrot.slane %v744_v53, 5  ;;  %v752_v15 = vrot.slane %v750_v22, 5  ;;  %v5220_v22 = vld [vmem:[#allocation2 + $0x44] sm:$0x1] }
 0x121   :  { %v757_v1 = vrot.slane %v755_v47, 4  ;;  %v1465_v3 = vsel %vm5841_vm13, %v1460_v30, %v1464_v39  ;;  %v758_v62 = vshll.u32 %v550_v41, 16  ;;  %v764_v54 = vshll.u32 %v5891_v19, 16  ;;  %v5219_v39 = vld [vmem:[#allocation2 + $0x84] sm:$0x1] }
 0x122   :  { %v1709_v37 = vpack.c.b16 %v1699_v63, %v1698_v26  ;;  %v1474_v21 = vrot.slane %v1473_v5, 4  ;;  %v1970_v0 = vunpack.c.l.b16 %v1465_v3  ;;  %v747_v18 = vor.u32 %v746_v36, %v743_v13  ;;  %v1287_v41 = vld [vmem:[#allocation2 + $0x48] sm:$0xf]  ;;  %v6015_v30 = vld [vmem:[#allocation2 + $0x58] sm:$0xf] }
 0x123   :  { %v1112_v57 = vshrl.u32 %v923_v45, 16  ;;  %v760_v34 = vrot.slane %v758_v62, 5  ;;  %v766_v50 = vrot.slane %v764_v54, 5  ;;  %v1115_v29 = vshll.u32 %v923_v45, 16  ;;  %v6017_v36 = vld [vmem:[#allocation2 + $0x5c] sm:$0xf0] }
 0x124   :  { %1722 = vrot.lane.b32.xlu0 %v1709_v37, %s5239_s6  ;;  %v1121_v10 = vshll.u32 %v5218_v8, 16  ;;  %v1479_v28 = vsel %vm5841_vm13, %v1474_v21, %v1478_v40  ;;  %v748_v55 = vrot.slane %v747_v18, 4  ;;  %v1126_v19 = vshrl.u32 %v924_v16, 16 }
 0x125   :  { %v1114_v42 = vrot.slane %v1112_v57, 4  ;;  %v1971_v23 = vunpack.c.l.b16 %v1479_v28  ;;  %v761_v59 = vor.u32 %v760_v34, %v757_v1  ;;  %v1117_v44 = vrot.slane %v1115_v29, 5  ;;  %v6021_v18 = vpop.permute.xlu0 %1814 }
 0x126   :  { %v1123_v32 = vrot.slane %v1121_v10, 5  ;;  %v753_v38 = vsel %vm5841_vm13, %v748_v55, %v752_v15  ;;  %v1128_v2 = vrot.slane %v1126_v19, 4  ;;  %v1129_v52 = vshll.u32 %v924_v16, 16  ;;  %v1292_v15 = vld [vmem:[#allocation2 + $0x80] sm:$0xf]  ;;  %v6023_v57 = vpop.permute.xlu1 %1954 }
 0x127   :  { %v1135_v43 = vshll.u32 %v5219_v39, 16  ;;  %v1981_v31 = vpack.c.b16 %v1971_v23, %v1970_v0  ;;  %v762_v35 = vrot.slane %v761_v59, 4  ;;  %v1700_v26 = vunpack.c.l.b16 %v753_v38  ;;  %v1293_v10 = vld [vmem:[#allocation2 + $0x88] sm:$0xf]  ;;  %v5222_v23 = vld [vmem:[#allocation2 + $0x84] sm:$0x1] }
 0x128   :  { %v1118_v46 = vor.u32 %v1117_v44, %v1114_v42  ;;  %v1131_v7 = vrot.slane %v1129_v52, 5  ;;  %v1397_v51 = vshrl.u32 %v1286_v4, 16  ;;  %v1400_v53 = vshll.u32 %v1286_v4, 16  ;;  %v6030_v52 = vpop.permute.xlu2 %2026 }
 0x129   :  { %v1137_v14 = vrot.slane %v1135_v43, 5  ;;  %1994 = vrot.lane.b32.xlu2 %v1981_v31, %s5241_s8  ;;  %v767_v60 = vsel %vm5841_vm13, %v762_v35, %v766_v50  ;;  %v1406_v47 = vshll.u32 %v5220_v22, 16  ;;  %v1411_v63 = vshrl.u32 %v1287_v41, 16  ;;  %v5221_v50 = vld [vmem:[#allocation2 + $0x4c] sm:$0x1] }
 0x12a   :  { %v1119_v20 = vrot.slane %v1118_v46, 4  ;;  %v1701_v40 = vunpack.c.l.b16 %v767_v60  ;;  %v1132_v13 = vor.u32 %v1131_v7, %v1128_v2  ;;  %v1399_v45 = vrot.slane %v1397_v51, 4  ;;  %v545_v2 = vld [vmem:[#allocation2 + $0x50] sm:$0xf]  ;;  %v561_v35 = vld [vmem:[#allocation2 + $0x54] sm:$0x1] }
 0x12b   :  { %v1402_v5 = vrot.slane %v1400_v53, 5  ;;  %v1408_v37 = vrot.slane %v1406_v47, 5  ;;  %v1413_v3 = vrot.slane %v1411_v63, 4  ;;  %v1414_v62 = vshll.u32 %v1287_v41, 16  ;;  %v5223_v60 = vld [vmem:[#allocation2 + $0x8c] sm:$0x1] }
 0x12c   :  { %v1124_v1 = vsel %vm5841_vm13, %v1119_v20, %v1123_v32  ;;  %v1710_v54 = vpack.c.b16 %v1701_v40, %v1700_v26  ;;  %v1133_v16 = vrot.slane %v1132_v13, 4  ;;  %v1420_v29 = vshll.u32 %v5221_v50, 16  ;;  %v546_v22 = vld [vmem:[#allocation2 + $0x58] sm:$0xf]  ;;  %v562_v40 = vld [vmem:[#allocation2 + $0x5c] sm:$0x1] }
 0x12d   :  { %v1836_v21 = vunpack.c.l.b16 %v1124_v1  ;;  %v1403_v0 = vor.u32 %v1402_v5, %v1399_v45  ;;  %v1416_v34 = vrot.slane %v1414_v62, 5  ;;  %v4866_v8 = vor.u32 %v6017_v36, %v6015_v30  ;;  %v4897_v5 = vld [vmem:[#allocation2 + $0x60] sm:$0xf] }
 0x12e   :  { %v1481_v28 = vshrl.u32 %v1292_v15, 16  ;;  %1724 = vrot.lane.b32.xlu1 %v1710_v54, %s5239_s6  ;;  %v1138_v55 = vsel %vm5841_vm13, %v1133_v16, %v1137_v14  ;;  %v1484_v19 = vshll.u32 %v1292_v15, 16  ;;  %v1490_v59 = vshll.u32 %v5222_v23, 16 }
 0x12f   :  { %v1404_v42 = vrot.slane %v1403_v0, 4  ;;  %v1837_v44 = vunpack.c.l.b16 %v1138_v55  ;;  %v1417_v32 = vor.u32 %v1416_v34, %v1413_v3  ;;  %v1422_v4 = vrot.slane %v1420_v29, 5  ;;  %v5115_v3 = vld [vmem:[#allocation2 + $0x64] sm:$0xf0]  ;;  %v804_v0 = vld [vmem:[#allocation2 + $0x50] sm:$0xe]  ;;  %v6040_v55 = vpop.permute.xlu0 %1950 }
 0x130   :  { %v1483_v38 = vrot.slane %v1481_v28, 4  ;;  %v1486_v43 = vrot.slane %v1484_v19, 5  ;;  %v1492_v41 = vrot.slane %v1490_v59, 5  ;;  %v1495_v31 = vshrl.u32 %v1293_v10, 16  ;;  %v805_v28 = vld [vmem:[#allocation2 + $0x58] sm:$0xe] }
 0x131   :  { %v1409_v39 = vsel %vm5841_vm13, %v1404_v42, %v1408_v37  ;;  %v1846_v26 = vpack.c.b16 %v1837_v44, %v1836_v21  ;;  %v1418_v46 = vrot.slane %v1417_v32, 4  ;;  %v1498_v14 = vshll.u32 %v1293_v10, 16  ;;  %v6042_v42 = vpop.permute.xlu1 %1756  ;;  %v919_v32 = vld [vmem:[#allocation2 + $0x58] sm:$0xf] }
 0x132   :  { %v1966_v7 = vunpack.c.l.b16 %v1409_v39  ;;  %v1487_v51 = vor.u32 %v1486_v43, %v1483_v38  ;;  %v1497_v53 = vrot.slane %v1495_v31, 4  ;;  %v1504_v20 = vshll.u32 %v5223_v60, 16 }
 0x133   :  { %v685_v47 = vshrl.u32 %v545_v2, 16  ;;  %1860 = vrot.lane.b32.xlu0 %v1846_v26, %s5240_s7  ;;  %v1423_v63 = vsel %vm5841_vm13, %v1418_v46, %v1422_v4  ;;  %v1500_v30 = vrot.slane %v1498_v14, 5  ;;  %v688_v13 = vshll.u32 %v545_v2, 16  ;;  %v6047_v26 = vpop.permute.xlu2 %1762 }
 0x134   :  { %v694_v45 = vshll.u32 %v561_v35, 16  ;;  %v1967_v36 = vunpack.c.l.b16 %v1423_v63  ;;  %v1488_v15 = vrot.slane %v1487_v51, 4  ;;  %v1506_v1 = vrot.slane %v1504_v20, 5  ;;  %v935_v51 = vld [vmem:[#allocation2 + $0x5c] sm:$0x1] }
 0x135   :  { %v687_v37 = vrot.slane %v685_v47, 4  ;;  %v1501_v62 = vor.u32 %v1500_v30, %v1497_v53  ;;  %v690_v54 = vrot.slane %v688_v13, 5  ;;  %v699_v21 = vshrl.u32 %v546_v22, 16 }
 0x136   :  { %v696_v16 = vrot.slane %v694_v45, 5  ;;  %v1979_v34 = vpack.c.b16 %v1967_v36, %v1966_v7  ;;  %1816 = vrot.lane.b32.xlu1 %v4866_v8, %s5234_s0  ;;  %v1493_v50 = vsel %vm5841_vm13, %v1488_v15, %v1492_v41  ;;  %v702_v29 = vshll.u32 %v546_v22, 16  ;;  %v920_v22 = vld [vmem:[#allocation2 + $0x60] sm:$0xf] }
 0x137   :  { %v708_v10 = vshll.u32 %v562_v40, 16  ;;  %v1502_v19 = vrot.slane %v1501_v62, 4  ;;  %v1972_v23 = vunpack.c.l.b16 %v1493_v50  ;;  %v691_v59 = vor.u32 %v690_v54, %v687_v37  ;;  %v567_v37 = vld [vmem:[#allocation2 + $0x84] sm:$0x1] }
 0x138   :  { %v701_v44 = vrot.slane %v699_v21, 4  ;;  %1990 = vrot.lane.b32.xlu2 %v1979_v34, %s5241_s8  ;;  %v704_v4 = vrot.slane %v702_v29, 5  ;;  %v4898_v8 = vor.u32 %v5115_v3, %v4897_v5  ;;  %v4775_v2 = vrot.slane %v804_v0, 9  ;;  %v936_v5 = vld [vmem:[#allocation2 + $0x64] sm:$0x1] }
 0x139   :  { %v710_v38 = vrot.slane %v708_v10, 5  ;;  %v1507_v39 = vsel %vm5841_vm13, %v1502_v19, %v1506_v1  ;;  %v692_v43 = vrot.slane %v691_v59, 4  ;;  %v881_v41 = vrot.slane %v561_v35, 5  ;;  %v810_v3 = vld [vmem:[#allocation2 + $0x80] sm:$0xe] }
 0x13a   :  { %v4776_v31 = vrot.slane %v805_v28, 9  ;;  %v1973_v46 = vunpack.c.l.b16 %v1507_v39  ;;  %v705_v7 = vor.u32 %v704_v4, %v701_v44  ;;  %v885_v14 = vrot.slane %v562_v40, 5  ;;  %v811_v0 = vld [vmem:[#allocation2 + $0x88] sm:$0xe]  ;;  %v568_v28 = vld [vmem:[#allocation2 + $0x8c] sm:$0x1] }
 0x13b   :  { %v1056_v53 = vshrl.u32 %v919_v32, 16  ;;  %v697_v60 = vsel %vm5841_vm13, %v692_v43, %v696_v16  ;;  %v882_v20 = vsel %vm5625_vm10, %v4775_v2, %v881_v41  ;;  %v1059_v47 = vshll.u32 %v919_v32, 16  ;;  %v1175_v19 = vld [vmem:[#allocation2 + $0x58] sm:$0xe]  ;;  %v1176_v2 = vld [vmem:[#allocation2 + $0x60] sm:$0xe] }
 0x13c   :  { %v1065_v63 = vshll.u32 %v935_v51, 16  ;;  %v1982_v30 = vpack.c.b16 %v1973_v46, %v1972_v23  ;;  %v706_v13 = vrot.slane %v705_v7, 4  ;;  %v1696_v35 = vunpack.c.l.b16 %v697_v60  ;;  %v6059_v23 = vpop.permute.xlu1 %1892 }
 0x13d   :  { %v886_v45 = vsel %vm5625_vm10, %v4776_v31, %v885_v14  ;;  %v1736_v36 = vunpack.c.l.b16 %v882_v20  ;;  %v1058_v15 = vrot.slane %v1056_v53, 4  ;;  %v1061_v1 = vrot.slane %v1059_v47, 5  ;;  %v551_v53 = vld [vmem:[#allocation2 + $0x80] sm:$0xf] }
 0x13e   :  { %v1737_v40 = vunpack.c.l.b16 %v886_v45  ;;  %1996 = vrot.lane.b32.xlu0 %v1982_v30, %s5241_s8  ;;  %v711_v62 = vsel %vm5841_vm13, %v706_v13, %v710_v38  ;;  %1952 = vrot.lane.b32.xlu1 %v4898_v8, %s5235_s21  ;;  %v1067_v54 = vrot.slane %v1065_v63, 5  ;;  %v1070_v16 = vshrl.u32 %v920_v22, 16  ;;  %v6061_v38 = vpop.permute.xlu0 %1752  ;;  %v6068_v63 = vpop.permute.xlu2 %1758 }
 0x13f   :  { %v1073_v21 = vshll.u32 %v920_v22, 16  ;;  %v1697_v34 = vunpack.c.l.b16 %v711_v62  ;;  %v1062_v29 = vor.u32 %v1061_v1, %v1058_v15  ;;  %v1079_v10 = vshll.u32 %v936_v5, 16  ;;  %v552_v15 = vld [vmem:[#allocation2 + $0x88] sm:$0xf] }
 0x140   :  { %v1748_v50 = vpack.c.b16 %v1737_v40, %v1736_v36  ;;  %v1072_v59 = vrot.slane %v1070_v16, 4  ;;  %v4781_v32 = vrot.slane %v810_v3, 9  ;;  %v905_v4 = vrot.slane %v567_v37, 5 }
 0x141   :  { %v1075_v44 = vrot.slane %v1073_v21, 5  ;;  %v1708_v8 = vpack.c.b16 %v1697_v34, %v1696_v35  ;;  %v1063_v39 = vrot.slane %v1062_v29, 4  ;;  %v1081_v43 = vrot.slane %v1079_v10, 5  ;;  %v925_v21 = vld [vmem:[#allocation2 + $0x88] sm:$0xf] }
 0x142   :  { %v4782_v41 = vrot.slane %v811_v0, 9  ;;  %v906_v46 = vsel %vm5625_vm10, %v4781_v32, %v905_v4  ;;  %v909_v7 = vrot.slane %v568_v28, 5  ;;  %v4791_v14 = vrot.slane %v1175_v19, 9 }
 0x143   :  { %v1076_v31 = vor.u32 %v1075_v44, %v1072_v59  ;;  %1720 = vrot.lane.b32.xlu2 %v1708_v8, %s5239_s6  ;;  %v1068_v60 = vsel %vm5841_vm13, %v1063_v39, %v1067_v54  ;;  %v1742_v20 = vunpack.c.l.b16 %v906_v46  ;;  %v1249_v22 = vrot.slane %v935_v51, 5 }
 0x144   :  { %v4792_v47 = vrot.slane %v1176_v2, 9  ;;  %v1832_v13 = vunpack.c.l.b16 %v1068_v60  ;;  %v910_v35 = vsel %vm5625_vm10, %v4782_v41, %v909_v7  ;;  %v1253_v45 = vrot.slane %v936_v5, 5  ;;  %v6079_v10 = vpop.permute.xlu1 %2030  ;;  %v6084_v7 = vld [vmem:[#allocation2 + $0x8c] sm:$0x1] }
 0x145   :  { %v1077_v30 = vrot.slane %v1076_v31, 4  ;;  %v1743_v36 = vunpack.c.l.b16 %v910_v35  ;;  %v1250_v40 = vsel %vm5625_vm10, %v4791_v14, %v1249_v22  ;;  %v769_v1 = vshrl.u32 %v551_v53, 16 }
 0x146   :  { %v772_v3 = vshll.u32 %v551_v53, 16  ;;  %1760 = vrot.lane.b32.xlu0 %v1748_v50, %s5236_s29  ;;  %v1254_v62 = vsel %vm5625_vm10, %v4792_v47, %v1253_v45  ;;  %v1872_v54 = vunpack.c.l.b16 %v1250_v40  ;;  %v778_v16 = vshll.u32 %v567_v37, 16  ;;  %v926_v50 = vld [vmem:[#allocation2 + $0x90] sm:$0xf]  ;;  %v6081_v4 = vpop.permute.xlu0 %1888 }
 0x147   :  { %v1082_v51 = vsel %vm5841_vm13, %v1077_v30, %v1081_v43  ;;  %v1751_v5 = vpack.c.b16 %v1743_v36, %v1742_v20  ;;  %v1873_v34 = vunpack.c.l.b16 %v1254_v62  ;;  %v771_v29 = vrot.slane %v769_v1, 4  ;;  %v1288_v43 = vld [vmem:[#allocation2 + $0x60] sm:$0xf]  ;;  %v6091_v1 = vpop.permute.xlu2 %1894 }
 0x148   :  { %v1833_v0 = vunpack.c.l.b16 %v1082_v51  ;;  %v774_v19 = vrot.slane %v772_v3, 5  ;;  %v780_v59 = vrot.slane %v778_v16, 5  ;;  %v783_v44 = vshrl.u32 %v552_v15, 16  ;;  %v1289_v16 = vld [vmem:[#allocation2 + $0x68] sm:$0xf] }
 0x149   :  { %v786_v32 = vshll.u32 %v552_v15, 16  ;;  %1766 = vrot.lane.b32.xlu1 %v1751_v5, %s5236_s29  ;;  %v1884_v8 = vpack.c.b16 %v1873_v34, %v1872_v54  ;;  %v792_v39 = vshll.u32 %v568_v28, 16  ;;  %v1140_v37 = vshrl.u32 %v925_v21, 16  ;;  %v1304_v5 = vld [vmem:[#allocation2 + $0x64] sm:$0x1] }
 0x14a   :  { %v1844_v2 = vpack.c.b16 %v1833_v0, %v1832_v13  ;;  %v775_v41 = vor.u32 %v774_v19, %v771_v29  ;;  %v785_v31 = vrot.slane %v783_v44, 4  ;;  %v1143_v14 = vshll.u32 %v925_v21, 16  ;;  %v6088_v13 = vld [vmem:[#allocation2 + $0x94] sm:$0x1] }
 0x14b   :  { %v788_v46 = vrot.slane %v786_v32, 5  ;;  %v794_v53 = vrot.slane %v792_v39, 5  ;;  %v1142_v60 = vrot.slane %v1140_v37, 4  ;;  %v1149_v20 = vshll.u32 %v6084_v7, 16 }
 0x14c   :  { %1856 = vrot.lane.b32.xlu2 %v1844_v2, %s5240_s7  ;;  %v1154_v22 = vshrl.u32 %v926_v50, 16  ;;  %v776_v47 = vrot.slane %v775_v41, 4  ;;  %v1145_v28 = vrot.slane %v1143_v14, 5  ;;  %v1157_v35 = vshll.u32 %v926_v50, 16  ;;  %v6096_v19 = vpop.permute.xlu1 %1900  ;;  %v1305_v2 = vld [vmem:[#allocation2 + $0x6c] sm:$0x1] }
 0x14d   :  { %v789_v30 = vor.u32 %v788_v46, %v785_v31  ;;  %v1151_v45 = vrot.slane %v1149_v20, 5  ;;  %v1163_v40 = vshll.u32 %v6088_v13, 16  ;;  %v1425_v15 = vshrl.u32 %v1288_v43, 16  ;;  %v1544_v46 = vld [vmem:[#allocation2 + $0x60] sm:$0xe] }
 0x14e   :  { %v1156_v36 = vrot.slane %v1154_v22, 4  ;;  %1896 = vrot.lane.b32.xlu0 %v1884_v8, %s5237_s30  ;;  %v781_v3 = vsel %vm5841_vm13, %v776_v47, %v780_v59  ;;  %v1146_v62 = vor.u32 %v1145_v28, %v1142_v60  ;;  %v1159_v54 = vrot.slane %v1157_v35, 5  ;;  %v6100_v39 = vpop.permute.xlu0 %2024  ;;  %v1545_v22 = vld [vmem:[#allocation2 + $0x68] sm:$0xe]  ;;  %v1294_v35 = vld [vmem:[#allocation2 + $0x90] sm:$0xf] }
 0x14f   :  { %v790_v51 = vrot.slane %v789_v30, 4  ;;  %v1702_v21 = vunpack.c.l.b16 %v781_v3  ;;  %v1165_v0 = vrot.slane %v1163_v40, 5  ;;  %v1427_v34 = vrot.slane %v1425_v15, 4 }
 0x150   :  { %v1428_v29 = vshll.u32 %v1288_v43, 16  ;;  %v1147_v32 = vrot.slane %v1146_v62, 4  ;;  %v1160_v50 = vor.u32 %v1159_v54, %v1156_v36  ;;  %v1434_v8 = vshll.u32 %v1304_v5, 16 }
 0x151   :  { %v795_v44 = vsel %vm5841_vm13, %v790_v51, %v794_v53  ;;  %v1439_v41 = vshrl.u32 %v1289_v16, 16  ;;  %v1442_v31 = vshll.u32 %v1289_v16, 16  ;;  %v1448_v20 = vshll.u32 %v1305_v2, 16 }
 0x152   :  { %v1703_v59 = vunpack.c.l.b16 %v795_v44  ;;  %v1430_v37 = vrot.slane %v1428_v29, 5  ;;  %v1152_v14 = vsel %vm5841_vm13, %v1147_v32, %v1151_v45  ;;  %v1161_v43 = vrot.slane %v1160_v50, 4  ;;  %v6107_v44 = vld [vmem:[#allocation2 + $0x94] sm:$0x1] }
 0x153   :  { %v1436_v60 = vrot.slane %v1434_v8, 5  ;;  %v1838_v53 = vunpack.c.l.b16 %v1152_v14  ;;  %v1441_v28 = vrot.slane %v1439_v41, 4  ;;  %v1444_v40 = vrot.slane %v1442_v31, 5  ;;  %v1295_v8 = vld [vmem:[#allocation2 + $0x98] sm:$0xf] }
 0x154   :  { %v1711_v47 = vpack.c.b16 %v1703_v59, %v1702_v21  ;;  %v1431_v30 = vor.u32 %v1430_v37, %v1427_v34  ;;  %v1166_v36 = vsel %vm5841_vm13, %v1161_v43, %v1165_v0  ;;  %v1450_v15 = vrot.slane %v1448_v20, 5  ;;  %v6114_v37 = vpop.permute.xlu2 %1712 }
 0x155   :  { %v4807_v3 = vrot.slane %v1544_v46, 9  ;;  %v1839_v51 = vunpack.c.l.b16 %v1166_v36  ;;  %v1618_v45 = vrot.slane %v1304_v5, 5  ;;  %v4808_v54 = vrot.slane %v1545_v22, 9  ;;  %v6116_v5 = vpop.permute.xlu1 %2036  ;;  %v1182_v36 = vld [vmem:[#allocation2 + $0x90] sm:$0xe] }
 0x156   :  { %1726 = vrot.lane.b32.xlu2 %v1711_v47, %s5239_s6  ;;  %v1432_v62 = vrot.slane %v1431_v30, 4  ;;  %v1445_v16 = vor.u32 %v1444_v40, %v1441_v28  ;;  %v1622_v29 = vrot.slane %v1305_v2, 5  ;;  %v1509_v21 = vshrl.u32 %v1294_v35, 16  ;;  %v6120_v46 = vpop.permute.xlu0 %2028  ;;  %v1181_v47 = vld [vmem:[#allocation2 + $0x88] sm:$0xe] }
 0x157   :  { %v1512_v34 = vshll.u32 %v1294_v35, 16  ;;  %v1847_v32 = vpack.c.b16 %v1839_v51, %v1838_v53  ;;  %v1619_v0 = vsel %vm5625_vm10, %v4807_v3, %v1618_v45  ;;  %v1518_v59 = vshll.u32 %v6107_v44, 16 }
 0x158   :  { %v1437_v50 = vsel %vm5841_vm13, %v1432_v62, %v1436_v60  ;;  %v1446_v41 = vrot.slane %v1445_v16, 4  ;;  %v1623_v2 = vsel %vm5625_vm10, %v4808_v54, %v1622_v29  ;;  %v2008_v31 = vunpack.c.l.b16 %v1619_v0  ;;  %v1311_v60 = vld [vmem:[#allocation2 + $0x9c] sm:$0x1]  ;;  %v1550_v29 = vld [vmem:[#allocation2 + $0x90] sm:$0xe] }
 0x159   :  { %1862 = vrot.lane.b32.xlu1 %v1847_v32, %s5240_s7  ;;  %v1968_v14 = vunpack.c.l.b16 %v1437_v50  ;;  %v2009_v43 = vunpack.c.l.b16 %v1623_v2  ;;  %v1511_v20 = vrot.slane %v1509_v21, 4  ;;  %v1514_v22 = vrot.slane %v1512_v34, 5  ;;  %v4817_v2 = vld [vmem:[#allocation2] sm:$0xf] }
 0x15a   :  { %v1451_v53 = vsel %vm5841_vm13, %v1446_v41, %v1450_v15  ;;  %v1523_v30 = vshrl.u32 %v1295_v8, 16  ;;  %v1526_v28 = vshll.u32 %v1295_v8, 16  ;;  %v1532_v35 = vshll.u32 %v1311_v60, 16  ;;  %v1551_v15 = vld [vmem:[#allocation2 + $0x98] sm:$0xe] }
 0x15b   :  { %v1969_v40 = vunpack.c.l.b16 %v1451_v53  ;;  %v2020_v3 = vpack.c.b16 %v2009_v43, %v2008_v31  ;;  %v1515_v51 = vor.u32 %v1514_v22, %v1511_v20  ;;  %v1520_v62 = vrot.slane %v1518_v59, 5  ;;  %v5095_v31 = vld [vmem:[#allocation2 + $0x4] sm:$0xf0]  ;;  %v5110_v53 = vld [vmem:[#allocation2 + $0x8c] sm:$0xf0] }
 0x15c   :  { %v1525_v45 = vrot.slane %v1523_v30, 4  ;;  %v1528_v54 = vrot.slane %v1526_v28, 5  ;;  %v4797_v16 = vrot.slane %v1181_v47, 9  ;;  %v1273_v34 = vrot.slane %v6084_v7, 5  ;;  %v4877_v47 = vld [vmem:[#allocation2 + $0x88] sm:$0xf] }
 0x15d   :  { %v1980_v32 = vpack.c.b16 %v1969_v40, %v1968_v14  ;;  %v1516_v21 = vrot.slane %v1515_v51, 4  ;;  %v4798_v50 = vrot.slane %v1182_v36, 9  ;;  %v1534_v8 = vrot.slane %v1532_v35, 5  ;;  %v1715_v7 = vpop.permute.xlu1 %1714 }
 0x15e   :  { %2032 = vrot.lane.b32.xlu2 %v2020_v3, %s5238_s5  ;;  %v1529_v0 = vor.u32 %v1528_v54, %v1525_v45  ;;  %v1277_v41 = vrot.slane %v6088_v13, 5  ;;  %v1274_v14 = vsel %vm5625_vm10, %v4797_v16, %v1273_v34  ;;  %v4813_v43 = vrot.slane %v1550_v29, 9  ;;  %v6136_v35 = vpop.permute.xlu0 %1898 }
 0x15f   :  { %1992 = vrot.lane.b32.xlu0 %v1980_v32, %s5241_s8  ;;  %v1521_v59 = vsel %vm5841_vm13, %v1516_v21, %v1520_v62  ;;  %v1642_v20 = vrot.slane %v6107_v44, 5  ;;  %v1878_v30 = vunpack.c.l.b16 %v1274_v14  ;;  %v4814_v28 = vrot.slane %v1551_v15, 9  ;;  %v2188_v62 = vld [vmem:[%s7523_s1 + $0x10] sm:$0x3]  ;;  %v1849_v44 = vpop.permute.xlu2 %1848  ;;  %v5096_v21 = vld [vmem:[#allocation2 + $0x14] sm:$0xf0] }
 0x160   :  { %v1530_v22 = vrot.slane %v1529_v0, 4  ;;  %v1278_v13 = vsel %vm5625_vm10, %v4798_v50, %v1277_v41  ;;  %v1974_v36 = vunpack.c.l.b16 %v1521_v59  ;;  %v1646_v3 = vrot.slane %v1311_v60, 5 }
 0x161   :  { %v1879_v40 = vunpack.c.l.b16 %v1278_v13  ;;  %v4818_v51 = vor.u32 %v5095_v31, %v4817_v2  ;;  %v4878_v16 = vor.u32 %v5110_v53, %v4877_v47  ;;  %v1643_v60 = vsel %vm5625_vm10, %v4813_v43, %v1642_v20  ;;  %v4909_v53 = vld [vmem:[#allocation2 + $0x90] sm:$0xf]  ;;  %v5118_v13 = vld [vmem:[#allocation2 + $0x94] sm:$0xf0] }
 0x162   :  { %v1535_v45 = vsel %vm5841_vm13, %v1530_v22, %v1534_v8  ;;  %v1647_v34 = vsel %vm5625_vm10, %v4814_v28, %v1646_v3  ;;  %v2198_v15 = vunpack.c.l.b16 %v2188_v62  ;;  %vm2221_vm0 = vcmask 1041408   ;;  %v4821_v8 = vld [vmem:[#allocation2 + $0x10] sm:$0xf] }
 0x163   :  { %v1975_v54 = vunpack.c.l.b16 %v1535_v45  ;;  %v1887_v29 = vpack.c.b16 %v1879_v40, %v1878_v30  ;;  %v2043_v32 = vsel %vm2040_vm14, %v4818_v51, %v6114_v37  ;;  %v4822_v2 = vor.u32 %v5096_v21, %v4821_v8 }
 0x164   :  { %v2067_v50 = vsel %vm2065_vm15, %v2043_v32, %v6061_v38  ;;  %v2201_v41 = vpack.c.b16 %v2198_v15, %v2198_v15  ;;  %v2014_v31 = vunpack.c.l.b16 %v1643_v60  ;;  %v2015_v59 = vunpack.c.l.b16 %v1647_v34 }
 0x165   :  { %v1983_v0 = vpack.c.b16 %v1975_v54, %v1974_v36  ;;  %v2084_v37 = vsel %vm2082_vm3, %v2067_v50, %v5969_v11  ;;  %v1851_v14 = vpop.permute.xlu1 %1850  ;;  %v2046_v20 = vsel %vm2040_vm14, %v4822_v2, %v1715_v7  ;;  %v5120_v11 = vld [vmem:[%s7523_s1 + $0x8] sm:$0xff]  ;;  %vm2133_vm6 = vcmask 195584   ;;  %v5098_v50 = vld [vmem:[#allocation2 + $0x34] sm:$0xf0] }
 0x166   :  { %1902 = vrot.lane.b32.xlu2 %v1887_v29, %s5237_s30  ;;  %v2101_v38 = vsel %vm2099_vm4, %v2084_v37, %v1849_v44  ;;  %v2223_v43 = vsel %vm2221_vm0, %v2201_v41, 0  ;;  %v6158_v22 = vpop.permute.xlu0 %2034  ;;  %v2069_v47 = vsel %vm2065_vm15, %v2046_v20, %v5991_v24  ;;  %v2023_v7 = vpack.c.b16 %v2015_v59, %v2014_v31  ;;  %v5119_v24 = vld [vmem:[%s7523_s1] sm:$0xff]  ;;  %v5097_v29 = vld [vmem:[#allocation2 + $0x24] sm:$0xf0]  ;;  %vm6385_vm0 = vmand %vm2441_vm9, %vm225_vm2 }
 0x167   :  { %1998 = vrot.lane.b32.xlu1 %v1983_v0, %s5241_s8  ;;  %1822 = vrot.lane.b32.xlu0 %v4878_v16, %s5234_s0  ;;  %v2118_v30 = vsel %vm2116_vm5, %v2101_v38, %v6081_v4  ;;  %v2086_v28 = vsel %vm2082_vm3, %v2069_v47, %v5985_v49  ;;  %v1985_v36 = vpop.permute.xlu2 %1984  ;;  %v4910_v51 = vor.u32 %v5118_v13, %v4909_v53  ;;  %v4825_v16 = vld [vmem:[#allocation2 + $0x20] sm:$0xf] }
 0x168   :  { %2230 = vmatpush.bf16.msra.mxu0 %v2223_v43  ;;  %5149 = vmatpush.bf16.msra.mxu3 %v2223_v43  ;;  %v2103_v40 = vsel %vm2099_vm4, %v2086_v28, %v1851_v14  ;;  %v2135_v49 = vsel %vm2133_vm6, %v2118_v30, %v5987_v56  ;;  %v4837_v20 = vld [vmem:[#allocation2 + $0x60] sm:$0xf] }
 0x169   :  { %v2120_v3 = vsel %vm2116_vm5, %v2103_v40, %v6008_v27  ;;  %v2152_v4 = vsel %vm2150_vm7, %v2135_v49, %v1985_v36  ;;  %v5101_v36 = vld [vmem:[#allocation2 + $0x74] sm:$0xf0] }
 0x16a   :  { %v2137_v27 = vsel %vm2133_vm6, %v2120_v3, %v6002_v12  ;;  %v2169_v45 = vsel %vm2167_vm8, %v2152_v4, %v6100_v39  ;;  %v4826_v12 = vor.u32 %v5097_v29, %v4825_v16  ;;  %v4829_v39 = vld [vmem:[#allocation2 + $0x30] sm:$0xf] }
 0x16b   :  { %v4830_v41 = vor.u32 %v5098_v50, %v4829_v39 }
 0x16c   :  { %2231 = vmatpush.bf16.msra.mxu0 %v5120_v11  ;;  %5150 = vmatpush.bf16.msra.mxu3 %v5120_v11  ;;  %v5100_v11 = vld [vmem:[#allocation2 + $0x64] sm:$0xf0] }
 0x16d   :  { %v1987_v62 = vpop.permute.xlu1 %1986 }
 0x16e   :  { %2038 = vrot.lane.b32.xlu2 %v2023_v7, %s5238_s5  ;;  %v2154_v44 = vsel %vm2150_vm7, %v2137_v27, %v1987_v62  ;;  %v1765_v54 = vpop.permute.xlu0 %1764  ;;  %v4841_v7 = vld [vmem:[#allocation2 + $0x70] sm:$0xf] }
 0x16f   :  { %1958 = vrot.lane.b32.xlu0 %v4910_v51, %s5235_s21  ;;  %v2171_v56 = vsel %vm2167_vm8, %v2154_v44, %v6030_v52  ;;  %v4842_v51 = vor.u32 %v5101_v36, %v4841_v7 }
 0x170   :  { %2232 = vmatpush.bf16.msra.mxu0 %v5119_v24  ;;  %5151 = vmatpush.bf16.msra.mxu3 %v5119_v24 }
 0x173   :  { %4919 = vmatmul.msk.bf16.vlgmr.msra.gmra.mxu0 %vm2204_vm11, %v2169_v45  ;;  %v1859_v31 = vpop.permute.xlu2 %1858 }
 0x175   :  { %v1989_v32 = vpop.permute.xlu1 %1988 }
 0x176   :  { %v1717_v21 = vpop.permute.xlu0 %1716 }
 0x177   :  { %v2049_v60 = vsel %vm2040_vm14, %v4826_v12, %v1717_v21  ;;  %v5099_v21 = vld [vmem:[#allocation2 + $0x54] sm:$0xf0] }
 0x178   :  { %v2071_v34 = vsel %vm2065_vm15, %v2049_v60, %v6042_v42 }
 0x179   :  { %v2088_v52 = vsel %vm2082_vm3, %v2071_v34, %v5921_v58 }
 0x181   :  { %v1719_v15 = vpop.permute.xlu1 %1718 }
 0x182   :  { %v2052_v2 = vsel %vm2040_vm14, %v4830_v41, %v1719_v15 }
 0x183   :  { %4920 = vmatmul.msk.bf16.gmra.mxu0 %vm2204_vm11, %v2171_v56  ;;  %v2073_v59 = vsel %vm2065_vm15, %v2052_v2, %v6068_v63  ;;  %v1995_v63 = vpop.permute.xlu2 %1994 }
 0x184   :  { %v2090_v58 = vsel %vm2082_vm3, %v2073_v59, %v6021_v18 }
 0x186   :  { %v1853_v0 = vpop.permute.xlu0 %1852 }
 0x187   :  { %v2105_v8 = vsel %vm2099_vm4, %v2088_v52, %v1853_v0 }
 0x188   :  { %v2122_v37 = vsel %vm2116_vm5, %v2105_v8, %v6059_v23 }
 0x189   :  { %v2139_v42 = vsel %vm2133_vm6, %v2122_v37, %v5937_v6  ;;  %v4838_v6 = vor.u32 %v5100_v11, %v4837_v20 }
 0x18a   :  { %v2156_v38 = vsel %vm2150_vm7, %v2139_v42, %v1989_v32  ;;  %v4833_v32 = vld [vmem:[#allocation2 + $0x50] sm:$0xf]  ;;  %v5102_v42 = vld [vmem:[#allocation2 + $0x84] sm:$0xf0] }
 0x18b   :  { %v2173_v43 = vsel %vm2167_vm8, %v2156_v38, %v6120_v46  ;;  %v4834_v12 = vor.u32 %v5099_v21, %v4833_v32 }
 0x190   :  { %v1855_v14 = vpop.permute.xlu1 %1854 }
 0x191   :  { %v2107_v23 = vsel %vm2099_vm4, %v2090_v58, %v1855_v14 }
 0x192   :  { %v2124_v47 = vsel %vm2116_vm5, %v2107_v23, %v6091_v1 }
 0x193   :  { %4921 = vmatmul.msk.bf16.gmra.mxu0 %vm2204_vm11, %v2173_v43 }
 0x196   :  { %v1723_v53 = vpop.permute.xlu0 %1722 }
 0x197   :  { %v2058_v13 = vsel %vm2040_vm14, %v4838_v6, %v1723_v53 }
 0x198   :  { %v2077_v18 = vsel %vm2065_vm15, %v2058_v13, %v6047_v26  ;;  %v2141_v26 = vsel %vm2133_vm6, %v2124_v47, %v6040_v55 }
 0x199   :  { %v2094_v46 = vsel %vm2082_vm3, %v2077_v18, %v6006_v17  ;;  %v1991_v17 = vpop.permute.xlu2 %1990 }
 0x19a   :  { %v2111_v30 = vsel %vm2099_vm4, %v2094_v46, %v1859_v31  ;;  %v4845_v31 = vld [vmem:[#allocation2 + $0x80] sm:$0xf] }
 0x19b   :  { %v2128_v28 = vsel %vm2116_vm5, %v2111_v30, %v6136_v35  ;;  %v2158_v35 = vsel %vm2150_vm7, %v2141_v26, %v1991_v17  ;;  %v4846_v59 = vor.u32 %v5102_v42, %v4845_v31 }
 0x19c   :  { %v2145_v1 = vsel %vm2133_vm6, %v2128_v28, %v6023_v57  ;;  %v2175_v57 = vsel %vm2167_vm8, %v2158_v35, %v6079_v10 }
 0x19d   :  { %v2162_v40 = vsel %vm2150_vm7, %v2145_v1, %v1995_v63 }
 0x19e   :  { %v2179_v3 = vsel %vm2167_vm8, %v2162_v40, %v6158_v22 }
 0x19f   :  { %4924 = vmatmul.msk.bf16.vlgmr.msra.gmra.mxu3 %vm2204_vm11, %v2179_v3 }
 0x1a0   :  { %v1725_v24 = vpop.permute.xlu1 %1724 }
 0x1a1   :  { %v2061_v49 = vsel %vm2040_vm14, %v4842_v51, %v1725_v24  ;;  %v1721_v56 = vpop.permute.xlu2 %1720 }
 0x1a2   :  { %v2079_v4 = vsel %vm2065_vm15, %v2061_v49, %v1765_v54  ;;  %v2055_v34 = vsel %vm2040_vm14, %v4834_v12, %v1721_v56 }
 0x1a3   :  { %4922 = vmatmul.msk.bf16.gmra.mxu0 %vm2204_vm11, %v2175_v57  ;;  %v2096_v55 = vsel %vm2082_vm3, %v2079_v4, %v5953_v48 }
 0x1a5   :  { %v1861_v22 = vpop.permute.xlu0 %1860 }
 0x1a6   :  { %v2113_v27 = vsel %vm2099_vm4, %v2096_v55, %v1861_v22 }
 0x1a7   :  { %v2130_v62 = vsel %vm2116_vm5, %v2113_v27, %v6096_v19 }
 0x1a8   :  { %v2147_v44 = vsel %vm2133_vm6, %v2130_v62, %v5971_v61  ;;  %v1817_v16 = vpop.permute.xlu1 %1816 }
 0x1a9   :  { %v1857_v29 = vpop.permute.xlu2 %1856 }
 0x1b0   :  { %v1997_v45 = vpop.permute.xlu0 %1996  ;;  %v1953_v60 = vpop.permute.xlu1 %1952 }
 0x1b1   :  { %v2164_v10 = vsel %vm2150_vm7, %v2147_v44, %v1997_v45  ;;  %v1727_v19 = vpop.permute.xlu2 %1726 }
 0x1b2   :  { %v2181_v54 = vsel %vm2167_vm8, %v2164_v10, %v6116_v5  ;;  %v2064_v58 = vsel %vm2040_vm14, %v4846_v59, %v1727_v19  ;;  %vm6379_vm14 = vmand %vm2441_vm9, %vm175_vm1 }
 0x1b3   :  { %4925 = vmatmul.msk.bf16.gmra.mxu3 %vm2204_vm11, %v2181_v54 }
 0x1b8   :  { %v1761_v48 = vpop.permute.xlu0 %1760 }
 0x1b9   :  { %v2075_v61 = vsel %vm2065_vm15, %v2055_v34, %v1761_v48  ;;  %v2033_v0 = vpop.permute.xlu2 %2032 }
 0x1ba   :  { %v2092_v50 = vsel %vm2082_vm3, %v2075_v61, %v1817_v16 }
 0x1bb   :  { %v2109_v15 = vsel %vm2099_vm4, %v2092_v50, %v1857_v29  ;;  %v1767_v5 = vpop.permute.xlu1 %1766 }
 0x1bc   :  { %v2081_v23 = vsel %vm2065_vm15, %v2064_v58, %v1767_v5 }
 0x1c0   :  { %v1897_v39 = vpop.permute.xlu0 %1896 }
 0x1c1   :  { %v2126_v52 = vsel %vm2116_vm5, %v2109_v15, %v1897_v39  ;;  %v1903_v14 = vpop.permute.xlu2 %1902 }
 0x1c2   :  { %v2143_v41 = vsel %vm2133_vm6, %v2126_v52, %v1953_v60 }
 0x1c9   :  { %v2039_v13 = vpop.permute.xlu2 %2038 }
 0x1cb   :  { %v1863_v38 = vpop.permute.xlu1 %1862 }
 0x1d1   :  { %v1993_v8 = vpop.permute.xlu0 %1992 }
 0x1d2   :  { %v2160_v37 = vsel %vm2150_vm7, %v2143_v41, %v1993_v8 }
 0x1d3   :  { %v2177_v2 = vsel %vm2167_vm8, %v2160_v37, %v2033_v0 }
 0x1d4   :  { %4923 = vmatmul.msk.bf16.gmra.mxu0 %vm2204_vm11, %v2177_v2 }
 0x1d9   :  { %v1823_v43 = vpop.permute.xlu0 %1822  ;;  %v1999_v63 = vpop.permute.xlu1 %1998 }
 0x1da   :  { %v2098_v20 = vsel %vm2082_vm3, %v2081_v23, %v1823_v43  ;;  %vm2439_vm3 = vcmask 60416  }
 0x1db   :  { %v2115_v11 = vsel %vm2099_vm4, %v2098_v20, %v1863_v38  ;;  %2440 = vst.msk [vmem:[#allocation3] sm:$0xf] %vm2439_vm3, %v5233_v33 }
 0x1dc   :  { %v2132_v6 = vsel %vm2116_vm5, %v2115_v11, %v1903_v14  ;;  %2443 = vst.msk [vmem:[#allocation3 + $0x50] sm:$0xf] %vm2439_vm3, %v5233_v33 }
 0x1dd   :  { %2446 = vst.msk [vmem:[#allocation3 + $0x48] sm:$0xf] %vm2439_vm3, %v5233_v33 }
 0x1de   :  { %2448 = vst.msk [vmem:[#allocation3 + $0x98] sm:$0xf] %vm2439_vm3, %v5233_v33  ;;  %v533_v33 = vld [vmem:[%s7524_s3] sm:$0x1] }
 0x1e1   :  { %v1959_v47 = vpop.permute.xlu0 %1958 }
 0x1e2   :  { %v2149_v53 = vsel %vm2133_vm6, %v2132_v6, %v1959_v47 }
 0x1e3   :  { %v2166_v18 = vsel %vm2150_vm7, %v2149_v53, %v1999_v63  ;;  %vm6454_vm7 = vmand %vm2439_vm3, %vm225_vm2  ;;  %vm4514_vm2 = vcmask 1043456   ;;  %v4993_v9 = vld [vmem:[#allocation3 + $0x50] sm:$0xf] }
 0x1e4   :  { %v2183_v46 = vsel %vm2167_vm8, %v2166_v18, %v2039_v13 }
 0x1e5   :  { %4926 = vmatmul.msk.bf16.gmra.mxu3 %vm2204_vm11, %v2183_v46  ;;  %vm4410_vm11 = vcmask 392192  }
 0x1f0   :  { %v6262_v30 = vpop.f32.mrf.mxu0 }
 0x1f1   :  { %v2319_v24 = vmul.f32 %v6262_v30, %v6262_v30  ;;  %v2274_v4 = vsel %vm2065_vm15, %v6262_v30, 0.0 }
 0x1f3   :  { %v2335_v44 = vsel %vm2065_vm15, %v2319_v24, 0.0 }
 0x1f8   :  { %v6264_v28 = vpop.f32.mrf.mxu0 }
 0x1f9   :  { %v2320_v17 = vmul.f32 %v6264_v28, %v6264_v28  ;;  %v2275_v35 = vsel %vm2065_vm15, %v6264_v28, 0.0 }
 0x1fa   :  { %v2276_v62 = vadd.f32 %v2275_v35, %v2274_v4 }
 0x1fb   :  { %v2336_v22 = vsel %vm2065_vm15, %v2320_v17, 0.0 }
 0x1fc   :  { %v2337_v54 = vadd.f32 %v2336_v22, %v2335_v44 }
 0x200   :  { %v6266_v1 = vpop.f32.mrf.mxu0 }
 0x201   :  { %v2321_v49 = vmul.f32 %v6266_v1, %v6266_v1  ;;  %v2277_v55 = vsel %vm2065_vm15, %v6266_v1, 0.0 }
 0x202   :  { %v2278_v16 = vadd.f32 %v2277_v55, %v2276_v62 }
 0x203   :  { %v2338_v45 = vsel %vm2065_vm15, %v2321_v49, 0.0 }
 0x204   :  { %v2339_v12 = vadd.f32 %v2338_v45, %v2337_v54 }
 0x208   :  { %v6268_v7 = vpop.f32.mrf.mxu0 }
 0x209   :  { %v2322_v27 = vmul.f32 %v6268_v7, %v6268_v7  ;;  %v2279_v56 = vsel %vm2065_vm15, %v6268_v7, 0.0 }
 0x20a   :  { %v2280_v60 = vadd.f32 %v2279_v56, %v2278_v16 }
 0x20b   :  { %v2340_v29 = vsel %vm2065_vm15, %v2322_v27, 0.0  ;;  %v5242_v27 = vmov 128.0  }
 0x20c   :  { %v2341_v39 = vadd.f32 %v2340_v29, %v2339_v12  ;;  %5212 = vrcp.f32 %v5242_v27 }
 0x210   :  { %v6270_v36 = vpop.f32.mrf.mxu0 }
 0x211   :  { %v2323_v10 = vmul.f32 %v6270_v36, %v6270_v36  ;;  %v2281_v48 = vsel %vm2065_vm15, %v6270_v36, 0.0 }
 0x212   :  { %v2282_v50 = vadd.f32 %v2281_v48, %v2280_v60  ;;  %v5213_v29 = vpop.eup %5212 }
 0x213   :  { %v2342_v19 = vsel %vm2065_vm15, %v2323_v10, 0.0  ;;  %vm2316_vm12 = vweird.f32 %v5213_v29 }
 0x214   :  { %v2343_v0 = vadd.f32 %v2342_v19, %v2341_v39  ;;  %v2312_v39 = vmul.f32 128.0, %v5213_v29 }
 0x218   :  { %v6272_v40 = vpop.f32.mrf.mxu0 }
 0x219   :  { %v2324_v32 = vmul.f32 %v6272_v40, %v6272_v40  ;;  %v2283_v34 = vsel %vm2065_vm15, %v6272_v40, 0.0 }
 0x21a   :  { %v2284_v8 = vadd.f32 %v2283_v34, %v2282_v50 }
 0x21b   :  { %v2344_v15 = vsel %vm2065_vm15, %v2324_v32, 0.0 }
 0x21c   :  { %v2345_v42 = vadd.f32 %v2344_v15, %v2343_v0 }
 0x220   :  { %v6274_v3 = vpop.f32.mrf.mxu0 }
 0x221   :  { %v2325_v61 = vmul.f32 %v6274_v3, %v6274_v3  ;;  %v2285_v5 = vsel %vm2065_vm15, %v6274_v3, 0.0 }
 0x222   :  { %v6276_v26 = vpop.f32.mrf.mxu3  ;;  %v2286_v59 = vadd.f32 %v2285_v5, %v2284_v8 }
 0x223   :  { %v2346_v37 = vsel %vm2065_vm15, %v2325_v61, 0.0  ;;  %v2329_v46 = vmul.f32 %v6276_v26, %v6276_v26  ;;  %v2293_v35 = vsel %vm2065_vm15, %v6276_v26, 0.0 }
 0x224   :  { %v2347_v43 = vadd.f32 %v2346_v37, %v2345_v42 }
 0x225   :  { %v2354_v4 = vsel %vm2065_vm15, %v2329_v46, 0.0 }
 0x228   :  { %v6280_v51 = vpop.f32.mrf.mxu0 }
 0x229   :  { %v2326_v52 = vmul.f32 %v6280_v51, %v6280_v51  ;;  %v2287_v2 = vsel %vm2065_vm15, %v6280_v51, 0.0 }
 0x22a   :  { %v6288_v57 = vpop.f32.mrf.mxu3  ;;  %v2288_v23 = vadd.f32 %v2287_v2, %v2286_v59  ;;  %v2313_v2 = vsub.f32 1.0, %v2312_v39 }
 0x22b   :  { %v2348_v38 = vsel %vm2065_vm15, %v2326_v52, 0.0  ;;  %v2330_v22 = vmul.f32 %v6288_v57, %v6288_v57  ;;  %v2295_v62 = vsel %vm2065_vm15, %v6288_v57, 0.0 }
 0x22c   :  { %v2349_v6 = vadd.f32 %v2348_v38, %v2347_v43 }
 0x22d   :  { %v2356_v45 = vsel %vm2065_vm15, %v2330_v22, 0.0 }
 0x236   :  { %v6320_v41 = vpop.f32.mrf.mxu3 }
 0x237   :  { %v2331_v56 = vmul.f32 %v6320_v41, %v6320_v41  ;;  %v2297_v16 = vsel %vm2065_vm15, %v6320_v41, 0.0 }
 0x239   :  { %v2358_v32 = vsel %vm2065_vm15, %v2331_v56, 0.0  ;;  %v2498_v56 = vld [vmem:[#allocation3 + $0x90] sm:$0x1] }
 0x23e   :  { %v6340_v17 = vpop.f32.mrf.mxu3 }
 0x23f   :  { %v2332_v12 = vmul.f32 %v6340_v17, %v6340_v17  ;;  %v2299_v34 = vsel %vm2065_vm15, %v6340_v17, 0.0 }
 0x241   :  { %v2360_v15 = vsel %vm2065_vm15, %v2332_v12, 0.0 }
 0x251   :  { %v6308_v21 = vpop.f32.mrf.mxu0 }
 0x252   :  { %v2327_v31 = vmul.f32 %v6308_v21, %v6308_v21  ;;  %v2289_v58 = vsel %vm2065_vm15, %v6308_v21, 0.0 }
 0x253   :  { %v2290_v63 = vadd.f32 %v2289_v58, %v2288_v23  ;;  %v2314_v23 = vmul.f32 %v5213_v29, %v2313_v2 }
 0x254   :  { %v2350_v11 = vsel %vm2065_vm15, %v2327_v31, 0.0 }
 0x255   :  { %v2351_v13 = vadd.f32 %v2350_v11, %v2349_v6 }
 0x259   :  { %v6330_v14 = vpop.f32.mrf.mxu0 }
 0x25a   :  { %v2328_v20 = vmul.f32 %v6330_v14, %v6330_v14  ;;  %v2291_v47 = vsel %vm2065_vm15, %v6330_v14, 0.0 }
 0x25b   :  { %v2292_v18 = vadd.f32 %v2291_v47, %v2290_v63  ;;  %v2315_v63 = vadd.f32 %v5213_v29, %v2314_v23  ;;  %v2453_v23 = vld [vmem:[#allocation3 + $0x8] sm:$0x1] }
 0x25c   :  { %v2352_v53 = vsel %vm2065_vm15, %v2328_v20, 0.0 }
 0x25d   :  { %v2353_v24 = vadd.f32 %v2352_v53, %v2351_v13  ;;  %v2294_v49 = vadd.f32 %v2293_v35, %v2292_v18 }
 0x25f   :  { %v2355_v55 = vadd.f32 %v2354_v4, %v2353_v24  ;;  %v2296_v44 = vadd.f32 %v2295_v62, %v2294_v49  ;;  %v6374_v24 = vsel %vm2316_vm12, %v5213_v29, %v2315_v63  ;;  %vm4444_vm12 = vcmask 523264  }
 0x260   :  { %7542 = vst [vmem:[#allocation4_spill] sm:$0xff] %v6374_v24 }
 0x261   :  { %v2357_v10 = vadd.f32 %v2356_v45, %v2355_v55  ;;  %v2298_v48 = vadd.f32 %v2297_v16, %v2296_v44  ;;  %v2499_v16 = vsel %vm6379_vm14, 0, %v2498_v56 }
 0x262   :  { %2500 = vst [vmem:[#allocation3 + $0x90] sm:$0x1] %v2499_v16 }
 0x263   :  { %v2359_v19 = vadd.f32 %v2358_v32, %v2357_v10  ;;  %v2300_v50 = vadd.f32 %v2299_v34, %v2298_v48  ;;  %v2547_v10 = vld [vmem:[#allocation3 + $0x94] sm:$0x1] }
 0x264   :  { %v2548_v29 = vsel %vm6385_vm0, 0, %v2547_v10 }
 0x265   :  { %v2361_v0 = vadd.f32 %v2360_v15, %v2359_v19  ;;  %2549 = vst [vmem:[#allocation3 + $0x94] sm:$0x1] %v2548_v29  ;;  %v2480_v19 = vld [vmem:[#allocation3 + $0x60] sm:$0x1] }
 0x266   :  { %v2481_v39 = vsel %vm6379_vm14, 0, %v2480_v19 }
 0x267   :  { %2482 = vst [vmem:[#allocation3 + $0x60] sm:$0x1] %v2481_v39 }
 0x268   :  { %v6352_v54 = vpop.f32.mrf.mxu3 }
 0x269   :  { %v2333_v60 = vmul.f32 %v6352_v54, %v6352_v54  ;;  %v2301_v61 = vsel %vm2065_vm15, %v6352_v54, 0.0 }
 0x26a   :  { %v2302_v52 = vadd.f32 %v2301_v61, %v2300_v50 }
 0x26b   :  { %v2362_v5 = vsel %vm2065_vm15, %v2333_v60, 0.0  ;;  %v2477_v60 = vld [vmem:[#allocation3 + $0x58] sm:$0x1] }
 0x26c   :  { %v2363_v42 = vadd.f32 %v2362_v5, %v2361_v0  ;;  %v2478_v61 = vsel %vm6379_vm14, 0, %v2477_v60 }
 0x26d   :  { %2479 = vst [vmem:[#allocation3 + $0x58] sm:$0x1] %v2478_v61 }
 0x270   :  { %v6367_v8 = vpop.f32.mrf.mxu3 }
 0x271   :  { %v2303_v37 = vsel %vm2065_vm15, %v6367_v8, 0.0  ;;  %v2334_v31 = vmul.f32 %v6367_v8, %v6367_v8 }
 0x272   :  { %v2304_v59 = vadd.f32 %v2303_v37, %v2302_v52  ;;  %v534_v37 = vld [vmem:[%s7524_s3 + $0x1] sm:$0x1] }
 0x273   :  { %v2364_v38 = vsel %vm2065_vm15, %v2334_v31, 0.0 }
 0x274   :  { %v2305_v58 = vrot.slane %v2304_v59, 4  ;;  %v2365_v43 = vadd.f32 %v2364_v38, %v2363_v42  ;;  %v2459_v42 = vld [vmem:[#allocation3 + $0x18] sm:$0x1] }
 0x275   :  { %v2460_v38 = vsel %vm6379_vm14, 0, %v2459_v42 }
 0x276   :  { %v2306_v20 = vadd.f32 %v2305_v58, %v2304_v59  ;;  %v2366_v11 = vrot.slane %v2365_v43, 4  ;;  %v2462_v59 = vld [vmem:[#allocation3 + $0x20] sm:$0x1]  ;;  %2461 = vst [vmem:[#allocation3 + $0x18] sm:$0x1] %v2460_v38 }
 0x277   :  { %v2463_v58 = vsel %vm6379_vm14, 0, %v2462_v59  ;;  %v2821_v59 = vld [vmem:[#allocation3 + $0x94] sm:$0x1] }
 0x278   :  { %v2307_v47 = vrot.slane %v2306_v20, 2  ;;  %v2367_v6 = vadd.f32 %v2366_v11, %v2365_v43  ;;  %2464 = vst [vmem:[#allocation3 + $0x20] sm:$0x1] %v2463_v58 }
 0x27a   :  { %v2308_v53 = vadd.f32 %v2307_v47, %v2306_v20  ;;  %v2368_v13 = vrot.slane %v2367_v6, 2  ;;  %v2456_v20 = vld [vmem:[#allocation3 + $0x10] sm:$0x1] }
 0x27c   :  { %v2309_v18 = vrot.slane %v2308_v53, 1  ;;  %v2369_v46 = vadd.f32 %v2368_v13, %v2367_v6 }
 0x27e   :  { %v2310_v35 = vadd.f32 %v2309_v18, %v2308_v53  ;;  %v2370_v49 = vrot.slane %v2369_v46, 1  ;;  %v2454_v18 = vsel %vm6379_vm14, 0, %v2453_v23 }
 0x27f   :  { %2455 = vst [vmem:[#allocation3 + $0x8] sm:$0x1] %v2454_v18 }
 0x280   :  { %v2318_v4 = vmul.f32 %v6374_v24, %v2310_v35  ;;  %v2371_v22 = vadd.f32 %v2370_v49, %v2369_v46  ;;  %v2483_v46 = vld [vmem:[#allocation3 + $0x68] sm:$0x1] }
 0x282   :  { %v2372_v62 = vmul.f32 %v2371_v22, %v6374_v24  ;;  %v2373_v44 = vmul.f32 %v2318_v4, %v2318_v4 }
 0x284   :  { %v2374_v45 = vsub.f32 %v2372_v62, %v2373_v44 }
 0x286   :  { %v2375_v48 = vadd.f32 1e-05, %v2374_v45 }
 0x288   :  { %5214 = vrsqrt.f32 %v2375_v48  ;;  %vm2382_vm9 = vweird.f32 %v2375_v48 }
 0x28e   :  { %v5215_v32 = vpop.eup %5214 }
 0x28f   :  { %v2377_v12 = vmul.f32 %v5215_v32, %v2375_v48  ;;  %vm2383_vm1 = vweird.f32 %v5215_v32 }
 0x290   :  { %vm2384_vm5 = vmor %vm2382_vm9, %vm2383_vm1 }
 0x291   :  { %v2378_v34 = vmul.f32 %v5215_v32, %v2377_v12 }
 0x293   :  { %v2379_v50 = vmul.f32 0.5, %v2378_v34 }
 0x295   :  { %v2380_v15 = vsub.f32 1.5, %v2379_v50 }
 0x297   :  { %v2381_v5 = vmul.f32 %v5215_v32, %v2380_v15 }
 0x299   :  { %v2385_v52 = vsel %vm2384_vm5, %v5215_v32, %v2381_v5 }
 0x29a   :  { %v2386_v0 = vmul.f32 %v2385_v52, %v533_v33  ;;  %v2818_v52 = vld [vmem:[#allocation3 + $0x90] sm:$0xf] }
 0x29c   :  { %v2387_v2 = vmul.f32 %v2386_v0, %v2318_v4  ;;  %v6412_v31 = vperm.slane %v2386_v0, 0 }
 0x29e   :  { %v2388_v43 = vsub.f32 %v534_v37, %v2387_v2  ;;  %v2405_v11 = vmul.f32 %v6412_v31, %v6367_v8  ;;  %v2398_v47 = vmul.f32 %v6412_v31, %v6308_v21  ;;  %v2399_v6 = vmul.f32 %v6412_v31, %v6330_v14 }
 0x29f   :  { %v2392_v63 = vmul.f32 %v6412_v31, %v6266_v1  ;;  %v2393_v13 = vmul.f32 %v6412_v31, %v6268_v7  ;;  %v2457_v8 = vsel %vm6379_vm14, 0, %v2456_v20  ;;  %v2390_v21 = vmul.f32 %v6412_v31, %v6262_v30 }
 0x2a0   :  { %v6426_v53 = vperm.slane %v2388_v43, 0  ;;  %v2391_v14 = vmul.f32 %v6412_v31, %v6264_v28  ;;  %v2400_v1 = vmul.f32 %v6412_v31, %v6276_v26  ;;  %v2484_v7 = vsel %vm6379_vm14, 0, %v2483_v46  ;;  %2458 = vst [vmem:[#allocation3 + $0x10] sm:$0x1] %v2457_v8  ;;  %v2782_v46 = vld [vmem:[#allocation3 + $0x60] sm:$0xf] }
 0x2a1   :  { %2485 = vst [vmem:[#allocation3 + $0x68] sm:$0x1] %v2484_v7 }
 0x2a2   :  { %v2422_v35 = vadd.f32 %v6426_v53, %v2405_v11  ;;  %v2415_v49 = vadd.f32 %v6426_v53, %v2398_v47  ;;  %v2416_v4 = vadd.f32 %v6426_v53, %v2399_v6  ;;  %v2409_v22 = vadd.f32 %v6426_v53, %v2392_v63  ;;  %v2776_v11 = vld [vmem:[#allocation3 + $0x58] sm:$0xf] }
 0x2a3   :  { %v2410_v30 = vadd.f32 %v6426_v53, %v2393_v13  ;;  %v2407_v28 = vadd.f32 %v6426_v53, %v2390_v21  ;;  %v2408_v62 = vadd.f32 %v6426_v53, %v2391_v14  ;;  %v2417_v26 = vadd.f32 %v6426_v53, %v2400_v1 }
 0x2a4   :  { %v2438_v44 = vmax.f32 %v2422_v35, 0.0  ;;  %v2431_v45 = vmax.f32 %v2415_v49, 0.0  ;;  %v2432_v56 = vmax.f32 %v2416_v4, 0.0  ;;  %v2425_v10 = vmax.f32 %v2409_v22, 0.0  ;;  %v2740_v35 = vld [vmem:[#allocation3 + $0x18] sm:$0xf] }
 0x2a5   :  { %v2426_v16 = vmax.f32 %v2410_v30, 0.0  ;;  %v2423_v29 = vmax.f32 %v2407_v28, 0.0  ;;  %v2424_v48 = vmax.f32 %v2408_v62, 0.0  ;;  %v2433_v33 = vmax.f32 %v2417_v26, 0.0  ;;  %v2746_v28 = vld [vmem:[#allocation3 + $0x20] sm:$0xf] }
 0x2a6   :  { %v2565_v32 = vpack.c.bf16 %v2438_v44, %v2438_v44  ;;  %v2558_v12 = vpack.c.bf16 %v2431_v45, %v2431_v45  ;;  %v2559_v60 = vpack.c.bf16 %v2432_v56, %v2432_v56  ;;  %v2552_v19 = vpack.c.bf16 %v2425_v10, %v2425_v10 }
 0x2a7   :  { %v2553_v34 = vpack.c.bf16 %v2426_v16, %v2426_v16  ;;  %v2550_v61 = vpack.c.bf16 %v2423_v29, %v2423_v29  ;;  %v2551_v15 = vpack.c.bf16 %v2424_v48, %v2424_v48  ;;  %v2560_v21 = vpack.c.bf16 %v2433_v33, %v2433_v33  ;;  %v2728_v16 = vld [vmem:[#allocation3 + $0x8] sm:$0xf]  ;;  %v2468_v33 = vld [vmem:[#allocation3 + $0x30] sm:$0x1] }
 0x2a8   :  { %v2687_v39 = vshrl.u32 %v2565_v32, 16  ;;  %v2631_v50 = vshrl.u32 %v2558_v12, 16  ;;  %v2690_v5 = vshll.u32 %v2565_v32, 16  ;;  %v2634_v0 = vshll.u32 %v2558_v12, 16  ;;  %v2465_v48 = vld [vmem:[#allocation3 + $0x28] sm:$0x1] }
 0x2a9   :  { %v2639_v37 = vshrl.u32 %v2559_v60, 16  ;;  %v2583_v2 = vshrl.u32 %v2552_v19, 16  ;;  %v2642_v58 = vshll.u32 %v2559_v60, 16  ;;  %v2591_v43 = vshrl.u32 %v2553_v34, 16 }
 0x2aa   :  { %v2689_v42 = vrot.slane %v2687_v39, 7  ;;  %v6450_v38 = vrot.slane %v2631_v50, 7  ;;  %v2586_v6 = vshll.u32 %v2552_v19, 16  ;;  %v2567_v63 = vshrl.u32 %v2550_v61, 16  ;;  %v2734_v19 = vld [vmem:[#allocation3 + $0x10] sm:$0xf] }
 0x2ab   :  { %v6458_v20 = vrot.slane %v2639_v37, 7  ;;  %v6460_v47 = vrot.slane %v2583_v2, 7  ;;  %v2594_v7 = vshll.u32 %v2553_v34, 16  ;;  %v6471_v30 = vrot.slane %v2591_v43, 7  ;;  %v2489_v43 = vld [vmem:[#allocation3 + $0x78] sm:$0x1] }
 0x2ac   :  { %v2692_v13 = vor.u32 %v2690_v5, %v2689_v42  ;;  %v2693_v18 = vrot.slane %v2689_v42, 4  ;;  %v2636_v8 = vor.u32 %v2634_v0, %v6450_v38  ;;  %v6475_v26 = vrot.slane %v2567_v63, 7  ;;  %v2788_v0 = vld [vmem:[#allocation3 + $0x68] sm:$0xf] }
 0x2ad   :  { %v2644_v14 = vor.u32 %v2642_v58, %v6458_v20  ;;  %v2588_v1 = vor.u32 %v2586_v6, %v6460_v47  ;;  %v2570_v44 = vshll.u32 %v2550_v61, 16  ;;  %v2575_v45 = vshrl.u32 %v2551_v15, 16 }
 0x2ae   :  { %v2819_v49 = vsel %vm6454_vm7, %v2692_v13, %v2818_v52  ;;  %v2822_v4 = vsel %vm6379_vm14, %v2693_v18, %v2821_v59  ;;  %v2777_v22 = vsel %vm6454_vm7, %v2636_v8, %v2776_v11  ;;  %v2596_v56 = vor.u32 %v2594_v7, %v6471_v30  ;;  %v2492_v13 = vld [vmem:[#allocation3 + $0x80] sm:$0x1] }
 0x2af   :  { %2820 = vst [vmem:[#allocation3 + $0x90] sm:$0xf] %v2819_v49  ;;  %v2783_v62 = vsel %vm6454_vm7, %v2644_v14, %v2782_v46  ;;  %v2741_v10 = vsel %vm6454_vm7, %v2588_v1, %v2740_v35  ;;  %v2647_v29 = vshrl.u32 %v2560_v21, 16  ;;  %v2572_v32 = vor.u32 %v2570_v44, %v6475_v26  ;;  %v2486_v46 = vld [vmem:[#allocation3 + $0x70] sm:$0x1] }
 0x2b0   :  { %2823 = vst [vmem:[#allocation3 + $0x94] sm:$0x1] %v2822_v4  ;;  %v6481_v12 = vrot.slane %v2575_v45, 7  ;;  %v2578_v60 = vshll.u32 %v2551_v15, 16  ;;  %v2747_v34 = vsel %vm6454_vm7, %v2596_v56, %v2746_v28  ;;  %v2650_v39 = vshll.u32 %v2560_v21, 16 }
 0x2b1   :  { %2778 = vst [vmem:[#allocation3 + $0x58] sm:$0xf] %v2777_v22  ;;  %v6485_v61 = vrot.slane %v2647_v29, 7  ;;  %v2394_v50 = vmul.f32 %v6412_v31, %v6270_v36  ;;  %v2729_v52 = vsel %vm6454_vm7, %v2572_v32, %v2728_v16  ;;  %v2395_v15 = vmul.f32 %v6412_v31, %v6272_v40  ;;  %v2471_v4 = vld [vmem:[#allocation3 + $0x38] sm:$0x1] }
 0x2b2   :  { %2784 = vst [vmem:[#allocation3 + $0x60] sm:$0xf] %v2783_v62  ;;  %v2580_v5 = vor.u32 %v2578_v60, %v6481_v12  ;;  %v2466_v42 = vsel %vm6379_vm14, 0, %v2465_v48  ;;  %v2469_v58 = vsel %vm6379_vm14, 0, %v2468_v33  ;;  %v2402_v6 = vmul.f32 %v6412_v31, %v6320_v41 }
 0x2b3   :  { %2742 = vst [vmem:[#allocation3 + $0x18] sm:$0xf] %v2741_v10  ;;  %v2652_v37 = vor.u32 %v2650_v39, %v6485_v61  ;;  %v2411_v2 = vadd.f32 %v6426_v53, %v2394_v50  ;;  %v2412_v59 = vadd.f32 %v6426_v53, %v2395_v15  ;;  %v2403_v63 = vmul.f32 %v6412_v31, %v6340_v17 }
 0x2b4   :  { %2748 = vst [vmem:[#allocation3 + $0x20] sm:$0xf] %v2747_v34  ;;  %v2735_v36 = vsel %vm6454_vm7, %v2580_v5, %v2734_v19  ;;  %v2401_v8 = vmul.f32 %v6412_v31, %v6288_v57  ;;  %v2419_v1 = vadd.f32 %v6426_v53, %v2402_v6  ;;  %v2490_v17 = vsel %vm6379_vm14, 0, %v2489_v43  ;;  %v2495_v43 = vld [vmem:[#allocation3 + $0x88] sm:$0x1] }
 0x2b5   :  { %2730 = vst [vmem:[#allocation3 + $0x8] sm:$0xf] %v2729_v52  ;;  %v2789_v40 = vsel %vm6454_vm7, %v2652_v37, %v2788_v0  ;;  %v2427_v11 = vmax.f32 %v2411_v2, 0.0  ;;  %v2428_v18 = vmax.f32 %v2412_v59, 0.0  ;;  %v2420_v7 = vadd.f32 %v6426_v53, %v2403_v63 }
 0x2b6   :  { %2736 = vst [vmem:[#allocation3 + $0x10] sm:$0xf] %v2735_v36  ;;  %v2418_v49 = vadd.f32 %v6426_v53, %v2401_v8  ;;  %v2493_v62 = vsel %vm6379_vm14, 0, %v2492_v13  ;;  %v2487_v44 = vsel %vm6379_vm14, 0, %v2486_v46  ;;  %v2396_v29 = vmul.f32 %v6412_v31, %v6274_v3 }
 0x2b7   :  { %2790 = vst [vmem:[#allocation3 + $0x68] sm:$0xf] %v2789_v40  ;;  %v2554_v14 = vpack.c.bf16 %v2427_v11, %v2427_v11  ;;  %v2555_v41 = vpack.c.bf16 %v2428_v18, %v2428_v18  ;;  %v2404_v48 = vmul.f32 %v6412_v31, %v6352_v54  ;;  %v2435_v34 = vmax.f32 %v2419_v1, 0.0 }
 0x2b8   :  { %v5025_v21 = vld [vmem:[#allocation3 + $0x58] sm:$0xf]  ;;  %2467 = vst [vmem:[#allocation3 + $0x28] sm:$0x1] %v2466_v42  ;;  %v2436_v39 = vmax.f32 %v2420_v7, 0.0  ;;  %v2434_v52 = vmax.f32 %v2418_v49, 0.0  ;;  %v2413_v0 = vadd.f32 %v6426_v53, %v2396_v29 }
 0x2b9   :  { %v5133_v35 = vld [vmem:[#allocation3 + $0x5c] sm:$0xf0]  ;;  %2470 = vst [vmem:[#allocation3 + $0x30] sm:$0x1] %v2469_v58  ;;  %v2599_v57 = vshrl.u32 %v2554_v14, 16  ;;  %v2602_v10 = vshll.u32 %v2554_v14, 16  ;;  %v2562_v59 = vpack.c.bf16 %v2435_v34, %v2435_v34  ;;  %v2421_v58 = vadd.f32 %v6426_v53, %v2404_v48 }
 0x2ba   :  { %v5026_v22 = vor.u32 %v5133_v35, %v5025_v21  ;;  %v5013_v28 = vld [vmem:[#allocation3 + $0x18] sm:$0xf]  ;;  %v5057_v56 = vld [vmem:[#allocation3 + $0x60] sm:$0xf]  ;;  %v2607_v16 = vshrl.u32 %v2555_v41, 16  ;;  %v2610_v5 = vshll.u32 %v2555_v41, 16  ;;  %v2563_v13 = vpack.c.bf16 %v2436_v39, %v2436_v39 }
 0x2bb   :  { %v5130_v45 = vld [vmem:[#allocation3 + $0x1c] sm:$0xf0]  ;;  %v6525_v19 = vrot.slane %v2599_v57, 7  ;;  %2491 = vst [vmem:[#allocation3 + $0x78] sm:$0x1] %v2490_v17  ;;  %v2472_v37 = vsel %vm6379_vm14, 0, %v2471_v4  ;;  %v2561_v18 = vpack.c.bf16 %v2434_v52, %v2434_v52  ;;  %v2397_v34 = vmul.f32 %v6412_v31, %v6280_v51 }
 0x2bc   :  { %4097 = vrot.lane.b32.xlu1 %v5026_v22, %s5235_s21  ;;  %v5014_v32 = vor.u32 %v5130_v45, %v5013_v28  ;;  %v5009_v60 = vld [vmem:[#allocation3 + $0x8] sm:$0xf]  ;;  %v6527_v33 = vrot.slane %v2607_v16, 7  ;;  %2494 = vst [vmem:[#allocation3 + $0x80] sm:$0x1] %v2493_v62  ;;  %v2663_v46 = vshrl.u32 %v2562_v59, 16 }
 0x2bd   :  { %v5129_v50 = vld [vmem:[#allocation3 + $0xc] sm:$0xf0]  ;;  %v2604_v54 = vor.u32 %v2602_v10, %v6525_v19  ;;  %v5137_v6 = vld [vmem:[#allocation3 + $0x14] sm:$0xf0]  ;;  %2488 = vst [vmem:[#allocation3 + $0x70] sm:$0x1] %v2487_v44 }
 0x2be   :  { %4091 = vrot.lane.b32.xlu0 %v5014_v32, %s5235_s21  ;;  %v5010_v3 = vor.u32 %v5129_v50, %v5009_v60  ;;  %v5141_v15 = vld [vmem:[#allocation3 + $0x64] sm:$0xf0]  ;;  %v2612_v42 = vor.u32 %v2610_v5, %v6527_v33  ;;  %v5041_v11 = vld [vmem:[#allocation3 + $0x10] sm:$0xf]  ;;  %v2666_v21 = vshll.u32 %v2562_v59, 16  ;;  %v2429_v14 = vmax.f32 %v2413_v0, 0.0 }
 0x2bf   :  { %v5058_v2 = vor.u32 %v5141_v15, %v5057_v56  ;;  %v2752_v36 = vld [vmem:[#allocation3 + $0x28] sm:$0xf]  ;;  %v2671_v1 = vshrl.u32 %v2563_v13, 16  ;;  %v2674_v7 = vshll.u32 %v2563_v13, 16  ;;  %v2655_v35 = vshrl.u32 %v2561_v18, 16 }
 0x2c0   :  { %4089 = vrot.lane.b32.xlu2 %v5010_v3, %s5235_s21  ;;  %v2753_v40 = vsel %vm6454_vm7, %v2604_v54, %v2752_v36  ;;  %v2758_v63 = vld [vmem:[#allocation3 + $0x30] sm:$0xf]  ;;  %v2658_v41 = vshll.u32 %v2561_v18, 16  ;;  %v6541_v17 = vrot.slane %v2663_v46, 7  ;;  %2473 = vst [vmem:[#allocation3 + $0x38] sm:$0x1] %v2472_v37  ;;  %v2556_v49 = vpack.c.bf16 %v2429_v14, %v2429_v14 }
 0x2c1   :  { %2754 = vst [vmem:[#allocation3 + $0x28] sm:$0xf] %v2753_v40  ;;  %v2759_v8 = vsel %vm6454_vm7, %v2612_v42, %v2758_v63  ;;  %v2437_v4 = vmax.f32 %v2421_v58, 0.0  ;;  %v2496_v22 = vsel %vm6379_vm14, 0, %v2495_v43  ;;  %v6546_v28 = vrot.slane %v2671_v1, 7 }
 0x2c2   :  { %2760 = vst [vmem:[#allocation3 + $0x30] sm:$0xf] %v2759_v8  ;;  %v6548_v57 = vrot.slane %v2655_v35, 7  ;;  %v2526_v62 = vld [vmem:[#allocation3 + $0x5c] sm:$0x1]  ;;  %v5042_v44 = vor.u32 %v5137_v6, %v5041_v11  ;;  %v2668_v45 = vor.u32 %v2666_v21, %v6541_v17  ;;  %v2615_v10 = vshrl.u32 %v2556_v49, 16 }
 0x2c3   :  { %2497 = vst [vmem:[#allocation3 + $0x88] sm:$0x1] %v2496_v22  ;;  %v2800_v56 = vld [vmem:[#allocation3 + $0x78] sm:$0xf]  ;;  %v5045_v16 = vld [vmem:[#allocation3 + $0x20] sm:$0xf]  ;;  %v2676_v29 = vor.u32 %v2674_v7, %v6546_v28  ;;  %v2564_v52 = vpack.c.bf16 %v2437_v4, %v2437_v4  ;;  %v2414_v42 = vadd.f32 %v6426_v53, %v2397_v34 }
 0x2c4   :  { %4233 = vrot.lane.b32.xlu1 %v5058_v2, %s5243_s18  ;;  %v2806_v48 = vld [vmem:[#allocation3 + $0x80] sm:$0xf]  ;;  %v2660_v32 = vor.u32 %v2658_v41, %v6548_v57  ;;  %v2618_v60 = vshll.u32 %v2556_v49, 16  ;;  %v2801_v39 = vsel %vm6454_vm7, %v2668_v45, %v2800_v56  ;;  %v2794_v50 = vld [vmem:[#allocation3 + $0x70] sm:$0xf]  ;;  %v6557_v5 = vrot.slane %v2615_v10, 7 }
 0x2c5   :  { %v2527_v0 = vsel %vm6385_vm0, 0, %v2526_v62  ;;  %2802 = vst [vmem:[#allocation3 + $0x78] sm:$0xf] %v2801_v39  ;;  %v2807_v54 = vsel %vm6454_vm7, %v2676_v29, %v2806_v48  ;;  %v2679_v36 = vshrl.u32 %v2564_v52, 16  ;;  %v2682_v11 = vshll.u32 %v2564_v52, 16 }
 0x2c6   :  { %v2795_v51 = vsel %vm6454_vm7, %v2660_v32, %v2794_v50  ;;  %2808 = vst [vmem:[#allocation3 + $0x80] sm:$0xf] %v2807_v54  ;;  %v2620_v2 = vor.u32 %v2618_v60, %v6557_v5  ;;  %v2430_v13 = vmax.f32 %v2414_v42, 0.0  ;;  %v2474_v53 = vld [vmem:[#allocation3 + $0x40] sm:$0x1]  ;;  %v2637_v18 = vrot.slane %v6450_v38, 4 }
 0x2c7   :  { %2796 = vst [vmem:[#allocation3 + $0x70] sm:$0xf] %v2795_v51  ;;  %v2764_v58 = vld [vmem:[#allocation3 + $0x38] sm:$0xf]  ;;  %v6571_v40 = vrot.slane %v2679_v36, 7  ;;  %v2645_v8 = vrot.slane %v6458_v20, 4 }
 0x2c8   :  { %v5138_v3 = vld [vmem:[#allocation3 + $0x24] sm:$0xf0]  ;;  %4225 = vrot.lane.b32.xlu2 %v5042_v44, %s5243_s18  ;;  %v2765_v43 = vsel %vm6454_vm7, %v2620_v2, %v2764_v58  ;;  %2528 = vst [vmem:[#allocation3 + $0x5c] sm:$0x1] %v2527_v0  ;;  %v2475_v21 = vsel %vm6379_vm14, 0, %v2474_v53  ;;  %v2557_v7 = vpack.c.bf16 %v2430_v13, %v2430_v13  ;;  %v2589_v41 = vrot.slane %v6460_v47, 4 }
 0x2c9   :  { %v5017_v15 = vld [vmem:[#allocation3 + $0x28] sm:$0xf]  ;;  %v5046_v31 = vor.u32 %v5138_v3, %v5045_v16  ;;  %v5131_v37 = vld [vmem:[#allocation3 + $0x2c] sm:$0xf0]  ;;  %2766 = vst [vmem:[#allocation3 + $0x38] sm:$0xf] %v2765_v43  ;;  %v2684_v63 = vor.u32 %v2682_v11, %v6571_v40 }
 0x2ca   :  { %v5018_v59 = vor.u32 %v5131_v37, %v5017_v15  ;;  %v2812_v6 = vld [vmem:[#allocation3 + $0x88] sm:$0xf]  ;;  %2476 = vst [vmem:[#allocation3 + $0x40] sm:$0x1] %v2475_v21  ;;  %v2502_v35 = vld [vmem:[#allocation3 + $0xc] sm:$0x1] }
 0x2cb   :  { %4227 = vrot.lane.b32.xlu0 %v5046_v31, %s5243_s18  ;;  %v5029_v46 = vld [vmem:[#allocation3 + $0x68] sm:$0xf]  ;;  %v2813_v1 = vsel %vm6454_vm7, %v2684_v63, %v2812_v6  ;;  %v2597_v49 = vrot.slane %v6471_v30, 4  ;;  %v2573_v38 = vrot.slane %v6475_v26, 4  ;;  %v5049_v44 = vld [vmem:[#allocation3 + $0x30] sm:$0xf] }
 0x2cc   :  { %4093 = vrot.lane.b32.xlu1 %v5018_v59, %s5235_s21  ;;  %v5033_v14 = vld [vmem:[#allocation3 + $0x78] sm:$0xf]  ;;  %2814 = vst [vmem:[#allocation3 + $0x88] sm:$0xf] %v2813_v1  ;;  %v2623_v45 = vshrl.u32 %v2557_v7, 16  ;;  %v2581_v56 = vrot.slane %v6481_v12, 4 }
 0x2cd   :  { %v5135_v4 = vld [vmem:[#allocation3 + $0x7c] sm:$0xf0]  ;;  %v3088_v29 = vld [vmem:[#allocation3 + $0x50] sm:$0xe]  ;;  %v2503_v48 = vsel %vm6385_vm0, 0, %v2502_v35  ;;  %v2626_v50 = vshll.u32 %v2557_v7, 16 }
 0x2ce   :  { %v5034_v22 = vor.u32 %v5135_v4, %v5033_v14  ;;  %v5134_v62 = vld [vmem:[#allocation3 + $0x6c] sm:$0xf0]  ;;  %v6590_v34 = vld [vmem:[#allocation3 + $0x54] sm:$0x1]  ;;  %v6592_v39 = vrot.slane %v2623_v45, 7  ;;  %v2653_v52 = vrot.slane %v6485_v61, 4 }
 0x2cf   :  { %v5030_v10 = vor.u32 %v5134_v62, %v5029_v46  ;;  %v2779_v16 = vld [vmem:[#allocation3 + $0x5c] sm:$0x1]  ;;  %v2605_v0 = vrot.slane %v6525_v19, 4  ;;  %v2529_v15 = vld [vmem:[#allocation3 + $0x64] sm:$0x1]  ;;  %v2613_v54 = vrot.slane %v6527_v33, 4 }
 0x2d0   :  { %v5139_v32 = vld [vmem:[#allocation3 + $0x34] sm:$0xf0]  ;;  %v2780_v60 = vsel %vm6379_vm14, %v2637_v18, %v2779_v16  ;;  %v4935_v37 = vrot.slane %v3088_v29, 9  ;;  %v2628_v2 = vor.u32 %v2626_v50, %v6592_v39  ;;  %2504 = vst [vmem:[#allocation3 + $0xc] sm:$0x1] %v2503_v48  ;;  %v3162_v42 = vrot.slane %v6590_v34, 5 }
 0x2d1   :  { %4099 = vrot.lane.b32.xlu2 %v5030_v10, %s5235_s21  ;;  %v5050_v3 = vor.u32 %v5139_v32, %v5049_v44  ;;  %2781 = vst [vmem:[#allocation3 + $0x5c] sm:$0x1] %v2780_v60  ;;  %v5142_v51 = vld [vmem:[#allocation3 + $0x74] sm:$0xf0]  ;;  %v5065_v36 = vld [vmem:[#allocation3 + $0x80] sm:$0xf] }
 0x2d2   :  { %v3089_v31 = vld [vmem:[#allocation3 + $0x58] sm:$0xe]  ;;  %v2770_v59 = vld [vmem:[#allocation3 + $0x40] sm:$0xf]  ;;  %v2530_v58 = vsel %vm6385_vm0, 0, %v2529_v15  ;;  %v2669_v53 = vrot.slane %v6541_v17, 4  ;;  %v3163_v23 = vsel %vm5625_vm10, %v4935_v37, %v3162_v42 }
 0x2d3   :  { %4101 = vrot.lane.b32.xlu0 %v5034_v22, %s5235_s21  ;;  %v5143_v43 = vld [vmem:[#allocation3 + $0x84] sm:$0xf0]  ;;  %v5061_v11 = vld [vmem:[#allocation3 + $0x70] sm:$0xf]  ;;  %v2771_v6 = vsel %vm6454_vm7, %v2628_v2, %v2770_v59  ;;  %2531 = vst [vmem:[#allocation3 + $0x64] sm:$0x1] %v2530_v58  ;;  %v4017_v48 = vunpack.c.l.b16 %v3163_v23 }
 0x2d4   :  { %4229 = vrot.lane.b32.xlu1 %v5050_v3, %s5243_s18  ;;  %2772 = vst [vmem:[#allocation3 + $0x40] sm:$0xf] %v2771_v6  ;;  %v6605_v63 = vld [vmem:[#allocation3 + $0x4] sm:$0x1]  ;;  %v2505_v13 = vld [vmem:[#allocation3 + $0x14] sm:$0x1]  ;;  %v5066_v46 = vor.u32 %v5143_v43, %v5065_v36  ;;  %v5062_v7 = vor.u32 %v5142_v51, %v5061_v11 }
 0x2d5   :  { %v3080_v21 = vld [vmem:[#allocation3] sm:$0xe]  ;;  %v2506_v14 = vsel %vm6385_vm0, 0, %v2505_v13  ;;  %v2661_v1 = vrot.slane %v6548_v57, 4  ;;  %v4936_v35 = vrot.slane %v3089_v31, 9  ;;  %v2621_v22 = vrot.slane %v6557_v5, 4 }
 0x2d6   :  { %2507 = vst [vmem:[#allocation3 + $0x14] sm:$0x1] %v2506_v14  ;;  %v2535_v4 = vld [vmem:[#allocation3 + $0x74] sm:$0x1]  ;;  %v3130_v45 = vrot.slane %v6605_v63, 5  ;;  %v4927_v29 = vrot.slane %v3080_v21, 9 }
 0x2d7   :  { %v2536_v57 = vsel %vm6385_vm0, 0, %v2535_v4  ;;  %v2731_v16 = vld [vmem:[#allocation3 + $0xc] sm:$0x1]  ;;  %v5021_v32 = vld [vmem:[#allocation3 + $0x38] sm:$0xf] }
 0x2d8   :  { %v6617_v44 = vld [vmem:[#allocation3 + $0x5c] sm:$0x1]  ;;  %2537 = vst [vmem:[#allocation3 + $0x74] sm:$0x1] %v2536_v57  ;;  %v2732_v60 = vsel %vm6379_vm14, %v2573_v38, %v2731_v16  ;;  %v3081_v50 = vld [vmem:[#allocation3 + $0x8] sm:$0xe] }
 0x2d9   :  { %4235 = vrot.lane.b32.xlu2 %v5062_v7, %s5243_s18  ;;  %v3166_v10 = vrot.slane %v6617_v44, 5  ;;  %v3456_v3 = vld [vmem:[#allocation3 + $0x58] sm:$0xe]  ;;  %v2538_v15 = vld [vmem:[#allocation3 + $0x7c] sm:$0x1]  ;;  %v4928_v13 = vrot.slane %v3081_v50, 9 }
 0x2da   :  { %2733 = vst [vmem:[#allocation3 + $0xc] sm:$0x1] %v2732_v60  ;;  %v2785_v37 = vld [vmem:[#allocation3 + $0x64] sm:$0x1]  ;;  %v6631_v2 = vld [vmem:[#allocation3 + $0x60] sm:$0xe] }
 0x2db   :  { %4237 = vrot.lane.b32.xlu0 %v5066_v46, %s5243_s18  ;;  %v3167_v51 = vsel %vm5625_vm10, %v4936_v35, %v3166_v10  ;;  %v6633_v36 = vld [vmem:[#allocation3 + $0x8] sm:$0xe]  ;;  %v2539_v26 = vsel %vm6385_vm0, 0, %v2538_v15  ;;  %v5132_v59 = vld [vmem:[#allocation3 + $0x3c] sm:$0xf0]  ;;  %v2786_v38 = vsel %vm6379_vm14, %v2645_v8, %v2785_v37  ;;  %v4951_v20 = vrot.slane %v3456_v3, 9 }
 0x2dc   :  { %v4018_v42 = vunpack.c.l.b16 %v3167_v51  ;;  %v6641_v58 = vld [vmem:[#allocation3 + $0x5c] sm:$0x1]  ;;  %2540 = vst [vmem:[#allocation3 + $0x7c] sm:$0x1] %v2539_v26  ;;  %v6643_v43 = vld [vmem:[#allocation3 + $0x10] sm:$0xe]  ;;  %v5022_v7 = vor.u32 %v5132_v59, %v5021_v32  ;;  %v3131_v10 = vsel %vm5625_vm10, %v4927_v29, %v3130_v45 }
 0x2dd   :  { %2787 = vst [vmem:[#allocation3 + $0x64] sm:$0x1] %v2786_v38  ;;  %v2532_v11 = vld [vmem:[#allocation3 + $0x6c] sm:$0x1]  ;;  %v2737_v46 = vld [vmem:[#allocation3 + $0x14] sm:$0x1] }
 0x2de   :  { %v4029_v6 = vpack.c.b16 %v4018_v42, %v4017_v48  ;;  %v6645_v21 = vld [vmem:[#allocation3 + $0x70] sm:$0xe]  ;;  %v2533_v14 = vsel %vm6385_vm0, 0, %v2532_v11  ;;  %v3530_v23 = vrot.slane %v6641_v58, 5  ;;  %v2738_v8 = vsel %vm6379_vm14, %v2581_v56, %v2737_v46  ;;  %v6663_v56 = vld [vmem:[#allocation3 + $0x78] sm:$0xe] }
 0x2df   :  { %2534 = vst [vmem:[#allocation3 + $0x6c] sm:$0x1] %v2533_v14  ;;  %v4952_v35 = vrot.slane %v6631_v2, 9  ;;  %v4943_v4 = vrot.slane %v6633_v36, 9  ;;  %v2797_v57 = vld [vmem:[#allocation3 + $0x74] sm:$0x1]  ;;  %v4009_v2 = vunpack.c.l.b16 %v3131_v10 }
 0x2e0   :  { %2739 = vst [vmem:[#allocation3 + $0x14] sm:$0x1] %v2738_v8  ;;  %v4944_v16 = vrot.slane %v6643_v43, 9  ;;  %v2798_v12 = vsel %vm6379_vm14, %v2661_v1, %v2797_v57  ;;  %v4969_v48 = vrot.slane %v6645_v21, 9  ;;  %v2508_v32 = vld [vmem:[#allocation3 + $0x1c] sm:$0x1]  ;;  %v3531_v45 = vsel %vm5625_vm10, %v4951_v20, %v3530_v23 }
 0x2e1   :  { %4095 = vrot.lane.b32.xlu2 %v5022_v7, %s5235_s21  ;;  %v6666_v60 = vld [vmem:[#allocation3 + $0xc] sm:$0x1]  ;;  %v5053_v50 = vld [vmem:[#allocation3 + $0x40] sm:$0xf]  ;;  %v5140_v3 = vld [vmem:[#allocation3 + $0x44] sm:$0xf0]  ;;  %v4153_v46 = vunpack.c.l.b16 %v3531_v45 }
 0x2e2   :  { %v6668_v15 = vld [vmem:[#allocation3 + $0xc] sm:$0x1]  ;;  %2799 = vst [vmem:[#allocation3 + $0x74] sm:$0x1] %v2798_v12  ;;  %v3134_v51 = vrot.slane %v6666_v60, 5  ;;  %v2509_v1 = vsel %vm6385_vm0, 0, %v2508_v32  ;;  %v5054_v8 = vor.u32 %v5140_v3, %v5053_v50 }
 0x2e3   :  { %4041 = vrot.lane.b32.xlu0 %v4029_v6, %s5240_s7  ;;  %v2803_v29 = vld [vmem:[#allocation3 + $0x7c] sm:$0x1]  ;;  %v6673_v37 = vld [vmem:[#allocation3 + $0x60] sm:$0xe]  ;;  %v6683_v42 = vld [vmem:[#allocation3 + $0x68] sm:$0xe] }
 0x2e4   :  { %v6677_v36 = vld [vmem:[#allocation3 + $0x64] sm:$0x1]  ;;  %v2804_v26 = vsel %vm6379_vm14, %v2669_v53, %v2803_v29  ;;  %2510 = vst [vmem:[#allocation3 + $0x1c] sm:$0x1] %v2509_v1  ;;  %v3135_v59 = vsel %vm5625_vm10, %v4928_v13, %v3134_v51  ;;  %v3498_v43 = vrot.slane %v6668_v15, 5  ;;  %v4970_v14 = vrot.slane %v6663_v56, 9 }
 0x2e5   :  { %v3534_v38 = vrot.slane %v6677_v36, 5  ;;  %2805 = vst [vmem:[#allocation3 + $0x7c] sm:$0x1] %v2804_v26  ;;  %v2514_v11 = vld [vmem:[#allocation3 + $0x2c] sm:$0x1]  ;;  %v4010_v6 = vunpack.c.l.b16 %v3135_v59  ;;  %v4967_v45 = vrot.slane %v6673_v37, 9 }
 0x2e6   :  { %v2791_v17 = vld [vmem:[#allocation3 + $0x6c] sm:$0x1]  ;;  %v6690_v7 = vld [vmem:[#allocation3 + $0x10] sm:$0xe]  ;;  %v6692_v53 = vld [vmem:[#allocation3 + $0x18] sm:$0xe]  ;;  %v3499_v61 = vsel %vm5625_vm10, %v4943_v4, %v3498_v43 }
 0x2e7   :  { %v2515_v20 = vsel %vm6385_vm0, 0, %v2514_v11  ;;  %v2517_v23 = vld [vmem:[#allocation3 + $0x34] sm:$0x1]  ;;  %v3535_v13 = vsel %vm5625_vm10, %v4952_v35, %v3534_v38  ;;  %v2792_v10 = vsel %vm6379_vm14, %v2653_v52, %v2791_v17  ;;  %v6704_v12 = vld [vmem:[#allocation3 + $0x64] sm:$0x1]  ;;  %v4025_v56 = vpack.c.b16 %v4010_v6, %v4009_v2 }
 0x2e8   :  { %v6698_v57 = vld [vmem:[#allocation3 + $0x14] sm:$0x1]  ;;  %2516 = vst [vmem:[#allocation3 + $0x2c] sm:$0x1] %v2515_v20  ;;  %v4154_v32 = vunpack.c.l.b16 %v3535_v13  ;;  %v4968_v52 = vrot.slane %v6683_v42, 9  ;;  %v2518_v50 = vsel %vm6385_vm0, 0, %v2517_v23  ;;  %v4145_v6 = vunpack.c.l.b16 %v3499_v61 }
 0x2e9   :  { %v3502_v51 = vrot.slane %v6698_v57, 5  ;;  %2793 = vst [vmem:[#allocation3 + $0x6c] sm:$0x1] %v2792_v10  ;;  %v6708_v29 = vld [vmem:[#allocation3 + $0x14] sm:$0x1]  ;;  %4231 = vrot.lane.b32.xlu2 %v5054_v8, %s5243_s18  ;;  %4033 = vrot.lane.b32.xlu1 %v4025_v56, %s5240_s7  ;;  %v3899_v26 = vrot.slane %v6704_v12, 5 }
 0x2ea   :  { %v3587_v35 = vld [vmem:[#allocation3 + $0x74] sm:$0x1]  ;;  %v6716_v3 = vld [vmem:[#allocation3 + $0x28] sm:$0xe]  ;;  %v4165_v1 = vpack.c.b16 %v4154_v32, %v4153_v46  ;;  %2519 = vst [vmem:[#allocation3 + $0x34] sm:$0x1] %v2518_v50 }
 0x2eb   :  { %v3503_v37 = vsel %vm5625_vm10, %v4944_v16, %v3502_v51  ;;  %v3907_v2 = vrot.slane %v3587_v35, 5  ;;  %v2511_v59 = vld [vmem:[#allocation3 + $0x24] sm:$0x1]  ;;  %v2743_v4 = vld [vmem:[#allocation3 + $0x1c] sm:$0x1]  ;;  %v4959_v38 = vrot.slane %v6690_v7, 9  ;;  %v3900_v21 = vsel %vm5625_vm10, %v4967_v45, %v3899_v26 }
 0x2ec   :  { %v3867_v42 = vrot.slane %v6708_v29, 5  ;;  %v4960_v43 = vrot.slane %v6692_v53, 9  ;;  %v2512_v11 = vsel %vm6385_vm0, 0, %v2511_v59  ;;  %4177 = vrot.lane.b32.xlu0 %v4165_v1, %s5244_s19  ;;  %v4146_v16 = vunpack.c.l.b16 %v3503_v37  ;;  %v3588_v46 = vld [vmem:[#allocation3 + $0x7c] sm:$0x1] }
 0x2ed   :  { %v3908_v17 = vsel %vm5625_vm10, %v4969_v48, %v3907_v2  ;;  %v2744_v7 = vsel %vm6379_vm14, %v2589_v41, %v2743_v4  ;;  %v6736_v20 = vld [vmem:[#allocation3 + $0x30] sm:$0xe]  ;;  %2513 = vst [vmem:[#allocation3 + $0x24] sm:$0x1] %v2512_v11  ;;  %v3911_v23 = vrot.slane %v3588_v46, 5  ;;  %v4947_v13 = vrot.slane %v6716_v3, 9 }
 0x2ee   :  { %2745 = vst [vmem:[#allocation3 + $0x1c] sm:$0x1] %v2744_v7  ;;  %v6739_v8 = vld [vmem:[#allocation3 + $0x14] sm:$0x1]  ;;  %v4291_v10 = vunpack.c.l.b16 %v3908_v17  ;;  %v3450_v48 = vld [vmem:[#allocation3 + $0x18] sm:$0xe]  ;;  %v4161_v1 = vpack.c.b16 %v4146_v16, %v4145_v6 }
 0x2ef   :  { %v2755_v56 = vld [vmem:[#allocation3 + $0x2c] sm:$0x1]  ;;  %v3082_v32 = vld [vmem:[#allocation3 + $0x10] sm:$0xe]  ;;  %v3912_v47 = vsel %vm5625_vm10, %v4970_v14, %v3911_v23  ;;  %v3083_v61 = vld [vmem:[#allocation3 + $0x18] sm:$0xe]  ;;  %v4289_v14 = vunpack.c.l.b16 %v3900_v21  ;;  %v3868_v23 = vsel %vm5625_vm10, %v4959_v38, %v3867_v42 }
 0x2f0   :  { %v6745_v41 = vld [vmem:[#allocation3 + $0x6c] sm:$0x1]  ;;  %v2756_v51 = vsel %vm6379_vm14, %v2605_v0, %v2755_v56  ;;  %v4929_v35 = vrot.slane %v3082_v32, 9  ;;  %v3138_v50 = vrot.slane %v6739_v8, 5  ;;  %v4292_v37 = vunpack.c.l.b16 %v3912_v47  ;;  %v2520_v26 = vld [vmem:[#allocation3 + $0x3c] sm:$0x1] }
 0x2f1   :  { %v3903_v45 = vrot.slane %v6745_v41, 5  ;;  %2757 = vst [vmem:[#allocation3 + $0x2c] sm:$0x1] %v2756_v51  ;;  %v4948_v2 = vrot.slane %v6736_v20, 9  ;;  %v2761_v59 = vld [vmem:[#allocation3 + $0x34] sm:$0x1]  ;;  %4169 = vrot.lane.b32.xlu1 %v4161_v1, %s5244_s19  ;;  %v4281_v51 = vunpack.c.l.b16 %v3868_v23 }
 0x2f2   :  { %v6754_v4 = vld [vmem:[#allocation3 + $0x20] sm:$0xe]  ;;  %v4945_v19 = vrot.slane %v3450_v48, 9  ;;  %v2521_v0 = vsel %vm6385_vm0, 0, %v2520_v26  ;;  %v4302_v11 = vpack.c.b16 %v4292_v37, %v4291_v10  ;;  %v2762_v16 = vsel %vm6379_vm14, %v2613_v54, %v2761_v59  ;;  %v6765_v17 = vld [vmem:[#allocation3 + $0x30] sm:$0xe] }
 0x2f3   :  { %v3904_v6 = vsel %vm5625_vm10, %v4968_v52, %v3903_v45  ;;  %v4930_v46 = vrot.slane %v3083_v61, 9  ;;  %2522 = vst [vmem:[#allocation3 + $0x3c] sm:$0x1] %v2521_v0  ;;  %v3139_v10 = vsel %vm5625_vm10, %v4929_v35, %v3138_v50  ;;  %v6771_v56 = vld [vmem:[#allocation3 + $0x38] sm:$0xe]  ;;  %v4946_v61 = vrot.slane %v6754_v4, 9 }
 0x2f4   :  { %v4290_v7 = vunpack.c.l.b16 %v3904_v6  ;;  %2763 = vst [vmem:[#allocation3 + $0x34] sm:$0x1] %v2762_v16  ;;  %v2749_v21 = vld [vmem:[#allocation3 + $0x24] sm:$0x1]  ;;  %4315 = vrot.lane.b32.xlu0 %v4302_v11, %s5245_s20  ;;  %v4011_v35 = vunpack.c.l.b16 %v3139_v10  ;;  %v4963_v30 = vrot.slane %v6765_v17, 9 }
 0x2f5   :  { %v6774_v33 = vld [vmem:[#allocation3 + $0x1c] sm:$0x1]  ;;  %v2750_v54 = vsel %vm6379_vm14, %v2597_v49, %v2749_v21  ;;  %v3819_v50 = vld [vmem:[#allocation3 + $0x20] sm:$0xe]  ;;  %v3820_v49 = vld [vmem:[#allocation3 + $0x28] sm:$0xe] }
 0x2f6   :  { %v6780_v52 = vld [vmem:[#allocation3 + $0x1c] sm:$0x1]  ;;  %v4301_v42 = vpack.c.b16 %v4290_v7, %v4289_v14  ;;  %v3871_v48 = vrot.slane %v6774_v33, 5  ;;  %2751 = vst [vmem:[#allocation3 + $0x24] sm:$0x1] %v2750_v54  ;;  %v4962_v59 = vrot.slane %v3820_v49, 9 }
 0x2f7   :  { %v6782_v38 = vld [vmem:[#allocation3 + $0x1c] sm:$0x1]  ;;  %v3506_v32 = vrot.slane %v6780_v52, 5  ;;  %v6806_v6 = vld [vmem:[#allocation3 + $0x64] sm:$0x1] }
 0x2f8   :  { %v3142_v47 = vrot.slane %v6782_v38, 5  ;;  %4313 = vrot.lane.b32.xlu2 %v4301_v42, %s5245_s20  ;;  %v3872_v1 = vsel %vm5625_vm10, %v4960_v43, %v3871_v48  ;;  %v6794_v37 = vld [vmem:[#allocation3 + $0x2c] sm:$0x1]  ;;  %v3090_v43 = vld [vmem:[#allocation3 + $0x60] sm:$0xe] }
 0x2f9   :  { %v6798_v45 = vsel %vm5625_vm10, %v4945_v19, %v3506_v32  ;;  %v6802_v14 = vld [vmem:[#allocation3 + $0x2c] sm:$0x1]  ;;  %v4282_v4 = vunpack.c.l.b16 %v3872_v1  ;;  %v3514_v0 = vrot.slane %v6794_v37, 5  ;;  %v4961_v19 = vrot.slane %v3819_v50, 9  ;;  %v3086_v49 = vld [vmem:[#allocation3 + $0x30] sm:$0xe] }
 0x2fa   :  { %v3143_v26 = vsel %vm5625_vm10, %v4930_v46, %v3142_v47  ;;  %v4147_v16 = vunpack.c.l.b16 %v6798_v45  ;;  %v2767_v17 = vld [vmem:[#allocation3 + $0x3c] sm:$0x1]  ;;  %v3879_v7 = vrot.slane %v6802_v14, 5  ;;  %v6810_v23 = vld [vmem:[#allocation3 + $0x6c] sm:$0x1]  ;;  %v4937_v32 = vrot.slane %v3090_v43, 9 }
 0x2fb   :  { %v4012_v11 = vunpack.c.l.b16 %v3143_v26  ;;  %v3091_v46 = vld [vmem:[#allocation3 + $0x68] sm:$0xe]  ;;  %v4297_v21 = vpack.c.b16 %v4282_v4, %v4281_v51  ;;  %v6812_v10 = vld [vmem:[#allocation3 + $0x34] sm:$0x1]  ;;  %v3515_v54 = vsel %vm5625_vm10, %v4947_v13, %v3514_v0  ;;  %v2768_v42 = vsel %vm6379_vm14, %v2621_v22, %v2767_v17  ;;  %v6856_v31 = vld [vmem:[#allocation3 + $0x6c] sm:$0x1] }
 0x2fc   :  { %v6822_v48 = vld [vmem:[#allocation3 + $0x34] sm:$0x1]  ;;  %v3518_v47 = vrot.slane %v6812_v10, 5  ;;  %2769 = vst [vmem:[#allocation3 + $0x3c] sm:$0x1] %v2768_v42  ;;  %v3880_v3 = vsel %vm5625_vm10, %v4962_v59, %v3879_v7  ;;  %v4149_v13 = vunpack.c.l.b16 %v3515_v54  ;;  %v3170_v45 = vrot.slane %v6806_v6, 5 }
 0x2fd   :  { %v4026_v50 = vpack.c.b16 %v4012_v11, %v4011_v35  ;;  %v3883_v51 = vrot.slane %v6822_v48, 5  ;;  %4305 = vrot.lane.b32.xlu1 %v4297_v21, %s5245_s20  ;;  %v6829_v5 = vld [vmem:[#allocation3 + $0x24] sm:$0x1]  ;;  %v4284_v22 = vunpack.c.l.b16 %v3880_v3  ;;  %v4938_v26 = vrot.slane %v3091_v46, 9  ;;  %v2846_v11 = vld [vmem:[#allocation3 + $0x34] sm:$0x1] }
 0x2fe   :  { %v6831_v1 = vld [vmem:[#allocation3 + $0x24] sm:$0x1]  ;;  %v3519_v35 = vsel %vm5625_vm10, %v4948_v2, %v3518_v47  ;;  %v3510_v4 = vrot.slane %v6829_v5, 5  ;;  %v3171_v7 = vsel %vm5625_vm10, %v4937_v32, %v3170_v45  ;;  %v3174_v20 = vrot.slane %v6810_v23, 5  ;;  %v3087_v46 = vld [vmem:[#allocation3 + $0x38] sm:$0xe] }
 0x2ff   :  { %v6841_v59 = vsel %vm5625_vm10, %v4963_v30, %v3883_v51  ;;  %v3875_v0 = vrot.slane %v6831_v1, 5  ;;  %v4150_v43 = vunpack.c.l.b16 %v3519_v35  ;;  %v3084_v21 = vld [vmem:[#allocation3 + $0x20] sm:$0xe]  ;;  %v4019_v54 = vunpack.c.l.b16 %v3171_v7  ;;  %v6852_v47 = vld [vmem:[#allocation3 + $0x24] sm:$0x1] }
 0x300   :  { %v4285_v17 = vunpack.c.l.b16 %v6841_v59  ;;  %v3511_v2 = vsel %vm5625_vm10, %v4946_v61, %v3510_v4  ;;  %v4933_v42 = vrot.slane %v3086_v49, 9  ;;  %7549 = vst [vmem:[#allocation5_spill] sm:$0xff] %v6852_v47  ;;  %v3085_v51 = vld [vmem:[#allocation3 + $0x28] sm:$0xe]  ;;  %v3175_v32 = vsel %vm5625_vm10, %v4938_v26, %v3174_v20  ;;  %v2845_v45 = vld [vmem:[#allocation3 + $0x2c] sm:$0x1] }
 0x301   :  { %v3876_v30 = vsel %vm5625_vm10, %v4961_v19, %v3875_v0  ;;  %v4163_v3 = vpack.c.b16 %v4150_v43, %v4149_v13  ;;  %v4148_v35 = vunpack.c.l.b16 %v3511_v2  ;;  %v4020_v62 = vunpack.c.l.b16 %v3175_v32  ;;  %v3458_v53 = vld [vmem:[#allocation3 + $0x68] sm:$0xe] }
 0x302   :  { %v4283_v59 = vunpack.c.l.b16 %v3876_v30  ;;  %v3154_v18 = vrot.slane %v2846_v11, 5  ;;  %v4934_v61 = vrot.slane %v3087_v46, 9  ;;  %v4931_v4 = vrot.slane %v3084_v21, 9  ;;  %v3459_v46 = vld [vmem:[#allocation3 + $0x70] sm:$0xe] }
 0x303   :  { %4173 = vrot.lane.b32.xlu0 %v4163_v3, %s5244_s19  ;;  %v4162_v19 = vpack.c.b16 %v4148_v35, %v4147_v16  ;;  %v6859_v49 = vld [vmem:[#allocation3 + $0x3c] sm:$0x1]  ;;  %v3146_v43 = vrot.slane %v6852_v47, 5  ;;  %v4932_v7 = vrot.slane %v3085_v51, 9  ;;  %v4030_v20 = vpack.c.b16 %v4020_v62, %v4019_v54  ;;  %v6869_v30 = vld [vmem:[#allocation3 + $0x74] sm:$0x1] }
 0x304   :  { %v4298_v0 = vpack.c.b16 %v4284_v22, %v4283_v59  ;;  %v2847_v13 = vld [vmem:[#allocation3 + $0x3c] sm:$0x1]  ;;  %v3887_v26 = vrot.slane %v6859_v49, 5  ;;  %v3155_v2 = vsel %vm5625_vm10, %v4933_v42, %v3154_v18  ;;  %v3150_v21 = vrot.slane %v2845_v45, 5  ;;  %v3092_v3 = vld [vmem:[#allocation3 + $0x70] sm:$0xe] }
 0x305   :  { %v3158_v11 = vrot.slane %v2847_v13, 5  ;;  %4171 = vrot.lane.b32.xlu2 %v4162_v19, %s5244_s19  ;;  %4035 = vrot.lane.b32.xlu1 %v4026_v50, %s5240_s7  ;;  %v4015_v16 = vunpack.c.l.b16 %v3155_v2  ;;  %v3147_v22 = vsel %vm5625_vm10, %v4931_v4, %v3146_v43  ;;  %v4953_v51 = vrot.slane %v3458_v53, 9  ;;  %v6878_v35 = vld [vmem:[#allocation3 + $0x74] sm:$0x1]  ;;  %v6882_v4 = vld [vmem:[#allocation3 + $0x7c] sm:$0x1] }
 0x306   :  { %v7550_v62 = vrot.slane %v6771_v56, 9  ;;  %v4013_v42 = vunpack.c.l.b16 %v3147_v22  ;;  %v3538_v50 = vrot.slane %v6856_v31, 5  ;;  %7551 = vst [vmem:[#allocation6_spill] sm:$0xff] %v6878_v35  ;;  %v3151_v45 = vsel %vm5625_vm10, %v4932_v7, %v3150_v21  ;;  %v3093_v56 = vld [vmem:[#allocation3 + $0x78] sm:$0xe] }
 0x307   :  { %v3159_v54 = vsel %vm5625_vm10, %v4934_v61, %v3158_v11  ;;  %v4954_v53 = vrot.slane %v3459_v46, 9  ;;  %7552 = vst [vmem:[#allocation7_spill] sm:$0xff] %v6882_v4  ;;  %v4014_v19 = vunpack.c.l.b16 %v3151_v45  ;;  %v3542_v61 = vrot.slane %v6869_v30, 5  ;;  %v2544_v2 = vld [vmem:[#allocation3 + $0x8c] sm:$0x1] }
 0x308   :  { %v3888_v18 = vsel %vm5625_vm10, %v7550_v62, %v3887_v26  ;;  %v4016_v32 = vunpack.c.l.b16 %v3159_v54  ;;  %v3539_v13 = vsel %vm5625_vm10, %v4953_v51, %v3538_v50  ;;  %v4939_v43 = vrot.slane %v3092_v3, 9  ;;  %v2541_v26 = vld [vmem:[#allocation3 + $0x84] sm:$0x1]  ;;  %v6888_v54 = vld [vmem:[#allocation3 + $0x80] sm:$0xe] }
 0x309   :  { %v4286_v59 = vunpack.c.l.b16 %v3888_v18  ;;  %v4155_v62 = vunpack.c.l.b16 %v3539_v13  ;;  %v3178_v18 = vrot.slane %v6878_v35, 5  ;;  %v6890_v7 = vld [vmem:[#allocation3 + $0x88] sm:$0xe]  ;;  %v6892_v46 = vpack.c.b16 %v4014_v19, %v4013_v42  ;;  %v2824_v3 = vld [vmem:[#allocation3] sm:$0xf] }
 0x30a   :  { %v4028_v22 = vpack.c.b16 %v4016_v32, %v4015_v16  ;;  %v3543_v21 = vsel %vm5625_vm10, %v4954_v53, %v3542_v61  ;;  %v4940_v51 = vrot.slane %v3093_v56, 9  ;;  %v3182_v50 = vrot.slane %v6882_v4, 5  ;;  %v2825_v32 = vld [vmem:[#allocation3 + $0x8] sm:$0xf]  ;;  %v3460_v45 = vld [vmem:[#allocation3 + $0x78] sm:$0xe] }
 0x30b   :  { %v4299_v11 = vpack.c.b16 %v4286_v59, %v4285_v17  ;;  %v4156_v17 = vunpack.c.l.b16 %v3543_v21  ;;  %v3179_v16 = vsel %vm5625_vm10, %v4939_v43, %v3178_v18  ;;  %v2542_v59 = vsel %vm6385_vm0, 0, %v2541_v26  ;;  %v6908_v61 = vld [vmem:[#allocation3 + $0x7c] sm:$0x1]  ;;  %v6910_v43 = vld [vmem:[#allocation3 + $0x80] sm:$0xe] }
 0x30c   :  { %v2545_v42 = vsel %vm6385_vm0, 0, %v2544_v2  ;;  %v3183_v53 = vsel %vm5625_vm10, %v4940_v51, %v3182_v50  ;;  %v4021_v56 = vunpack.c.l.b16 %v3179_v16  ;;  %2543 = vst [vmem:[#allocation3 + $0x84] sm:$0x1] %v2542_v59  ;;  %v2857_v18 = vshrl.u32 %v2824_v3, 16  ;;  %v3214_v51 = vld [vmem:[#allocation3 + $0x3c] sm:$0x1] }
 0x30d   :  { %4309 = vrot.lane.b32.xlu0 %v4299_v11, %s5245_s20  ;;  %v2523_v11 = vld [vmem:[#allocation3 + $0x44] sm:$0x1]  ;;  %4307 = vrot.lane.b32.xlu2 %v4298_v0, %s5245_s20  ;;  %v4166_v26 = vpack.c.b16 %v4156_v17, %v4155_v62  ;;  %v4022_v2 = vunpack.c.l.b16 %v3183_v53  ;;  %2546 = vst [vmem:[#allocation3 + $0x8c] sm:$0x1] %v2545_v42  ;;  %v2860_v21 = vshll.u32 %v2824_v3, 16  ;;  %v2866_v50 = vshll.u32 %v6605_v63, 16 }
 0x30e   :  { %4043 = vrot.lane.b32.xlu1 %v4030_v20, %s5240_s7  ;;  %v2871_v16 = vshrl.u32 %v2825_v32, 16  ;;  %v2874_v59 = vshll.u32 %v2825_v32, 16  ;;  %v2880_v13 = vshll.u32 %v6666_v60, 16  ;;  %v3454_v19 = vld [vmem:[#allocation3 + $0x38] sm:$0xe]  ;;  %v2859_v47 = vrot.slane %v2857_v18, 4 }
 0x30f   :  { %v6916_v24 = vpack.c.b16 %v4022_v2, %v4021_v56  ;;  %v2862_v4 = vrot.slane %v2860_v21, 5  ;;  %v4955_v0 = vrot.slane %v3460_v45, 9  ;;  %v6918_v35 = vld [vmem:[#allocation3 + $0x40] sm:$0xe]  ;;  %v2868_v20 = vrot.slane %v2866_v50, 5 }
 0x310   :  { %v2873_v62 = vrot.slane %v2871_v16, 4  ;;  %v2876_v17 = vrot.slane %v2874_v59, 5  ;;  %v2882_v42 = vrot.slane %v2880_v13, 5  ;;  %v3192_v3 = vld [vmem:[#allocation3 + $0x8] sm:$0xf]  ;;  %v3546_v63 = vrot.slane %v6908_v61, 5 }
 0x311   :  { %v2863_v53 = vor.u32 %v2862_v4, %v2859_v47  ;;  %v4956_v32 = vrot.slane %v6910_v43, 9  ;;  %v2524_v60 = vsel %vm6385_vm0, 0, %v2523_v11  ;;  %v4949_v2 = vrot.slane %v3454_v19, 9  ;;  %v3193_v59 = vld [vmem:[#allocation3 + $0x10] sm:$0xf] }
 0x312   :  { %v2877_v56 = vor.u32 %v2876_v17, %v2873_v62  ;;  %2525 = vst [vmem:[#allocation3 + $0x44] sm:$0x1] %v2524_v60  ;;  %v3522_v18 = vrot.slane %v3214_v51, 5  ;;  %v4950_v45 = vrot.slane %v6918_v35, 9  ;;  %v6928_v47 = vsel %vm5625_vm10, %v4955_v0, %v3546_v63 }
 0x313   :  { %v2809_v21 = vld [vmem:[#allocation3 + $0x84] sm:$0x1]  ;;  %v2864_v50 = vrot.slane %v2863_v53, 4  ;;  %v3225_v4 = vshrl.u32 %v3192_v3, 16  ;;  %v3228_v13 = vshll.u32 %v3192_v3, 16  ;;  %v7553_v16 = vrot.slane %v6546_v28, 4 }
 0x314   :  { %v2815_v11 = vld [vmem:[#allocation3 + $0x8c] sm:$0x1]  ;;  %v2878_v19 = vrot.slane %v2877_v56, 4  ;;  %v4157_v51 = vunpack.c.l.b16 %v6928_v47  ;;  %v7554_v28 = vrot.slane %v6571_v40, 4  ;;  %v2832_v53 = vld [vmem:[#allocation3 + $0x50] sm:$0xf] }
 0x315   :  { %4039 = vrot.lane.b32.xlu0 %v4028_v22, %s5240_s7  ;;  %v2810_v27 = vsel %vm6379_vm14, %v7553_v16, %v2809_v21  ;;  %v6937_v22 = vsel %vm5625_vm10, %v4949_v2, %v3522_v18  ;;  %4037 = vrot.lane.b32.xlu2 %v6892_v46, %s5240_s7  ;;  %v2869_v62 = vsel %vm5841_vm13, %v2864_v50, %v2868_v20  ;;  %v3227_v3 = vrot.slane %v3225_v4, 4  ;;  %v2833_v21 = vld [vmem:[#allocation3 + $0x58] sm:$0xf]  ;;  %v6953_v4 = vld [vmem:[#allocation3 + $0x40] sm:$0xe] }
 0x316   :  { %4179 = vrot.lane.b32.xlu1 %v4166_v26, %s5244_s19  ;;  %2811 = vst [vmem:[#allocation3 + $0x84] sm:$0x1] %v2810_v27  ;;  %v2816_v0 = vsel %vm6379_vm14, %v7554_v28, %v2815_v11  ;;  %v4151_v17 = vunpack.c.l.b16 %v6937_v22  ;;  %v2883_v63 = vsel %vm5841_vm13, %v2878_v19, %v2882_v42  ;;  %v3969_v46 = vunpack.c.l.b16 %v2869_v62 }
 0x317   :  { %2817 = vst [vmem:[#allocation3 + $0x8c] sm:$0x1] %v2816_v0  ;;  %v3230_v60 = vrot.slane %v3228_v13, 5  ;;  %v3234_v26 = vshll.u32 %v6668_v15, 16  ;;  %v3970_v56 = vunpack.c.l.b16 %v2883_v63  ;;  %v3239_v40 = vshrl.u32 %v3193_v59, 16 }
 0x318   :  { %v3242_v2 = vshll.u32 %v3193_v59, 16  ;;  %v3248_v18 = vshll.u32 %v6698_v57, 16  ;;  %v2969_v50 = vshrl.u32 %v2832_v53, 16  ;;  %v2972_v27 = vshll.u32 %v2832_v53, 16 }
 0x319   :  { %v3231_v16 = vor.u32 %v3230_v60, %v3227_v3  ;;  %v3236_v20 = vrot.slane %v3234_v26, 5  ;;  %v3985_v11 = vpack.c.b16 %v3970_v56, %v3969_v46  ;;  %v2773_v28 = vld [vmem:[#allocation3 + $0x44] sm:$0x1]  ;;  %v3241_v0 = vrot.slane %v3239_v40, 4 }
 0x31a   :  { %v3244_v42 = vrot.slane %v3242_v2, 5  ;;  %v3250_v19 = vrot.slane %v3248_v18, 5  ;;  %v7555_v13 = vrot.slane %v6592_v39, 4  ;;  %v2971_v62 = vrot.slane %v2969_v50, 4 }
 0x31b   :  { %v3232_v59 = vrot.slane %v3231_v16, 4  ;;  %v2974_v57 = vrot.slane %v2972_v27, 5  ;;  %v2978_v53 = vshll.u32 %v6590_v34, 16  ;;  %v2983_v63 = vshrl.u32 %v2833_v21, 16 }
 0x31c   :  { %v2774_v15 = vsel %vm6379_vm14, %v7555_v13, %v2773_v28  ;;  %v3245_v3 = vor.u32 %v3244_v42, %v3241_v0  ;;  %v2986_v46 = vshll.u32 %v2833_v21, 16  ;;  %v2992_v56 = vshll.u32 %v6617_v44, 16  ;;  %v3824_v42 = vld [vmem:[#allocation3 + $0x48] sm:$0xe] }
 0x31d   :  { %3993 = vrot.lane.b32.xlu0 %v3985_v11, %s5236_s29  ;;  %2775 = vst [vmem:[#allocation3 + $0x44] sm:$0x1] %v2774_v15  ;;  %v6961_v60 = vld [vmem:[#allocation3 + $0x84] sm:$0x1]  ;;  %v3237_v39 = vsel %vm5841_vm13, %v3232_v59, %v3236_v20  ;;  %v2975_v55 = vor.u32 %v2974_v57, %v2971_v62  ;;  %v4965_v40 = vrot.slane %v6953_v4, 9  ;;  %4045 = vrot.lane.b32.xlu2 %v6916_v24, %s5240_s7  ;;  %v2980_v20 = vrot.slane %v2978_v53, 5 }
 0x31e   :  { %v6963_v26 = vld [vmem:[#allocation3 + $0x84] sm:$0x1]  ;;  %v6971_v2 = vld [vmem:[#allocation3 + $0x8c] sm:$0x1]  ;;  %v3915_v34 = vrot.slane %v6961_v60, 5  ;;  %v3246_v21 = vrot.slane %v3245_v3, 4  ;;  %v4105_v16 = vunpack.c.l.b16 %v3237_v39 }
 0x31f   :  { %v3550_v18 = vrot.slane %v6963_v26, 5  ;;  %v3919_v50 = vrot.slane %v6971_v2, 5  ;;  %v2976_v27 = vrot.slane %v2975_v55, 4  ;;  %v2985_v11 = vrot.slane %v2983_v63, 4  ;;  %v3584_v57 = vld [vmem:[#allocation3 + $0x4c] sm:$0x1] }
 0x320   :  { %v7556_v44 = vrot.slane %v6888_v54, 9  ;;  %v3251_v28 = vsel %vm5841_vm13, %v3246_v21, %v3250_v19  ;;  %v2988_v0 = vrot.slane %v2986_v46, 5  ;;  %v7557_v13 = vrot.slane %v6890_v7, 9  ;;  %v3561_v63 = vld [vmem:[#allocation3 + $0x10] sm:$0xf] }
 0x321   :  { %v3551_v24 = vsel %vm5625_vm10, %v4956_v32, %v3550_v18  ;;  %v4106_v62 = vunpack.c.l.b16 %v3251_v28  ;;  %v2981_v43 = vsel %vm5841_vm13, %v2976_v27, %v2980_v20  ;;  %v2994_v32 = vrot.slane %v2992_v56, 5  ;;  %v3562_v39 = vld [vmem:[#allocation3 + $0x18] sm:$0xf] }
 0x322   :  { %v3916_v4 = vsel %vm5625_vm10, %v7556_v44, %v3915_v34  ;;  %v3920_v15 = vsel %vm5625_vm10, %v7557_v13, %v3919_v50  ;;  %v4158_v54 = vunpack.c.l.b16 %v3551_v24  ;;  %v2989_v53 = vor.u32 %v2988_v0, %v2985_v11  ;;  %v3200_v13 = vld [vmem:[#allocation3 + $0x58] sm:$0xf] }
 0x323   :  { %v4293_v59 = vunpack.c.l.b16 %v3916_v4  ;;  %v4294_v3 = vunpack.c.l.b16 %v3920_v15  ;;  %v4121_v7 = vpack.c.b16 %v4106_v62, %v4105_v16  ;;  %v3977_v55 = vunpack.c.l.b16 %v2981_v43  ;;  %v3201_v62 = vld [vmem:[#allocation3 + $0x60] sm:$0xf] }
 0x324   :  { %v4167_v19 = vpack.c.b16 %v4158_v54, %v4157_v51  ;;  %v6994_v46 = vld [vmem:[#allocation3 + $0x44] sm:$0x1]  ;;  %v4966_v18 = vrot.slane %v3824_v42, 9  ;;  %v2990_v44 = vrot.slane %v2989_v53, 4  ;;  %v3895_v27 = vrot.slane %v3584_v57, 5 }
 0x325   :  { %v3583_v34 = vld [vmem:[#allocation3 + $0x44] sm:$0x1]  ;;  %v4303_v21 = vpack.c.b16 %v4294_v3, %v4293_v59  ;;  %v3526_v50 = vrot.slane %v6994_v46, 5  ;;  %4129 = vrot.lane.b32.xlu0 %v4121_v7, %s5238_s5  ;;  %v3594_v56 = vshrl.u32 %v3561_v63, 16  ;;  %v3597_v20 = vshll.u32 %v3561_v63, 16 }
 0x326   :  { %v3891_v4 = vrot.slane %v3583_v34, 5  ;;  %v3603_v11 = vshll.u32 %v6708_v29, 16  ;;  %4181 = vrot.lane.b32.xlu2 %v4167_v19, %s5244_s19  ;;  %v2995_v51 = vsel %vm5841_vm13, %v2990_v44, %v2994_v32  ;;  %v3608_v24 = vshrl.u32 %v3562_v39, 16  ;;  %v7014_v19 = vpop.permute.xlu2 %4089 }
 0x327   :  { %4317 = vrot.lane.b32.xlu1 %v4303_v21, %s5245_s20  ;;  %v3527_v47 = vsel %vm5625_vm10, %v4950_v45, %v3526_v50  ;;  %v3978_v0 = vunpack.c.l.b16 %v2995_v51  ;;  %v3896_v29 = vsel %vm5625_vm10, %v4966_v18, %v3895_v27  ;;  %v3596_v59 = vrot.slane %v3594_v56, 4  ;;  %v3194_v50 = vld [vmem:[#allocation3 + $0x18] sm:$0xf] }
 0x328   :  { %v3892_v16 = vsel %vm5625_vm10, %v4965_v40, %v3891_v4  ;;  %v4152_v28 = vunpack.c.l.b16 %v3527_v47  ;;  %v4288_v15 = vunpack.c.l.b16 %v3896_v29  ;;  %v3599_v35 = vrot.slane %v3597_v20, 5 }
 0x329   :  { %v4287_v42 = vunpack.c.l.b16 %v3892_v16  ;;  %v3605_v54 = vrot.slane %v3603_v11, 5  ;;  %v3989_v57 = vpack.c.b16 %v3978_v0, %v3977_v55  ;;  %v3610_v3 = vrot.slane %v3608_v24, 4  ;;  %v3195_v11 = vld [vmem:[#allocation3 + $0x20] sm:$0xf] }
 0x32a   :  { %v4164_v45 = vpack.c.b16 %v4152_v28, %v4151_v17  ;;  %v3611_v43 = vshll.u32 %v3562_v39, 16  ;;  %v3600_v53 = vor.u32 %v3599_v35, %v3596_v59  ;;  %v3617_v32 = vshll.u32 %v6774_v33, 16 }
 0x32b   :  { %v4300_v40 = vpack.c.b16 %v4288_v15, %v4287_v42  ;;  %v3337_v63 = vshrl.u32 %v3200_v13, 16  ;;  %v3340_v34 = vshll.u32 %v3200_v13, 16  ;;  %v3346_v18 = vshll.u32 %v6641_v58, 16 }
 0x32c   :  { %v3613_v7 = vrot.slane %v3611_v43, 5  ;;  %v3351_v21 = vshrl.u32 %v3201_v62, 16  ;;  %v3601_v44 = vrot.slane %v3600_v53, 4  ;;  %v3619_v4 = vrot.slane %v3617_v32, 5 }
 0x32d   :  { %v3339_v22 = vrot.slane %v3337_v63, 4  ;;  %v3354_v17 = vshll.u32 %v3201_v62, 16  ;;  %v3342_v27 = vrot.slane %v3340_v34, 5  ;;  %v3348_v39 = vrot.slane %v3346_v18, 5 }
 0x32e   :  { %v3614_v55 = vor.u32 %v3613_v7, %v3610_v3  ;;  %v3353_v56 = vrot.slane %v3351_v21, 4  ;;  %4001 = vrot.lane.b32.xlu2 %v3989_v57, %s5236_s29  ;;  %v3606_v33 = vsel %vm5841_vm13, %v3601_v44, %v3605_v54  ;;  %v3360_v58 = vshll.u32 %v6677_v36, 16  ;;  %v3569_v3 = vld [vmem:[#allocation3 + $0x60] sm:$0xf]  ;;  %v3570_v7 = vld [vmem:[#allocation3 + $0x68] sm:$0xf] }
 0x32f   :  { %4175 = vrot.lane.b32.xlu1 %v4164_v45, %s5244_s19  ;;  %v3356_v20 = vrot.slane %v3354_v17, 5  ;;  %v3253_v47 = vshrl.u32 %v3194_v50, 16  ;;  %v4241_v16 = vunpack.c.l.b16 %v3606_v33  ;;  %v3343_v24 = vor.u32 %v3342_v27, %v3339_v22 }
 0x330   :  { %v3615_v51 = vrot.slane %v3614_v55, 4  ;;  %v3256_v28 = vshll.u32 %v3194_v50, 16  ;;  %v3362_v29 = vrot.slane %v3360_v58, 5  ;;  %v3262_v13 = vshll.u32 %v6780_v52, 16  ;;  %v7030_v50 = vpop.permute.xlu2 %4225 }
 0x331   :  { %v3357_v0 = vor.u32 %v3356_v20, %v3353_v56  ;;  %v3255_v42 = vrot.slane %v3253_v47, 4  ;;  %v3344_v59 = vrot.slane %v3343_v24, 4  ;;  %v3267_v54 = vshrl.u32 %v3195_v11, 16  ;;  %v2826_v56 = vld [vmem:[#allocation3 + $0x10] sm:$0xf] }
 0x332   :  { %v3620_v15 = vsel %vm5841_vm13, %v3615_v51, %v3619_v4  ;;  %v3258_v35 = vrot.slane %v3256_v28, 5  ;;  %v3264_v36 = vrot.slane %v3262_v13, 5  ;;  %v3270_v57 = vshll.u32 %v3195_v11, 16 }
 0x333   :  { %v4242_v62 = vunpack.c.l.b16 %v3620_v15  ;;  %v3358_v45 = vrot.slane %v3357_v0, 4  ;;  %v3349_v43 = vsel %vm5841_vm13, %v3344_v59, %v3348_v39  ;;  %v3269_v32 = vrot.slane %v3267_v54, 4 }
 0x334   :  { %v3259_v53 = vor.u32 %v3258_v35, %v3255_v42  ;;  %v3276_v63 = vshll.u32 %v6829_v5, 16  ;;  %v4113_v18 = vunpack.c.l.b16 %v3349_v43  ;;  %v3272_v21 = vrot.slane %v3270_v57, 5 }
 0x335   :  { %v4257_v52 = vpack.c.b16 %v4242_v62, %v4241_v16  ;;  %v3363_v34 = vsel %vm5841_vm13, %v3358_v45, %v3362_v29  ;;  %v3706_v17 = vshrl.u32 %v3569_v3, 16  ;;  %v3709_v5 = vshll.u32 %v3569_v3, 16  ;;  %v2827_v29 = vld [vmem:[#allocation3 + $0x18] sm:$0xf] }
 0x336   :  { %v4114_v44 = vunpack.c.l.b16 %v3363_v34  ;;  %v3260_v4 = vrot.slane %v3259_v53, 4  ;;  %v3278_v22 = vrot.slane %v3276_v63, 5  ;;  %v3273_v55 = vor.u32 %v3272_v21, %v3269_v32 }
 0x337   :  { %4311 = vrot.lane.b32.xlu1 %v4300_v40, %s5245_s20  ;;  %4265 = vrot.lane.b32.xlu0 %v4257_v52, %s5246_s22  ;;  %v3715_v27 = vshll.u32 %v6704_v12, 16  ;;  %v3720_v39 = vshrl.u32 %v3570_v7, 16  ;;  %v3708_v58 = vrot.slane %v3706_v17, 4  ;;  %v3723_v11 = vshll.u32 %v3570_v7, 16 }
 0x338   :  { %v4125_v33 = vpack.c.b16 %v4114_v44, %v4113_v18  ;;  %v3265_v20 = vsel %vm5841_vm13, %v3260_v4, %v3264_v36  ;;  %v3274_v47 = vrot.slane %v3273_v55, 4  ;;  %v3711_v16 = vrot.slane %v3709_v5, 5  ;;  %v3563_v36 = vld [vmem:[#allocation3 + $0x20] sm:$0xf] }
 0x339   :  { %v4107_v51 = vunpack.c.l.b16 %v3265_v20  ;;  %v3717_v24 = vrot.slane %v3715_v27, 5  ;;  %v3722_v40 = vrot.slane %v3720_v39, 4  ;;  %v3725_v28 = vrot.slane %v3723_v11, 5  ;;  %v2834_v11 = vld [vmem:[#allocation3 + $0x60] sm:$0xf] }
 0x33a   :  { %4137 = vrot.lane.b32.xlu2 %v4125_v33, %s5238_s5  ;;  %v3729_v0 = vshll.u32 %v6745_v41, 16  ;;  %v2885_v12 = vshrl.u32 %v2826_v56, 16  ;;  %v3279_v42 = vsel %vm5841_vm13, %v3274_v47, %v3278_v22  ;;  %v3712_v13 = vor.u32 %v3711_v16, %v3708_v58  ;;  %v7048_v22 = vpop.permute.xlu2 %4099 }
 0x33b   :  { %v2888_v15 = vshll.u32 %v2826_v56, 16  ;;  %v2894_v59 = vshll.u32 %v6739_v8, 16  ;;  %v4108_v35 = vunpack.c.l.b16 %v3279_v42  ;;  %v3726_v54 = vor.u32 %v3725_v28, %v3722_v40  ;;  %v3564_v8 = vld [vmem:[#allocation3 + $0x28] sm:$0xf] }
 0x33c   :  { %v3731_v62 = vrot.slane %v3729_v0, 5  ;;  %v2887_v45 = vrot.slane %v2885_v12, 4  ;;  %v3713_v57 = vrot.slane %v3712_v13, 4  ;;  %v2899_v53 = vshrl.u32 %v2827_v29, 16  ;;  %v2835_v40 = vld [vmem:[#allocation3 + $0x68] sm:$0xf] }
 0x33d   :  { %v2890_v3 = vrot.slane %v2888_v15, 5  ;;  %v2896_v43 = vrot.slane %v2894_v59, 5  ;;  %v4122_v32 = vpack.c.b16 %v4108_v35, %v4107_v51  ;;  %v3727_v41 = vrot.slane %v3726_v54, 4 }
 0x33e   :  { %v2902_v63 = vshll.u32 %v2827_v29, 16  ;;  %v2908_v7 = vshll.u32 %v6782_v38, 16  ;;  %v3718_v52 = vsel %vm5841_vm13, %v3713_v57, %v3717_v24  ;;  %v2901_v18 = vrot.slane %v2899_v53, 4 }
 0x33f   :  { %v2891_v34 = vor.u32 %v2890_v3, %v2887_v45  ;;  %v3622_v21 = vshrl.u32 %v3563_v36, 16  ;;  %4131 = vrot.lane.b32.xlu1 %v4122_v32, %s5238_s5  ;;  %v3732_v44 = vsel %vm5841_vm13, %v3727_v41, %v3731_v62  ;;  %v4249_v4 = vunpack.c.l.b16 %v3718_v52  ;;  %v3196_v3 = vld [vmem:[#allocation3 + $0x28] sm:$0xf] }
 0x340   :  { %v2904_v17 = vrot.slane %v2902_v63, 5  ;;  %v2910_v55 = vrot.slane %v2908_v7, 5  ;;  %v4250_v5 = vunpack.c.l.b16 %v3732_v44  ;;  %v3625_v39 = vshll.u32 %v3563_v36, 16 }
 0x341   :  { %v2892_v27 = vrot.slane %v2891_v34, 4  ;;  %v3624_v38 = vrot.slane %v3622_v21, 4  ;;  %v3631_v33 = vshll.u32 %v6831_v1, 16  ;;  %v3636_v20 = vshrl.u32 %v3564_v8, 16  ;;  %v7061_v21 = vpop.permute.xlu0 %4091 }
 0x342   :  { %v2905_v56 = vor.u32 %v2904_v17, %v2901_v18  ;;  %v3639_v58 = vshll.u32 %v3564_v8, 16  ;;  %v4261_v47 = vpack.c.b16 %v4250_v5, %v4249_v4  ;;  %v3627_v16 = vrot.slane %v3625_v39, 5  ;;  %v7063_v44 = vpop.permute.xlu2 %4235  ;;  %v3197_v4 = vld [vmem:[#allocation3 + $0x30] sm:$0xf] }
 0x343   :  { %v2897_v51 = vsel %vm5841_vm13, %v2892_v27, %v2896_v43  ;;  %v3645_v24 = vshll.u32 %v6802_v14, 16  ;;  %v3633_v29 = vrot.slane %v3631_v33, 5  ;;  %v3638_v12 = vrot.slane %v3636_v20, 4  ;;  %v7068_v27 = vpop.permute.xlu1 %4097 }
 0x344   :  { %v2906_v28 = vrot.slane %v2905_v56, 4  ;;  %v3971_v0 = vunpack.c.l.b16 %v2897_v51  ;;  %4273 = vrot.lane.b32.xlu0 %v4261_v47, %s5246_s22  ;;  %v3628_v42 = vor.u32 %v3627_v16, %v3624_v38  ;;  %v3641_v13 = vrot.slane %v3639_v58, 5  ;;  %v3571_v16 = vld [vmem:[#allocation3 + $0x70] sm:$0xf] }
 0x345   :  { %v3647_v1 = vrot.slane %v3645_v24, 5  ;;  %v2997_v15 = vshrl.u32 %v2834_v11, 16  ;;  %v3000_v35 = vshll.u32 %v2834_v11, 16  ;;  %v3006_v54 = vshll.u32 %v6806_v6, 16 }
 0x346   :  { %v2911_v59 = vsel %vm5841_vm13, %v2906_v28, %v2910_v55  ;;  %v3011_v62 = vshrl.u32 %v2835_v40, 16  ;;  %v3629_v14 = vrot.slane %v3628_v42, 4  ;;  %v3642_v36 = vor.u32 %v3641_v13, %v3638_v12  ;;  %v3572_v13 = vld [vmem:[#allocation3 + $0x78] sm:$0xf] }
 0x347   :  { %v3972_v45 = vunpack.c.l.b16 %v2911_v59  ;;  %v2999_v57 = vrot.slane %v2997_v15, 4  ;;  %v3002_v43 = vrot.slane %v3000_v35, 5  ;;  %v3008_v53 = vrot.slane %v3006_v54, 5 }
 0x348   :  { %v3013_v32 = vrot.slane %v3011_v62, 4  ;;  %v3014_v41 = vshll.u32 %v2835_v40, 16  ;;  %v3634_v7 = vsel %vm5841_vm13, %v3629_v14, %v3633_v29  ;;  %v3643_v52 = vrot.slane %v3642_v36, 4  ;;  %v5224_v14 = vld [vmem:[#allocation3 + $0x74] sm:$0x1] }
 0x349   :  { %v3986_v63 = vpack.c.b16 %v3972_v45, %v3971_v0  ;;  %v3020_v34 = vshll.u32 %v6810_v23, 16  ;;  %v4243_v18 = vunpack.c.l.b16 %v3634_v7  ;;  %v3003_v8 = vor.u32 %v3002_v43, %v2999_v57 }
 0x34a   :  { %v3016_v6 = vrot.slane %v3014_v41, 5  ;;  %v3281_v17 = vshrl.u32 %v3196_v3, 16  ;;  %v3648_v55 = vsel %vm5841_vm13, %v3643_v52, %v3647_v1  ;;  %v3284_v38 = vshll.u32 %v3196_v3, 16 }
 0x34b   :  { %3995 = vrot.lane.b32.xlu2 %v3986_v63, %s5236_s29  ;;  %v3022_v5 = vrot.slane %v3020_v34, 5  ;;  %v3290_v23 = vshll.u32 %v6794_v37, 16  ;;  %v4244_v39 = vunpack.c.l.b16 %v3648_v55  ;;  %v3004_v56 = vrot.slane %v3003_v8, 4 }
 0x34c   :  { %v3017_v33 = vor.u32 %v3016_v6, %v3013_v32  ;;  %v3283_v20 = vrot.slane %v3281_v17, 4  ;;  %v3286_v58 = vrot.slane %v3284_v38, 5  ;;  %v3295_v47 = vshrl.u32 %v3197_v4, 16  ;;  %v3203_v6 = vld [vmem:[#allocation3 + $0x70] sm:$0xf]  ;;  %v7081_v17 = vpop.permute.xlu2 %4095 }
 0x34d   :  { %v3292_v11 = vrot.slane %v3290_v23, 5  ;;  %v3298_v51 = vshll.u32 %v3197_v4, 16  ;;  %v4258_v24 = vpack.c.b16 %v4244_v39, %v4243_v18  ;;  %v3009_v40 = vsel %vm5841_vm13, %v3004_v56, %v3008_v53  ;;  %v3202_v53 = vld [vmem:[#allocation3 + $0x68] sm:$0xf]  ;;  %v7079_v4 = vpop.permute.xlu0 %4227  ;;  %v7086_v56 = vpop.permute.xlu1 %4233 }
 0x34e   :  { %v3018_v28 = vrot.slane %v3017_v33, 4  ;;  %v3304_v0 = vshll.u32 %v6812_v10, 16  ;;  %v3979_v29 = vunpack.c.l.b16 %v3009_v40  ;;  %v3287_v12 = vor.u32 %v3286_v58, %v3283_v20  ;;  %v3565_v40 = vld [vmem:[#allocation3 + $0x30] sm:$0xf] }
 0x34f   :  { %v3297_v42 = vrot.slane %v3295_v47, 4  ;;  %v3300_v37 = vrot.slane %v3298_v51, 5  ;;  %4267 = vrot.lane.b32.xlu1 %v4258_v24, %s5246_s22  ;;  %v3734_v59 = vshrl.u32 %v3571_v16, 16  ;;  %v3737_v35 = vshll.u32 %v3571_v16, 16 }
 0x350   :  { %v3023_v1 = vsel %vm5841_vm13, %v3018_v28, %v3022_v5  ;;  %v3306_v15 = vrot.slane %v3304_v0, 5  ;;  %v3288_v62 = vrot.slane %v3287_v12, 4  ;;  %v3743_v36 = vshll.u32 %v5224_v14, 16  ;;  %v5225_v5 = vld [vmem:[#allocation3 + $0x7c] sm:$0x1] }
 0x351   :  { %v3980_v54 = vunpack.c.l.b16 %v3023_v1  ;;  %v3301_v45 = vor.u32 %v3300_v37, %v3297_v42  ;;  %v3736_v57 = vrot.slane %v3734_v59, 4  ;;  %v3739_v10 = vrot.slane %v3737_v35, 5 }
 0x352   :  { %v3748_v3 = vshrl.u32 %v3572_v13, 16  ;;  %v3751_v43 = vshll.u32 %v3572_v13, 16  ;;  %v3293_v41 = vsel %vm5841_vm13, %v3288_v62, %v3292_v11  ;;  %v3745_v7 = vrot.slane %v3743_v36, 5 }
 0x353   :  { %v3990_v32 = vpack.c.b16 %v3980_v54, %v3979_v29  ;;  %v3302_v63 = vrot.slane %v3301_v45, 4  ;;  %v4109_v52 = vunpack.c.l.b16 %v3293_v41  ;;  %v3740_v34 = vor.u32 %v3739_v10, %v3736_v57 }
 0x354   :  { %v3750_v18 = vrot.slane %v3748_v3, 4  ;;  %v3753_v8 = vrot.slane %v3751_v43, 5  ;;  %v3757_v38 = vshll.u32 %v5225_v5, 16  ;;  %v3365_v23 = vshrl.u32 %v3202_v53, 16 }
 0x355   :  { %4003 = vrot.lane.b32.xlu0 %v3990_v32, %s5236_s29  ;;  %v3307_v55 = vsel %vm5841_vm13, %v3302_v63, %v3306_v15  ;;  %v3368_v39 = vshll.u32 %v3202_v53, 16  ;;  %v3741_v20 = vrot.slane %v3740_v34, 4  ;;  %v3374_v11 = vshll.u32 %v6856_v31, 16  ;;  %v3566_v15 = vld [vmem:[#allocation3 + $0x38] sm:$0xf] }
 0x356   :  { %v4110_v33 = vunpack.c.l.b16 %v3307_v55  ;;  %v3754_v58 = vor.u32 %v3753_v8, %v3750_v18  ;;  %v3759_v47 = vrot.slane %v3757_v38, 5  ;;  %v3367_v51 = vrot.slane %v3365_v23, 4  ;;  %v2836_v53 = vld [vmem:[#allocation3 + $0x70] sm:$0xf]  ;;  %v7100_v55 = vpop.permute.xlu2 %4231 }
 0x357   :  { %v3370_v16 = vrot.slane %v3368_v39, 5  ;;  %v3379_v24 = vshrl.u32 %v3203_v6, 16  ;;  %v3746_v0 = vsel %vm5841_vm13, %v3741_v20, %v3745_v7  ;;  %v3376_v12 = vrot.slane %v3374_v11, 5  ;;  %v7104_v39 = vpop.permute.xlu1 %4093 }
 0x358   :  { %v4123_v28 = vpack.c.b16 %v4110_v33, %v4109_v52  ;;  %v3755_v29 = vrot.slane %v3754_v58, 4  ;;  %v4251_v42 = vunpack.c.l.b16 %v3746_v0  ;;  %v3382_v1 = vshll.u32 %v3203_v6, 16  ;;  %v2837_v52 = vld [vmem:[#allocation3 + $0x78] sm:$0xf]  ;;  %v7098_v6 = vpop.permute.xlu0 %4101  ;;  %v7558_v58 = vld [vmem:[#allocation6_spill] sm:$0xff] }
 0x359   :  { %v3371_v37 = vor.u32 %v3370_v16, %v3367_v51  ;;  %v3381_v13 = vrot.slane %v3379_v24, 4  ;;  %v3388_v59 = vshll.u32 %v6869_v30, 16  ;;  %v3650_v35 = vshrl.u32 %v3565_v40, 16 }
 0x35a   :  { %4133 = vrot.lane.b32.xlu2 %v4123_v28, %s5238_s5  ;;  %v3760_v31 = vsel %vm5841_vm13, %v3755_v29, %v3759_v47  ;;  %v3653_v54 = vshll.u32 %v3565_v40, 16  ;;  %v3384_v14 = vrot.slane %v3382_v1, 5  ;;  %v3659_v36 = vshll.u32 %v6822_v48, 16  ;;  %v2828_v40 = vld [vmem:[#allocation3 + $0x20] sm:$0xf] }
 0x35b   :  { %v4252_v62 = vunpack.c.l.b16 %v3760_v31  ;;  %v3372_v45 = vrot.slane %v3371_v37, 4  ;;  %v3390_v57 = vrot.slane %v3388_v59, 5  ;;  %v3652_v10 = vrot.slane %v3650_v35, 4  ;;  %v2829_v1 = vld [vmem:[#allocation3 + $0x28] sm:$0xf]  ;;  %v7559_v59 = vld [vmem:[#allocation7_spill] sm:$0xff] }
 0x35c   :  { %v3655_v3 = vrot.slane %v3653_v54, 5  ;;  %v3664_v43 = vshrl.u32 %v3566_v15, 16  ;;  %v3385_v63 = vor.u32 %v3384_v14, %v3381_v13  ;;  %v3661_v7 = vrot.slane %v3659_v36, 5 }
 0x35d   :  { %v4262_v32 = vpack.c.b16 %v4252_v62, %v4251_v42  ;;  %v3377_v41 = vsel %vm5841_vm13, %v3372_v45, %v3376_v12  ;;  %v3667_v8 = vshll.u32 %v3566_v15, 16  ;;  %v3673_v5 = vshll.u32 %v6859_v49, 16 }
 0x35e   :  { %v4115_v30 = vunpack.c.l.b16 %v3377_v41  ;;  %v3656_v34 = vor.u32 %v3655_v3, %v3652_v10  ;;  %v3666_v18 = vrot.slane %v3664_v43, 4  ;;  %v3386_v48 = vrot.slane %v3385_v63, 4  ;;  %v7560_v3 = vld [vmem:[#allocation5_spill] sm:$0xff] }
 0x35f   :  { %4275 = vrot.lane.b32.xlu1 %v4262_v32, %s5246_s22  ;;  %v3025_v38 = vshrl.u32 %v2836_v53, 16  ;;  %v3028_v23 = vshll.u32 %v2836_v53, 16  ;;  %v3669_v20 = vrot.slane %v3667_v8, 5  ;;  %v3034_v11 = vshll.u32 %v7558_v58, 16  ;;  %v5226_v58 = vld [vmem:[#allocation3 + $0x2c] sm:$0x1] }
 0x360   :  { %v3657_v33 = vrot.slane %v3656_v34, 4  ;;  %v3039_v47 = vshrl.u32 %v2837_v52, 16  ;;  %v3391_v51 = vsel %vm5841_vm13, %v3386_v48, %v3390_v57  ;;  %v3675_v29 = vrot.slane %v3673_v5, 5  ;;  %v3574_v48 = vld [vmem:[#allocation3 + $0x88] sm:$0xf]  ;;  %v7118_v5 = vpop.permute.xlu0 %4237 }
 0x361   :  { %v3027_v16 = vrot.slane %v3025_v38, 4  ;;  %v3030_v24 = vrot.slane %v3028_v23, 5  ;;  %v4116_v28 = vunpack.c.l.b16 %v3391_v51  ;;  %v3670_v49 = vor.u32 %v3669_v20, %v3666_v18  ;;  %v7120_v38 = vpop.permute.xlu2 %4313 }
 0x362   :  { %v3662_v0 = vsel %vm5841_vm13, %v3657_v33, %v3661_v7  ;;  %v3036_v42 = vrot.slane %v3034_v11, 5  ;;  %v3041_v37 = vrot.slane %v3039_v47, 4  ;;  %v3042_v13 = vshll.u32 %v2837_v52, 16  ;;  %v3573_v52 = vld [vmem:[#allocation3 + $0x80] sm:$0xf]  ;;  %v7122_v47 = vpop.permute.xlu1 %4229 }
 0x363   :  { %v3031_v12 = vor.u32 %v3030_v24, %v3027_v16  ;;  %v4126_v15 = vpack.c.b16 %v4116_v28, %v4115_v30  ;;  %v3671_v31 = vrot.slane %v3670_v49, 4  ;;  %v3048_v35 = vshll.u32 %v7559_v59, 16 }
 0x364   :  { %v2913_v54 = vshrl.u32 %v2828_v40, 16  ;;  %v4245_v62 = vunpack.c.l.b16 %v3662_v0  ;;  %v3044_v14 = vrot.slane %v3042_v13, 5  ;;  %v2916_v36 = vshll.u32 %v2828_v40, 16 }
 0x365   :  { %v3032_v45 = vrot.slane %v3031_v12, 4  ;;  %4139 = vrot.lane.b32.xlu0 %v4126_v15, %s5238_s5  ;;  %v3676_v57 = vsel %vm5841_vm13, %v3671_v31, %v3675_v29  ;;  %v2922_v43 = vshll.u32 %v7560_v3, 16  ;;  %v2927_v53 = vshrl.u32 %v2829_v1, 16 }
 0x366   :  { %v2915_v10 = vrot.slane %v2913_v54, 4  ;;  %v4246_v32 = vunpack.c.l.b16 %v3676_v57  ;;  %v3045_v63 = vor.u32 %v3044_v14, %v3041_v37  ;;  %v2918_v7 = vrot.slane %v2916_v36, 5  ;;  %v3205_v54 = vld [vmem:[#allocation3 + $0x80] sm:$0xf] }
 0x367   :  { %v3037_v41 = vsel %vm5841_vm13, %v3032_v45, %v3036_v42  ;;  %v3050_v30 = vrot.slane %v3048_v35, 5  ;;  %v2929_v18 = vrot.slane %v2927_v53, 4  ;;  %v2930_v8 = vshll.u32 %v2829_v1, 16  ;;  %v3204_v1 = vld [vmem:[#allocation3 + $0x78] sm:$0xf] }
 0x368   :  { %v3981_v34 = vunpack.c.l.b16 %v3037_v41  ;;  %v4259_v23 = vpack.c.b16 %v4246_v32, %v4245_v62  ;;  %v3046_v33 = vrot.slane %v3045_v63, 4  ;;  %v2919_v20 = vor.u32 %v2918_v7, %v2915_v10  ;;  %v7134_v63 = vld [vmem:[#allocation3 + $0x84] sm:$0x1] }
 0x369   :  { %v2936_v11 = vshll.u32 %v5226_v58, 16  ;;  %v2924_v51 = vrot.slane %v2922_v43, 5  ;;  %v2932_v16 = vrot.slane %v2930_v8, 5  ;;  %v3762_v24 = vshrl.u32 %v3573_v52, 16  ;;  %v7141_v58 = vpop.permute.xlu0 %4041 }
 0x36a   :  { %v3765_v40 = vshll.u32 %v3573_v52, 16  ;;  %4269 = vrot.lane.b32.xlu2 %v4259_v23, %s5246_s22  ;;  %v3051_v28 = vsel %vm5841_vm13, %v3046_v33, %v3050_v30  ;;  %v2920_v0 = vrot.slane %v2919_v20, 4  ;;  %v3771_v49 = vshll.u32 %v6961_v60, 16  ;;  %v3095_v20 = vld [vmem:[#allocation3 + $0x88] sm:$0xe] }
 0x36b   :  { %v3776_v29 = vshrl.u32 %v3574_v48, 16  ;;  %v3982_v12 = vunpack.c.l.b16 %v3051_v28  ;;  %v2933_v42 = vor.u32 %v2932_v16, %v2929_v18  ;;  %v3764_v37 = vrot.slane %v3762_v24, 4  ;;  %v7137_v18 = vld [vmem:[#allocation3 + $0x8c] sm:$0x1]  ;;  %v7145_v28 = vpop.permute.xlu1 %4033 }
 0x36c   :  { %v3767_v13 = vrot.slane %v3765_v40, 5  ;;  %v2925_v15 = vsel %vm5841_vm13, %v2920_v0, %v2924_v51  ;;  %v2938_v31 = vrot.slane %v2936_v11, 5  ;;  %v3779_v35 = vshll.u32 %v3574_v48, 16  ;;  %v7143_v11 = vpop.permute.xlu2 %4171 }
 0x36d   :  { %v3778_v59 = vrot.slane %v3776_v29, 4  ;;  %v3991_v62 = vpack.c.b16 %v3982_v12, %v3981_v34  ;;  %v2934_v45 = vrot.slane %v2933_v42, 4  ;;  %v3973_v14 = vunpack.c.l.b16 %v2925_v15  ;;  %v2838_v12 = vld [vmem:[#allocation3 + $0x80] sm:$0xf] }
 0x36e   :  { %v3768_v36 = vor.u32 %v3767_v13, %v3764_v37  ;;  %v3781_v57 = vrot.slane %v3779_v35, 5  ;;  %v3785_v60 = vshll.u32 %v6971_v2, 16  ;;  %v3393_v10 = vshrl.u32 %v3204_v1, 16  ;;  %v3094_v2 = vld [vmem:[#allocation3 + $0x80] sm:$0xe] }
 0x36f   :  { %v3396_v3 = vshll.u32 %v3204_v1, 16  ;;  %4005 = vrot.lane.b32.xlu1 %v3991_v62, %s5236_s29  ;;  %v2939_v43 = vsel %vm5841_vm13, %v2934_v45, %v2938_v31  ;;  %v3773_v32 = vrot.slane %v3771_v49, 5  ;;  %v3407_v41 = vshrl.u32 %v3205_v54, 16  ;;  %v2839_v45 = vld [vmem:[#allocation3 + $0x88] sm:$0xf] }
 0x370   :  { %v3769_v53 = vrot.slane %v3768_v36, 4  ;;  %v3974_v7 = vunpack.c.l.b16 %v2939_v43  ;;  %v3782_v52 = vor.u32 %v3781_v57, %v3778_v59  ;;  %v3395_v30 = vrot.slane %v3393_v10, 4 }
 0x371   :  { %v3402_v34 = vshll.u32 %v6908_v61, 16  ;;  %v3787_v48 = vrot.slane %v3785_v60, 5  ;;  %v3398_v23 = vrot.slane %v3396_v3, 5  ;;  %v3409_v33 = vrot.slane %v3407_v41, 4  ;;  %v2830_v3 = vld [vmem:[#allocation3 + $0x30] sm:$0xf] }
 0x372   :  { %v3774_v8 = vsel %vm5841_vm13, %v3769_v53, %v3773_v32  ;;  %v3987_v51 = vpack.c.b16 %v3974_v7, %v3973_v14  ;;  %v3783_v16 = vrot.slane %v3782_v52, 4  ;;  %v3410_v40 = vshll.u32 %v3205_v54, 16 }
 0x373   :  { %v4253_v24 = vunpack.c.l.b16 %v3774_v8  ;;  %v3399_v61 = vor.u32 %v3398_v23, %v3395_v30  ;;  %v3416_v0 = vshll.u32 %v6963_v26, 16  ;;  %v4941_v49 = vrot.slane %v3094_v2, 9  ;;  %v2831_v23 = vld [vmem:[#allocation3 + $0x38] sm:$0xf] }
 0x374   :  { %v3186_v29 = vrot.slane %v7134_v63, 5  ;;  %3997 = vrot.lane.b32.xlu0 %v3987_v51, %s5236_s29  ;;  %v3788_v42 = vsel %vm5841_vm13, %v3783_v16, %v3787_v48  ;;  %v3412_v37 = vrot.slane %v3410_v40, 5  ;;  %v4942_v13 = vrot.slane %v3095_v20, 9  ;;  %v7164_v40 = vpop.permute.xlu0 %4177 }
 0x375   :  { %v3190_v1 = vrot.slane %v7137_v18, 5  ;;  %v4254_v15 = vunpack.c.l.b16 %v3788_v42  ;;  %v3400_v31 = vrot.slane %v3399_v61, 4  ;;  %v3404_v59 = vrot.slane %v3402_v34, 5  ;;  %v3198_v42 = vld [vmem:[#allocation3 + $0x38] sm:$0xf] }
 0x376   :  { %v3187_v35 = vsel %vm5625_vm10, %v4941_v49, %v3186_v29  ;;  %v3413_v26 = vor.u32 %v3412_v37, %v3409_v33  ;;  %v3053_v14 = vshrl.u32 %v2838_v12, 16  ;;  %v3056_v10 = vshll.u32 %v2838_v12, 16  ;;  %v5227_v29 = vld [vmem:[#allocation3 + $0x34] sm:$0x1]  ;;  %v7169_v37 = vpop.permute.xlu1 %4169 }
 0x377   :  { %v3191_v54 = vsel %vm5625_vm10, %v4942_v13, %v3190_v1  ;;  %v4023_v62 = vunpack.c.l.b16 %v3187_v35  ;;  %v4263_v36 = vpack.c.b16 %v4254_v15, %v4253_v24  ;;  %v3405_v57 = vsel %vm5841_vm13, %v3400_v31, %v3404_v59 }
 0x378   :  { %v4024_v60 = vunpack.c.l.b16 %v3191_v54  ;;  %v3414_v43 = vrot.slane %v3413_v26, 4  ;;  %v3418_v53 = vrot.slane %v3416_v0, 5  ;;  %v3055_v32 = vrot.slane %v3053_v14, 4  ;;  %v5228_v26 = vld [vmem:[#allocation3 + $0x3c] sm:$0x1] }
 0x379   :  { %v3062_v41 = vshll.u32 %v7134_v63, 16  ;;  %4277 = vrot.lane.b32.xlu2 %v4263_v36, %s5246_s22  ;;  %v4117_v7 = vunpack.c.l.b16 %v3405_v57  ;;  %v3058_v52 = vrot.slane %v3056_v10, 5  ;;  %v3067_v30 = vshrl.u32 %v2839_v45, 16  ;;  %v7166_v63 = vpop.permute.xlu2 %4307  ;;  %v3199_v36 = vld [vmem:[#allocation3 + $0x40] sm:$0xf] }
 0x37a   :  { %v3070_v34 = vshll.u32 %v2839_v45, 16  ;;  %v3419_v2 = vsel %vm5841_vm13, %v3414_v43, %v3418_v53  ;;  %v4032_v8 = vpack.c.b16 %v4024_v60, %v4023_v62  ;;  %v3076_v48 = vshll.u32 %v7137_v18, 16 }
 0x37b   :  { %v2941_v33 = vshrl.u32 %v2830_v3, 16  ;;  %v4118_v20 = vunpack.c.l.b16 %v3419_v2  ;;  %v3059_v51 = vor.u32 %v3058_v52, %v3055_v32  ;;  %v3069_v16 = vrot.slane %v3067_v30, 4 }
 0x37c   :  { %v3072_v24 = vrot.slane %v3070_v34, 5  ;;  %4047 = vrot.lane.b32.xlu0 %v4032_v8, %s5240_s7  ;;  %v3064_v61 = vrot.slane %v3062_v41, 5  ;;  %v2944_v49 = vshll.u32 %v2830_v3, 16  ;;  %v2950_v12 = vshll.u32 %v5227_v29, 16 }
 0x37d   :  { %v2943_v0 = vrot.slane %v2941_v33, 4  ;;  %v4127_v18 = vpack.c.b16 %v4118_v20, %v4117_v7  ;;  %v3060_v13 = vrot.slane %v3059_v51, 4  ;;  %v2955_v15 = vshrl.u32 %v2831_v23, 16  ;;  %v5229_v7 = vld [vmem:[#allocation3 + $0x3c] sm:$0x1] }
 0x37e   :  { %v3073_v1 = vor.u32 %v3072_v24, %v3069_v16  ;;  %v3078_v31 = vrot.slane %v3076_v48, 5  ;;  %v2946_v59 = vrot.slane %v2944_v49, 5  ;;  %v2958_v35 = vshll.u32 %v2831_v23, 16  ;;  %v3206_v48 = vld [vmem:[#allocation3 + $0x88] sm:$0xf]  ;;  %v7179_v24 = vpop.permute.xlu0 %4315 }
 0x37f   :  { %v2964_v54 = vshll.u32 %v5228_v26, 16  ;;  %4141 = vrot.lane.b32.xlu1 %v4127_v18, %s5238_s5  ;;  %v3065_v62 = vsel %vm5841_vm13, %v3060_v13, %v3064_v61  ;;  %v2957_v14 = vrot.slane %v2955_v15, 4  ;;  %v3309_v57 = vshrl.u32 %v3198_v42, 16  ;;  %v7177_v16 = vld [vmem:[#allocation3 + $0x8c] sm:$0x1]  ;;  %v7185_v18 = vpop.permute.xlu1 %4305 }
 0x380   :  { %v3074_v45 = vrot.slane %v3073_v1, 4  ;;  %v3983_v60 = vunpack.c.l.b16 %v3065_v62  ;;  %v2947_v10 = vor.u32 %v2946_v59, %v2943_v0  ;;  %v2952_v3 = vrot.slane %v2950_v12, 5 }
 0x381   :  { %v2960_v43 = vrot.slane %v2958_v35, 5  ;;  %v3311_v32 = vrot.slane %v3309_v57, 4  ;;  %v3312_v41 = vshll.u32 %v3198_v42, 16  ;;  %v3318_v52 = vshll.u32 %v5229_v7, 16  ;;  %v7181_v61 = vpop.permute.xlu2 %4037  ;;  %v3207_v42 = vld [vmem:[#allocation3 + $0x90] sm:$0xf] }
 0x382   :  { %v3079_v53 = vsel %vm5841_vm13, %v3074_v45, %v3078_v31  ;;  %v2948_v34 = vrot.slane %v2947_v10, 4  ;;  %v3323_v8 = vshrl.u32 %v3199_v36, 16  ;;  %v2966_v23 = vrot.slane %v2964_v54, 5 }
 0x383   :  { %v3984_v30 = vunpack.c.l.b16 %v3079_v53  ;;  %v2961_v2 = vor.u32 %v2960_v43, %v2957_v14  ;;  %v3314_v33 = vrot.slane %v3312_v41, 5  ;;  %v3326_v20 = vshll.u32 %v3199_v36, 16  ;;  %v7191_v14 = vld [vmem:[#allocation3 + $0x94] sm:$0x1]  ;;  %v3567_v43 = vld [vmem:[#allocation3 + $0x40] sm:$0xf] }
 0x384   :  { %v3332_v51 = vshll.u32 %v6994_v46, 16  ;;  %v2953_v49 = vsel %vm5841_vm13, %v2948_v34, %v2952_v3  ;;  %v3325_v12 = vrot.slane %v3323_v8, 4  ;;  %v3320_v15 = vrot.slane %v3318_v52, 5  ;;  %v3568_v8 = vld [vmem:[#allocation3 + $0x48] sm:$0xf] }
 0x385   :  { %v3992_v0 = vpack.c.b16 %v3984_v30, %v3983_v60  ;;  %v2962_v29 = vrot.slane %v2961_v2, 4  ;;  %v3975_v13 = vunpack.c.l.b16 %v2953_v49  ;;  %v3315_v1 = vor.u32 %v3314_v33, %v3311_v32 }
 0x386   :  { %v3328_v31 = vrot.slane %v3326_v20, 5  ;;  %v3421_v59 = vshrl.u32 %v3206_v48, 16  ;;  %v3424_v35 = vshll.u32 %v3206_v48, 16  ;;  %v3430_v26 = vshll.u32 %v7177_v16, 16 }
 0x387   :  { %4007 = vrot.lane.b32.xlu2 %v3992_v0, %s5236_s29  ;;  %v2967_v46 = vsel %vm5841_vm13, %v2962_v29, %v2966_v23  ;;  %v3316_v62 = vrot.slane %v3315_v1, 4  ;;  %v3435_v36 = vshrl.u32 %v3207_v42, 16  ;;  %v3334_v57 = vrot.slane %v3332_v51, 5  ;;  %v7199_v51 = vpop.permute.xlu0 %4173 }
 0x388   :  { %v3976_v54 = vunpack.c.l.b16 %v2967_v46  ;;  %v3329_v45 = vor.u32 %v3328_v31, %v3325_v12  ;;  %v3423_v60 = vrot.slane %v3421_v59, 4  ;;  %v3426_v10 = vrot.slane %v3424_v35, 5  ;;  %v5230_v59 = vld [vmem:[#allocation3 + $0x44] sm:$0x1] }
 0x389   :  { %v3438_v3 = vshll.u32 %v3207_v42, 16  ;;  %v3321_v32 = vsel %vm5841_vm13, %v3316_v62, %v3320_v15  ;;  %v3437_v7 = vrot.slane %v3435_v36, 4  ;;  %v3444_v2 = vshll.u32 %v7191_v14, 16  ;;  %v5037_v42 = vld [vmem:[#allocation3 + $0x88] sm:$0xf]  ;;  %v7201_v1 = vpop.permute.xlu2 %4045  ;;  %v7203_v15 = vpop.permute.xlu1 %4035 }
 0x38a   :  { %v3988_v53 = vpack.c.b16 %v3976_v54, %v3975_v13  ;;  %v3330_v41 = vrot.slane %v3329_v45, 4  ;;  %v4111_v52 = vunpack.c.l.b16 %v3321_v32  ;;  %v3427_v30 = vor.u32 %v3426_v10, %v3423_v60  ;;  %v5136_v13 = vld [vmem:[#allocation3 + $0x8c] sm:$0xf0] }
 0x38b   :  { %v3440_v34 = vrot.slane %v3438_v3, 5  ;;  %v3432_v23 = vrot.slane %v3430_v26, 5  ;;  %v3678_v33 = vshrl.u32 %v3567_v43, 16  ;;  %v3681_v20 = vshll.u32 %v3567_v43, 16  ;;  %v3575_v26 = vld [vmem:[#allocation3 + $0x90] sm:$0xf] }
 0x38c   :  { %3999 = vrot.lane.b32.xlu1 %v3988_v53, %s5236_s29  ;;  %v3335_v48 = vsel %vm5841_vm13, %v3330_v41, %v3334_v57  ;;  %v3428_v49 = vrot.slane %v3427_v30, 4  ;;  %v3446_v12 = vrot.slane %v3444_v2, 5  ;;  %v3687_v35 = vshll.u32 %v5230_v59, 16  ;;  %v3576_v53 = vld [vmem:[#allocation3 + $0x98] sm:$0xf] }
 0x38d   :  { %v4112_v0 = vunpack.c.l.b16 %v3335_v48  ;;  %v3441_v29 = vor.u32 %v3440_v34, %v3437_v7  ;;  %v3680_v31 = vrot.slane %v3678_v33, 4  ;;  %v3683_v46 = vrot.slane %v3681_v20, 5  ;;  %v5231_v7 = vld [vmem:[#allocation3 + $0x4c] sm:$0x1]  ;;  %v7210_v34 = vld [vmem:[#allocation3 + $0x94] sm:$0x1] }
 0x38e   :  { %v3692_v54 = vshrl.u32 %v3568_v8, 16  ;;  %v3433_v45 = vsel %vm5841_vm13, %v3428_v49, %v3432_v23  ;;  %v3695_v57 = vshll.u32 %v3568_v8, 16  ;;  %v5038_v10 = vor.u32 %v5136_v13, %v5037_v42 }
 0x38f   :  { %v4124_v62 = vpack.c.b16 %v4112_v0, %v4111_v52  ;;  %v3442_v36 = vrot.slane %v3441_v29, 4  ;;  %v4119_v60 = vunpack.c.l.b16 %v3433_v45  ;;  %v3684_v3 = vor.u32 %v3683_v46, %v3680_v31  ;;  %v3462_v29 = vld [vmem:[#allocation3 + $0x88] sm:$0xe]  ;;  %v3463_v46 = vld [vmem:[#allocation3 + $0x90] sm:$0xe]  ;;  %v7216_v59 = vpop.permute.xlu0 %4309 }
 0x390   :  { %v3694_v43 = vrot.slane %v3692_v54, 4  ;;  %v3697_v41 = vrot.slane %v3695_v57, 5  ;;  %v3701_v30 = vshll.u32 %v5231_v7, 16  ;;  %v3790_v52 = vshrl.u32 %v3575_v26, 16 }
 0x391   :  { %4135 = vrot.lane.b32.xlu0 %v4124_v62, %s5238_s5  ;;  %v3447_v32 = vsel %vm5841_vm13, %v3442_v36, %v3446_v12  ;;  %v3685_v48 = vrot.slane %v3684_v3, 4  ;;  %v3689_v23 = vrot.slane %v3687_v35, 5  ;;  %v3793_v8 = vshll.u32 %v3575_v26, 16  ;;  %v3592_v35 = vld [vmem:[#allocation3 + $0x9c] sm:$0x1]  ;;  %v7218_v45 = vpop.permute.xlu1 %4043 }
 0x392   :  { %v4120_v2 = vunpack.c.l.b16 %v3447_v32  ;;  %v3698_v33 = vor.u32 %v3697_v41, %v3694_v43  ;;  %v3703_v20 = vrot.slane %v3701_v30, 5  ;;  %v3792_v0 = vrot.slane %v3790_v52, 4  ;;  %v5144_v41 = vld [vmem:[#allocation3 + $0x94] sm:$0xf0]  ;;  %v7224_v52 = vpop.permute.xlu2 %4181 }
 0x393   :  { %v3804_v49 = vshrl.u32 %v3576_v53, 16  ;;  %v3690_v12 = vsel %vm5841_vm13, %v3685_v48, %v3689_v23  ;;  %v3795_v13 = vrot.slane %v3793_v8, 5  ;;  %v3799_v31 = vshll.u32 %v7210_v34, 16 }
 0x394   :  { %v4128_v42 = vpack.c.b16 %v4120_v2, %v4119_v60  ;;  %4103 = vrot.lane.b32.xlu1 %v5038_v10, %s5235_s21  ;;  %v3699_v54 = vrot.slane %v3698_v33, 4  ;;  %v3807_v62 = vshll.u32 %v3576_v53, 16  ;;  %v4247_v36 = vunpack.c.l.b16 %v3690_v12  ;;  %v5069_v10 = vld [vmem:[#allocation3 + $0x90] sm:$0xf] }
 0x395   :  { %v3806_v26 = vrot.slane %v3804_v49, 4  ;;  %v3796_v57 = vor.u32 %v3795_v13, %v3792_v0  ;;  %v3813_v60 = vshll.u32 %v3592_v35, 16  ;;  %v4957_v3 = vrot.slane %v3462_v29, 9 }
 0x396   :  { %4143 = vrot.lane.b32.xlu2 %v4128_v42, %s5238_s5  ;;  %v3704_v43 = vsel %vm5841_vm13, %v3699_v54, %v3703_v20  ;;  %v3809_v32 = vrot.slane %v3807_v62, 5  ;;  %v3554_v7 = vrot.slane %v7177_v16, 5  ;;  %v4958_v30 = vrot.slane %v3463_v46, 9  ;;  %v3831_v20 = vld [vmem:[#allocation3 + $0x90] sm:$0xe] }
 0x397   :  { %v4248_v53 = vunpack.c.l.b16 %v3704_v43  ;;  %v3797_v2 = vrot.slane %v3796_v57, 4  ;;  %v3801_v48 = vrot.slane %v3799_v31, 5  ;;  %v3558_v23 = vrot.slane %v7191_v14, 5  ;;  %v4469_v16 = vld [vmem:[%s7525_s2 + $0x20] sm:$0xf]  ;;  %v7238_v46 = vpop.permute.xlu0 %4039 }
 0x398   :  { %v3810_v8 = vor.u32 %v3809_v32, %v3806_v26  ;;  %v3815_v33 = vrot.slane %v3813_v60, 5  ;;  %v5070_v29 = vor.u32 %v5144_v41, %v5069_v10  ;;  %v3555_v12 = vsel %vm5625_vm10, %v4957_v3, %v3554_v7  ;;  %v3832_v31 = vld [vmem:[#allocation3 + $0x98] sm:$0xe] }
 0x399   :  { %v4260_v0 = vpack.c.b16 %v4248_v53, %v4247_v36  ;;  %v3802_v49 = vsel %vm5841_vm13, %v3797_v2, %v3801_v48  ;;  %v3559_v13 = vsel %vm5625_vm10, %v4958_v30, %v3558_v23  ;;  %v4973_v26 = vrot.slane %v3831_v20, 9  ;;  %v7242_v62 = vpop.permute.xlu1 %4179  ;;  %v4977_v2 = vld [vmem:[#allocation3] sm:$0xf]  ;;  %v5121_v48 = vld [vmem:[#allocation3 + $0x4] sm:$0xf0]  ;;  %v5148_v23 = vld [vmem:[%s7525_s2 + $0x18] sm:$0xff] }
 0x39a   :  { %v3811_v42 = vrot.slane %v3810_v8, 4  ;;  %v4255_v14 = vunpack.c.l.b16 %v3802_v49  ;;  %v4487_v36 = vunpack.c.l.b16 %v4469_v16  ;;  %v4159_v60 = vunpack.c.l.b16 %v3555_v12  ;;  %v4002_v30 = vpop.permute.xlu2 %4001  ;;  %v5147_v20 = vld [vmem:[%s7525_s2 + $0x10] sm:$0xff]  ;;  %v5125_v12 = vld [vmem:[#allocation3 + $0x54] sm:$0xf0] }
 0x39b   :  { %4271 = vrot.lane.b32.xlu0 %v4260_v0, %s5246_s22  ;;  %v4160_v10 = vunpack.c.l.b16 %v3559_v13  ;;  %v3923_v3 = vrot.slane %v7210_v34, 5  ;;  %v4974_v43 = vrot.slane %v3832_v31, 9  ;;  %v3927_v32 = vrot.slane %v3592_v35, 5 }
 0x39c   :  { %4239 = vrot.lane.b32.xlu1 %v5070_v29, %s5243_s18  ;;  %v3816_v54 = vsel %vm5841_vm13, %v3811_v42, %v3815_v33  ;;  %v4492_v41 = vpack.c.b16 %v4487_v36, %v4487_v36  ;;  %v4978_v0 = vor.u32 %v5121_v48, %v4977_v2  ;;  %vm4427_vm13 = vcmask 457728  }
 0x39d   :  { %v4256_v57 = vunpack.c.l.b16 %v3816_v54  ;;  %v4168_v25 = vpack.c.b16 %v4160_v10, %v4159_v60  ;;  %v3924_v8 = vsel %vm5625_vm10, %v4973_v26, %v3923_v3  ;;  %v3928_v34 = vsel %vm5625_vm10, %v4974_v43, %v3927_v32  ;;  %v5122_v32 = vld [vmem:[#allocation3 + $0x14] sm:$0xf0] }
 0x39e   :  { %v4516_v53 = vsel %vm4514_vm2, %v4492_v41, 0  ;;  %v4295_v49 = vunpack.c.l.b16 %v3924_v8  ;;  %v4296_v29 = vunpack.c.l.b16 %v3928_v34  ;;  %v4994_v26 = vor.u32 %v5125_v12, %v4993_v9 }
 0x39f   :  { %v4264_v7 = vpack.c.b16 %v4256_v57, %v4255_v14  ;;  %4521 = vmatpush.bf16.msra.mxu1 %v4516_v53  ;;  %5152 = vmatpush.bf16.msra.mxu2 %v4516_v53  ;;  %v3994_v35 = vpop.permute.xlu0 %3993  ;;  %v5146_v14 = vld [vmem:[%s7525_s2 + $0x8] sm:$0xff]  ;;  %vm4393_vm10 = vcmask 326656   ;;  %vm4497_vm14 = vcmask 588800  }
 0x3a0   :  { %v4323_v16 = vsel %vm2065_vm15, %v4978_v0, %v3994_v35  ;;  %v4304_v42 = vpack.c.b16 %v4296_v29, %v4295_v49  ;;  %v4335_v10 = vsel %vm2065_vm15, %v4994_v26, %v4002_v30 }
 0x3a1   :  { %4279 = vrot.lane.b32.xlu2 %v4264_v7, %s5246_s22  ;;  %v7254_v33 = vpop.permute.xlu1 %4317  ;;  %v4346_v13 = vsel %vm2099_vm4, %v4323_v16, %v7145_v28  ;;  %v5145_v28 = vld [vmem:[%s7525_s2] sm:$0xff]  ;;  %v4354_v43 = vsel %vm2099_vm4, %v4335_v10, %v7141_v58  ;;  %v5001_v10 = vld [vmem:[#allocation3 + $0x70] sm:$0xf] }
 0x3a2   :  { %v4138_v31 = vpop.permute.xlu2 %4137  ;;  %v4362_v57 = vsel %vm2133_vm6, %v4346_v13, %v7014_v19  ;;  %v4981_v19 = vld [vmem:[#allocation3 + $0x10] sm:$0xf]  ;;  %v4370_v30 = vsel %vm2133_vm6, %v4354_v43, %v7068_v27 }
 0x3a3   :  { %4183 = vrot.lane.b32.xlu0 %v4168_v25, %s5244_s19  ;;  %4522 = vmatpush.bf16.msra.mxu1 %v5148_v23  ;;  %v4386_v25 = vsel %vm2167_vm8, %v4370_v30, %v4138_v31  ;;  %v4982_v2 = vor.u32 %v5122_v32, %v4981_v19 }
 0x3a4   :  { %5153 = vmatpush.bf16.msra.mxu2 %v5148_v23  ;;  %v4403_v23 = vsel %vm4393_vm10, %v4386_v25, %v7164_v40 }
 0x3a5   :  { %v4420_v8 = vsel %vm4410_vm11, %v4403_v23, %v7086_v56 }
 0x3a7   :  { %4523 = vmatpush.bf16.msra.mxu1 %v5147_v20  ;;  %v4130_v54 = vpop.permute.xlu0 %4129 }
 0x3a8   :  { %5154 = vmatpush.bf16.msra.mxu2 %v5147_v20  ;;  %v4378_v60 = vsel %vm2167_vm8, %v4362_v57, %v4130_v54 }
 0x3a9   :  { %v7266_v36 = vpop.permute.xlu1 %4175  ;;  %v4395_v3 = vsel %vm4393_vm10, %v4378_v60, %v7169_v37  ;;  %v4985_v60 = vld [vmem:[#allocation3 + $0x20] sm:$0xf] }
 0x3aa   :  { %v4412_v41 = vsel %vm4410_vm11, %v4395_v3, %v7030_v50  ;;  %v3996_v53 = vpop.permute.xlu2 %3995  ;;  %v5127_v3 = vld [vmem:[#allocation3 + $0x74] sm:$0xf0] }
 0x3ab   :  { %4319 = vrot.lane.b32.xlu0 %v4304_v42, %s5245_s20  ;;  %4524 = vmatpush.bf16.msra.mxu1 %v5146_v14  ;;  %v4326_v50 = vsel %vm2065_vm15, %v4982_v2, %v3996_v53  ;;  %v5002_v32 = vor.u32 %v5127_v3, %v5001_v10 }
 0x3ac   :  { %5155 = vmatpush.bf16.msra.mxu2 %v5146_v14  ;;  %v4348_v27 = vsel %vm2099_vm4, %v4326_v50, %v7203_v15 }
 0x3af   :  { %4525 = vmatpush.bf16.msra.mxu1 %v5145_v28  ;;  %v4266_v7 = vpop.permute.xlu0 %4265 }
 0x3b0   :  { %5156 = vmatpush.bf16.msra.mxu2 %v5145_v28  ;;  %v4429_v58 = vsel %vm4427_vm13, %v4412_v41, %v4266_v7 }
 0x3b1   :  { %v7283_v37 = vpop.permute.xlu1 %4311  ;;  %v4446_v48 = vsel %vm4444_vm12, %v4429_v58, %v7185_v18  ;;  %v4364_v18 = vsel %vm2133_vm6, %v4348_v27, %v7061_v21  ;;  %v4997_v21 = vld [vmem:[#allocation3 + $0x60] sm:$0xf] }
 0x3b2   :  { %5087 = vmatmul.msk.bf16.vlgmr.msra.gmra.mxu1 %vm4497_vm14, %v4446_v48 }
 0x3b7   :  { %v4274_v34 = vpop.permute.xlu0 %4273 }
 0x3b8   :  { %v4437_v0 = vsel %vm4427_vm13, %v4420_v8, %v4274_v34  ;;  %v4989_v8 = vld [vmem:[#allocation3 + $0x30] sm:$0xf] }
 0x3b9   :  { %v4132_v35 = vpop.permute.xlu1 %4131  ;;  %v4454_v49 = vsel %vm4444_vm12, %v4437_v0, %v7120_v38  ;;  %v5126_v38 = vld [vmem:[#allocation3 + $0x64] sm:$0xf0] }
 0x3ba   :  { %v4380_v29 = vsel %vm2167_vm8, %v4364_v18, %v4132_v35  ;;  %5091 = vmatmul.msk.bf16.vlgmr.msra.gmra.mxu2 %vm4497_vm14, %v4454_v49  ;;  %v4998_v9 = vor.u32 %v5126_v38, %v4997_v21 }
 0x3bb   :  { %v4397_v40 = vsel %vm4393_vm10, %v4380_v29, %v7143_v11 }
 0x3bc   :  { %v4414_v56 = vsel %vm4410_vm11, %v4397_v40, %v7079_v4  ;;  %v5005_v40 = vld [vmem:[#allocation3 + $0x80] sm:$0xf] }
 0x3c1   :  { %v4268_v15 = vpop.permute.xlu1 %4267 }
 0x3c2   :  { %v4431_v20 = vsel %vm4427_vm13, %v4414_v56, %v4268_v15  ;;  %v5128_v56 = vld [vmem:[#allocation3 + $0x84] sm:$0xf0] }
 0x3c3   :  { %v4448_v16 = vsel %vm4444_vm12, %v4431_v20, %v7166_v63 }
 0x3c4   :  { %5088 = vmatmul.msk.bf16.gmra.mxu1 %vm4497_vm14, %v4448_v16 }
 0x3c7   :  { %v4004_v42 = vpop.permute.xlu0 %4003 }
 0x3c8   :  { %v4338_v12 = vsel %vm2065_vm15, %v4998_v9, %v4004_v42 }
 0x3c9   :  { %v4356_v11 = vsel %vm2099_vm4, %v4338_v12, %v7218_v45  ;;  %v4134_v45 = vpop.permute.xlu2 %4133 }
 0x3ca   :  { %v4372_v4 = vsel %vm2133_vm6, %v4356_v11, %v7048_v22  ;;  %v5123_v22 = vld [vmem:[#allocation3 + $0x24] sm:$0xf0] }
 0x3cb   :  { %v4986_v28 = vor.u32 %v5123_v22, %v4985_v60 }
 0x3d1   :  { %v4276_v31 = vpop.permute.xlu1 %4275 }
 0x3d7   :  { %v4140_v13 = vpop.permute.xlu0 %4139 }
 0x3d8   :  { %v4388_v14 = vsel %vm2167_vm8, %v4372_v4, %v4140_v13 }
 0x3d9   :  { %v4405_v63 = vsel %vm4393_vm10, %v4388_v14, %v7242_v62 }
 0x3da   :  { %v4422_v54 = vsel %vm4410_vm11, %v4405_v63, %v7063_v44 }
 0x3db   :  { %v4439_v26 = vsel %vm4427_vm13, %v4422_v54, %v4276_v31 }
 0x3dc   :  { %v4456_v57 = vsel %vm4444_vm12, %v4439_v26, %v7179_v24  ;;  %v4270_v24 = vpop.permute.xlu2 %4269 }
 0x3dd   :  { %5092 = vmatmul.msk.bf16.gmra.mxu2 %vm4497_vm14, %v4456_v57 }
 0x3e1   :  { %v4006_v19 = vpop.permute.xlu1 %4005 }
 0x3e2   :  { %v4341_v30 = vsel %vm2065_vm15, %v5002_v32, %v4006_v19 }
 0x3e6   :  { %v3998_v43 = vpop.permute.xlu0 %3997 }
 0x3e7   :  { %v4329_v62 = vsel %vm2065_vm15, %v4986_v28, %v3998_v43 }
 0x3e8   :  { %v4350_v44 = vsel %vm2099_vm4, %v4329_v62, %v7181_v61  ;;  %v4358_v61 = vsel %vm2099_vm4, %v4341_v30, %v7201_v1 }
 0x3e9   :  { %v4366_v41 = vsel %vm2133_vm6, %v4350_v44, %v7104_v39  ;;  %v4374_v39 = vsel %vm2133_vm6, %v4358_v61, %v7098_v6  ;;  %v5124_v6 = vld [vmem:[#allocation3 + $0x34] sm:$0xf0] }
 0x3ea   :  { %v4382_v7 = vsel %vm2167_vm8, %v4366_v41, %v4134_v45  ;;  %v4990_v34 = vor.u32 %v5124_v6, %v4989_v8 }
 0x3eb   :  { %v4399_v53 = vsel %vm4393_vm10, %v4382_v7, %v7199_v51 }
 0x3ec   :  { %v4416_v58 = vsel %vm4410_vm11, %v4399_v53, %v7122_v47  ;;  %v4278_v47 = vpop.permute.xlu2 %4277 }
 0x3ed   :  { %v4433_v25 = vsel %vm4427_vm13, %v4416_v58, %v4270_v24 }
 0x3ee   :  { %v4450_v2 = vsel %vm4444_vm12, %v4433_v25, %v7216_v59  ;;  %v4048_v27 = vpop.permute.xlu0 %4047 }
 0x3ef   :  { %5089 = vmatmul.msk.bf16.gmra.mxu1 %vm4497_vm14, %v4450_v2 }
 0x3f1   :  { %v4142_v48 = vpop.permute.xlu1 %4141 }
 0x3f2   :  { %v4390_v50 = vsel %vm2167_vm8, %v4374_v39, %v4142_v48 }
 0x3f3   :  { %v4407_v51 = vsel %vm4393_vm10, %v4390_v50, %v7224_v52 }
 0x3f4   :  { %v4424_v23 = vsel %vm4410_vm11, %v4407_v51, %v7118_v5  ;;  %v4008_v29 = vpop.permute.xlu2 %4007 }
 0x3f5   :  { %v4441_v1 = vsel %vm4427_vm13, %v4424_v23, %v4278_v47 }
 0x3f6   :  { %v4458_v59 = vsel %vm4444_vm12, %v4441_v1, %v7254_v33 }
 0x3f7   :  { %5093 = vmatmul.msk.bf16.gmra.mxu2 %vm4497_vm14, %v4458_v59 }
 0x3fc   :  { %v4144_v42 = vpop.permute.xlu2 %4143 }
 0x3fe   :  { %v4000_v35 = vpop.permute.xlu1 %3999 }
 0x3ff   :  { %v4332_v0 = vsel %vm2065_vm15, %v4990_v34, %v4000_v35 }
 0x400   :  { %v4352_v52 = vsel %vm2099_vm4, %v4332_v0, %v7238_v46  ;;  %v5006_v46 = vor.u32 %v5128_v56, %v5005_v40 }
 0x401   :  { %v4368_v5 = vsel %vm2133_vm6, %v4352_v52, %v7081_v17 }
 0x402   :  { %v4344_v17 = vsel %vm2065_vm15, %v5006_v46, %v4008_v29 }
 0x403   :  { %v4136_v18 = vpop.permute.xlu0 %4135 }
 0x404   :  { %v4384_v49 = vsel %vm2167_vm8, %v4368_v5, %v4136_v18  ;;  %v4280_v14 = vpop.permute.xlu2 %4279 }
 0x405   :  { %v4401_v33 = vsel %vm4393_vm10, %v4384_v49, %v7266_v36  ;;  %v4360_v36 = vsel %vm2099_vm4, %v4344_v17, %v4048_v27 }
 0x406   :  { %v4104_v15 = vpop.permute.xlu1 %4103  ;;  %v4418_v20 = vsel %vm4410_vm11, %v4401_v33, %v7100_v55 }
 0x407   :  { %v4376_v9 = vsel %vm2133_vm6, %v4360_v36, %v4104_v15 }
 0x408   :  { %v4392_v11 = vsel %vm2167_vm8, %v4376_v9, %v4144_v42 }
 0x40d   :  { %v4272_v16 = vpop.permute.xlu0 %4271 }
 0x40e   :  { %v4435_v21 = vsel %vm4427_vm13, %v4418_v20, %v4272_v16  ;;  %v4240_v55 = vpop.permute.xlu1 %4239 }
 0x40f   :  { %v4452_v38 = vsel %vm4444_vm12, %v4435_v21, %v7283_v37 }
 0x410   :  { %5090 = vmatmul.msk.bf16.gmra.mxu1 %vm4497_vm14, %v4452_v38 }
 0x415   :  { %v4184_v12 = vpop.permute.xlu0 %4183 }
 0x416   :  { %v4409_v4 = vsel %vm4393_vm10, %v4392_v11, %v4184_v12 }
 0x417   :  { %v4426_v13 = vsel %vm4410_vm11, %v4409_v4, %v4240_v55 }
 0x418   :  { %v4443_v37 = vsel %vm4427_vm13, %v4426_v13, %v4280_v14 }
 0x41d   :  { %v4320_v63 = vpop.permute.xlu0 %4319 }
 0x41e   :  { %v4460_v31 = vsel %vm4444_vm12, %v4443_v37, %v4320_v63 }
 0x41f   :  { %5094 = vmatmul.msk.bf16.gmra.mxu2 %vm4497_vm14, %v4460_v31 }
 0x42f   :  { %v7377_v54 = vpop.f32.mrf.mxu1 }
 0x430   :  { %v4605_v62 = vmul.f32 %v7377_v54, %v7377_v54  ;;  %v4567_v41 = vsel %vm2065_vm15, %v7377_v54, 0.0 }
 0x432   :  { %v4621_v58 = vsel %vm2065_vm15, %v4605_v62, 0.0 }
 0x437   :  { %v7379_v26 = vpop.f32.mrf.mxu1 }
 0x438   :  { %v4606_v43 = vmul.f32 %v7379_v26, %v7379_v26  ;;  %v4568_v44 = vsel %vm2065_vm15, %v7379_v26, 0.0 }
 0x439   :  { %v4569_v53 = vadd.f32 %v4568_v44, %v4567_v41 }
 0x43a   :  { %v4622_v24 = vsel %vm2065_vm15, %v4606_v43, 0.0 }
 0x43b   :  { %v4623_v39 = vadd.f32 %v4622_v24, %v4621_v58 }
 0x43d   :  { %v7383_v45 = vpop.f32.mrf.mxu2 }
 0x43e   :  { %v4613_v15 = vmul.f32 %v7383_v45, %v7383_v45  ;;  %v4582_v38 = vsel %vm2065_vm15, %v7383_v45, 0.0 }
 0x440   :  { %v4636_v12 = vsel %vm2065_vm15, %v4613_v15, 0.0 }
 0x441   :  { %v7381_v57 = vpop.f32.mrf.mxu1 }
 0x442   :  { %v4607_v32 = vmul.f32 %v7381_v57, %v7381_v57  ;;  %v4570_v7 = vsel %vm2065_vm15, %v7381_v57, 0.0 }
 0x443   :  { %v4571_v48 = vadd.f32 %v4570_v7, %v4569_v53 }
 0x444   :  { %v4624_v25 = vsel %vm2065_vm15, %v4607_v32, 0.0 }
 0x445   :  { %v7387_v22 = vpop.f32.mrf.mxu2  ;;  %v4625_v1 = vadd.f32 %v4624_v25, %v4623_v39 }
 0x446   :  { %v4614_v17 = vmul.f32 %v7387_v22, %v7387_v22  ;;  %v4584_v11 = vsel %vm2065_vm15, %v7387_v22, 0.0 }
 0x448   :  { %v4638_v63 = vsel %vm2065_vm15, %v4614_v17, 0.0 }
 0x449   :  { %v7385_v60 = vpop.f32.mrf.mxu1 }
 0x44a   :  { %v4608_v30 = vmul.f32 %v7385_v60, %v7385_v60  ;;  %v4572_v61 = vsel %vm2065_vm15, %v7385_v60, 0.0 }
 0x44b   :  { %v4573_v59 = vadd.f32 %v4572_v61, %v4571_v48 }
 0x44c   :  { %v4626_v51 = vsel %vm2065_vm15, %v4608_v30, 0.0 }
 0x44d   :  { %v4627_v35 = vadd.f32 %v4626_v51, %v4625_v1 }
 0x460   :  { %v7391_v10 = vpop.f32.mrf.mxu2 }
 0x461   :  { %v4615_v55 = vmul.f32 %v7391_v10, %v7391_v10  ;;  %v4586_v37 = vsel %vm2065_vm15, %v7391_v10, 0.0 }
 0x463   :  { %v4640_v44 = vsel %vm2065_vm15, %v4615_v55, 0.0 }
 0x468   :  { %v7397_v19 = vpop.f32.mrf.mxu2 }
 0x469   :  { %v4616_v31 = vmul.f32 %v7397_v19, %v7397_v19  ;;  %v4588_v32 = vsel %vm2065_vm15, %v7397_v19, 0.0 }
 0x46b   :  { %v4642_v30 = vsel %vm2065_vm15, %v4616_v31, 0.0 }
 0x46c   :  { %v7389_v28 = vpop.f32.mrf.mxu1 }
 0x46d   :  { %v4609_v2 = vmul.f32 %v7389_v28, %v7389_v28  ;;  %v4574_v47 = vsel %vm2065_vm15, %v7389_v28, 0.0 }
 0x46e   :  { %v4575_v0 = vadd.f32 %v4574_v47, %v4573_v59 }
 0x46f   :  { %v4628_v27 = vsel %vm2065_vm15, %v4609_v2, 0.0 }
 0x470   :  { %v4629_v5 = vadd.f32 %v4628_v27, %v4627_v35 }
 0x474   :  { %v7393_v3 = vpop.f32.mrf.mxu1 }
 0x475   :  { %v4610_v23 = vmul.f32 %v7393_v3, %v7393_v3  ;;  %v4576_v8 = vsel %vm2065_vm15, %v7393_v3, 0.0 }
 0x476   :  { %v4577_v49 = vadd.f32 %v4576_v8, %v4575_v0 }
 0x477   :  { %v4630_v52 = vsel %vm2065_vm15, %v4610_v23, 0.0 }
 0x478   :  { %v4631_v33 = vadd.f32 %v4630_v52, %v4629_v5 }
 0x47a   :  { %v7428_v6 = vpop.f32.mrf.mxu2 }
 0x47b   :  { %v4617_v41 = vmul.f32 %v7428_v6, %v7428_v6  ;;  %v4590_v53 = vsel %vm2065_vm15, %v7428_v6, 0.0 }
 0x47d   :  { %v4644_v2 = vsel %vm2065_vm15, %v4617_v41, 0.0 }
 0x482   :  { %v7454_v4 = vpop.f32.mrf.mxu2 }
 0x483   :  { %v4618_v39 = vmul.f32 %v7454_v4, %v7454_v4  ;;  %v4592_v51 = vsel %vm2065_vm15, %v7454_v4, 0.0 }
 0x485   :  { %v4646_v1 = vsel %vm2065_vm15, %v4618_v39, 0.0 }
 0x48d   :  { %v7418_v50 = vpop.f32.mrf.mxu1 }
 0x48e   :  { %v4611_v34 = vmul.f32 %v7418_v50, %v7418_v50  ;;  %v4578_v18 = vsel %vm2065_vm15, %v7418_v50, 0.0 }
 0x48f   :  { %v4579_v40 = vadd.f32 %v4578_v18, %v4577_v49 }
 0x490   :  { %v4632_v29 = vsel %vm2065_vm15, %v4611_v34, 0.0 }
 0x491   :  { %v4633_v21 = vadd.f32 %v4632_v29, %v4631_v33 }
 0x495   :  { %v7436_v56 = vpop.f32.mrf.mxu1 }
 0x496   :  { %v4580_v20 = vsel %vm2065_vm15, %v7436_v56, 0.0  ;;  %v4612_v16 = vmul.f32 %v7436_v56, %v7436_v56 }
 0x497   :  { %v4581_v46 = vadd.f32 %v4580_v20, %v4579_v40 }
 0x498   :  { %v4634_v42 = vsel %vm2065_vm15, %v4612_v16, 0.0 }
 0x499   :  { %v4583_v36 = vadd.f32 %v4582_v38, %v4581_v46  ;;  %v4635_v9 = vadd.f32 %v4634_v42, %v4633_v21 }
 0x49b   :  { %v4585_v13 = vadd.f32 %v4584_v11, %v4583_v36  ;;  %v4637_v14 = vadd.f32 %v4636_v12, %v4635_v9  ;;  %v7561_v9 = vld [vmem:[#allocation4_spill] sm:$0xff] }
 0x49d   :  { %v4587_v43 = vadd.f32 %v4586_v37, %v4585_v13  ;;  %v4639_v62 = vadd.f32 %v4638_v63, %v4637_v14 }
 0x49f   :  { %v4641_v24 = vadd.f32 %v4640_v44, %v4639_v62  ;;  %v4589_v7 = vadd.f32 %v4588_v32, %v4587_v43  ;;  %v535_v32 = vld [vmem:[%s7524_s3 + $0x2] sm:$0x1] }
 0x4a1   :  { %v4643_v58 = vadd.f32 %v4642_v30, %v4641_v24  ;;  %v4591_v61 = vadd.f32 %v4590_v53, %v4589_v7  ;;  %v536_v30 = vld [vmem:[%s7524_s3 + $0x3] sm:$0x1] }
 0x4a2   :  { %v7469_v25 = vpop.f32.mrf.mxu2 }
 0x4a3   :  { %v4645_v48 = vadd.f32 %v4644_v2, %v4643_v58  ;;  %v4619_v47 = vmul.f32 %v7469_v25, %v7469_v25  ;;  %v4593_v23 = vadd.f32 %v4592_v51, %v4591_v61  ;;  %v4594_v59 = vsel %vm2065_vm15, %v7469_v25, 0.0 }
 0x4a5   :  { %v4647_v27 = vadd.f32 %v4646_v1, %v4645_v48  ;;  %v4648_v8 = vsel %vm2065_vm15, %v4619_v47, 0.0  ;;  %v4595_v34 = vadd.f32 %v4594_v59, %v4593_v23 }
 0x4a7   :  { %v4649_v18 = vadd.f32 %v4648_v8, %v4647_v27 }
 0x4aa   :  { %v7482_v35 = vpop.f32.mrf.mxu2 }
 0x4ab   :  { %v4596_v0 = vsel %vm2065_vm15, %v7482_v35, 0.0  ;;  %v4620_v52 = vmul.f32 %v7482_v35, %v7482_v35 }
 0x4ac   :  { %v4597_v5 = vadd.f32 %v4596_v0, %v4595_v34 }
 0x4ad   :  { %v4650_v49 = vsel %vm2065_vm15, %v4620_v52, 0.0 }
 0x4ae   :  { %v4598_v29 = vrot.slane %v4597_v5, 4  ;;  %v4651_v33 = vadd.f32 %v4650_v49, %v4649_v18 }
 0x4b0   :  { %v4599_v40 = vadd.f32 %v4598_v29, %v4597_v5  ;;  %v4652_v15 = vrot.slane %v4651_v33, 4 }
 0x4b2   :  { %v4600_v20 = vrot.slane %v4599_v40, 2  ;;  %v4653_v16 = vadd.f32 %v4652_v15, %v4651_v33 }
 0x4b4   :  { %v4601_v21 = vadd.f32 %v4600_v20, %v4599_v40  ;;  %v4654_v46 = vrot.slane %v4653_v16, 2 }
 0x4b6   :  { %v4602_v38 = vrot.slane %v4601_v21, 1  ;;  %v4655_v17 = vadd.f32 %v4654_v46, %v4653_v16 }
 0x4b8   :  { %v4603_v42 = vadd.f32 %v4602_v38, %v4601_v21  ;;  %v4656_v36 = vrot.slane %v4655_v17, 1 }
 0x4ba   :  { %v4604_v12 = vmul.f32 %v4603_v42, %v7561_v9  ;;  %v4657_v11 = vadd.f32 %v4656_v36, %v4655_v17 }
 0x4bc   :  { %v4658_v55 = vmul.f32 %v4657_v11, %v7561_v9  ;;  %v4659_v13 = vmul.f32 %v4604_v12, %v4604_v12 }
 0x4be   :  { %v4660_v14 = vsub.f32 %v4658_v55, %v4659_v13 }
 0x4c0   :  { %v4661_v63 = vadd.f32 1e-05, %v4660_v14 }
 0x4c2   :  { %5216 = vrsqrt.f32 %v4661_v63  ;;  %vm4668_vm4 = vweird.f32 %v4661_v63 }
 0x4c8   :  { %v5217_v37 = vpop.eup %5216 }
 0x4c9   :  { %v4663_v31 = vmul.f32 %v5217_v37, %v4661_v63  ;;  %vm4669_vm15 = vweird.f32 %v5217_v37 }
 0x4ca   :  { %vm4670_vm6 = vmor %vm4668_vm4, %vm4669_vm15 }
 0x4cb   :  { %v4664_v43 = vmul.f32 %v5217_v37, %v4663_v31 }
 0x4cd   :  { %v4665_v62 = vmul.f32 0.5, %v4664_v43 }
 0x4cf   :  { %v4666_v44 = vsub.f32 1.5, %v4665_v62 }
 0x4d1   :  { %v4667_v41 = vmul.f32 %v5217_v37, %v4666_v44 }
 0x4d3   :  { %v4671_v24 = vsel %vm4670_vm6, %v5217_v37, %v4667_v41 }
 0x4d4   :  { %v4672_v7 = vmul.f32 %v4671_v24, %v535_v32 }
 0x4d6   :  { %v4673_v53 = vmul.f32 %v4672_v7, %v4604_v12  ;;  %v4675_v58 = vperm.slane %v4672_v7, 0 }
 0x4d8   :  { %v4674_v61 = vsub.f32 %v536_v30, %v4673_v53  ;;  %v4676_v39 = vmul.f32 %v4675_v58, %v7377_v54  ;;  %v4677_v47 = vmul.f32 %v4675_v58, %v7379_v26  ;;  %v4678_v59 = vmul.f32 %v4675_v58, %v7381_v57 }
 0x4d9   :  { %v4679_v34 = vmul.f32 %v4675_v58, %v7385_v60  ;;  %v4680_v54 = vmul.f32 %v4675_v58, %v7389_v28  ;;  %v4681_v26 = vmul.f32 %v4675_v58, %v7393_v3  ;;  %v4682_v57 = vmul.f32 %v4675_v58, %v7418_v50 }
 0x4da   :  { %v4692_v2 = vperm.slane %v4674_v61, 0  ;;  %v4683_v60 = vmul.f32 %v4675_v58, %v7436_v56  ;;  %v4684_v28 = vmul.f32 %v4675_v58, %v7383_v45  ;;  %v4685_v3 = vmul.f32 %v4675_v58, %v7387_v22 }
 0x4db   :  { %v4686_v50 = vmul.f32 %v4675_v58, %v7391_v10  ;;  %v4687_v56 = vmul.f32 %v4675_v58, %v7397_v19  ;;  %v4688_v45 = vmul.f32 %v4675_v58, %v7428_v6  ;;  %v4689_v22 = vmul.f32 %v4675_v58, %v7454_v4 }
 0x4dc   :  { %v4693_v48 = vadd.f32 %v4692_v2, %v4676_v39  ;;  %v4694_v23 = vadd.f32 %v4692_v2, %v4677_v47  ;;  %v4695_v27 = vadd.f32 %v4692_v2, %v4678_v59  ;;  %v4696_v0 = vadd.f32 %v4692_v2, %v4679_v34 }
 0x4dd   :  { %v4697_v18 = vadd.f32 %v4692_v2, %v4680_v54  ;;  %v4698_v49 = vadd.f32 %v4692_v2, %v4681_v26  ;;  %v4699_v33 = vadd.f32 %v4692_v2, %v4682_v57  ;;  %v4700_v15 = vadd.f32 %v4692_v2, %v4683_v60 }
 0x4de   :  { %v4709_v51 = vmax.f32 %v4693_v48, 0.0  ;;  %v4710_v1 = vmax.f32 %v4694_v23, 0.0  ;;  %v4711_v8 = vmax.f32 %v4695_v27, 0.0  ;;  %v4712_v52 = vmax.f32 %v4696_v0, 0.0 }
 0x4df   :  { %v4713_v5 = vmax.f32 %v4697_v18, 0.0  ;;  %v4714_v29 = vmax.f32 %v4698_v49, 0.0  ;;  %v4715_v40 = vmax.f32 %v4699_v33, 0.0  ;;  %v4716_v20 = vmax.f32 %v4700_v15, 0.0 }
 0x4e0   :  { %4725 = vxpose.xlu1.b32.start [1/16] (narrow) %v4709_v51, 8  ;;  %v4701_v16 = vadd.f32 %v4692_v2, %v4684_v28  ;;  %v4702_v46 = vadd.f32 %v4692_v2, %v4685_v3  ;;  %v4703_v17 = vadd.f32 %v4692_v2, %v4686_v50  ;;  %v4704_v36 = vadd.f32 %v4692_v2, %v4687_v56 }
 0x4e1   :  { %v4705_v12 = vadd.f32 %v4692_v2, %v4688_v45  ;;  %v4706_v55 = vadd.f32 %v4692_v2, %v4689_v22  ;;  %v4690_v10 = vmul.f32 %v4675_v58, %v7469_v25  ;;  %v4691_v37 = vmul.f32 %v4675_v58, %v7482_v35 }
 0x4e2   :  { %v4717_v21 = vmax.f32 %v4701_v16, 0.0  ;;  %v4718_v38 = vmax.f32 %v4702_v46, 0.0  ;;  %v4719_v42 = vmax.f32 %v4703_v17, 0.0  ;;  %v4720_v9 = vmax.f32 %v4704_v36, 0.0 }
 0x4e3   :  { %v4721_v11 = vmax.f32 %v4705_v12, 0.0  ;;  %v4722_v13 = vmax.f32 %v4706_v55, 0.0  ;;  %v4707_v14 = vadd.f32 %v4692_v2, %v4690_v10  ;;  %v4708_v19 = vadd.f32 %v4692_v2, %v4691_v37 }
 0x4e5   :  { %v4723_v63 = vmax.f32 %v4707_v14, 0.0  ;;  %v4724_v31 = vmax.f32 %v4708_v19, 0.0 }
 0x4e8   :  { %4726 = vxpose.xlu1.b32.cont [2/16] (narrow) %v4710_v1, 8 }
 0x4f0   :  { %4727 = vxpose.xlu1.b32.cont [3/16] (narrow) %v4711_v8, 8 }
 0x4f8   :  { %4728 = vxpose.xlu1.b32.cont [4/16] (narrow) %v4712_v52, 8 }
 0x500   :  { %4729 = vxpose.xlu1.b32.cont [5/16] (narrow) %v4713_v5, 8 }
 0x508   :  { %4730 = vxpose.xlu1.b32.cont [6/16] (narrow) %v4714_v29, 8 }
 0x510   :  { %4731 = vxpose.xlu1.b32.cont [7/16] (narrow) %v4715_v40, 8 }
 0x518   :  { %4732 = vxpose.xlu1.b32.cont [8/16] (narrow) %v4716_v20, 8 }
 0x520   :  { %4733 = vxpose.xlu1.b32.cont [9/16] (narrow) %v4717_v21, 8 }
 0x528   :  { %4734 = vxpose.xlu1.b32.cont [10/16] (narrow) %v4718_v38, 8 }
 0x530   :  { %4735 = vxpose.xlu1.b32.cont [11/16] (narrow) %v4719_v42, 8 }
 0x538   :  { %4736 = vxpose.xlu1.b32.cont [12/16] (narrow) %v4720_v9, 8 }
 0x540   :  { %4737 = vxpose.xlu1.b32.cont [13/16] (narrow) %v4721_v11, 8 }
 0x548   :  { %4738 = vxpose.xlu1.b32.cont [14/16] (narrow) %v4722_v13, 8 }
 0x550   :  { %4739 = vxpose.xlu1.b32.cont [15/16] (narrow) %v4723_v63, 8 }
 0x558   :  { %4740 = vxpose.xlu1.b32.end [16/16] (narrow) %v4724_v31, 8 }
 0x584   :  { %v4741_v43 = vpop.trf.xlu1 }
 0x585   :  { %4757 = vst.msk [vmem:[%s7526_s4] sm:$0xff] %vm4444_vm12, %v4741_v43  ;;  %4759 = vrot.lane.b32.xlu2 %v4741_v43, %s5245_s20 }
 0x5df   :  { %v4760_v6 = vpop.permute.xlu2 %4759 }
 0x5e0   :  { %4762 = vst.msk [vmem:[%s7526_s4 + $0x8] sm:$0xff] %vm4444_vm12, %v4760_v6 }

</bundles_post_ra>
